<compile_context>
chip_gen: v6e
topology: v6e:2x2x1
jax: 0.10.0
libtpu: 0.0.40
codegen_flags: <defaults>
</compile_context>

<pallas_src>
import numpy as np
import jax
import jax.numpy as jnp
from jax import lax
from jax.experimental import pallas as pl
from jax.experimental.pallas import tpu as pltpu

LN_EPS = 1e-5  # torch.nn.LayerNorm default


# ----------------------------- small math helpers -----------------------------
def _erf(x):
    # Abramowitz & Stegun 7.1.26 rational approximation, |err| < 1.5e-7
    # (matches torch's exact erf-based GELU to f32 precision).
    a1, a2, a3, a4, a5 = (0.254829592, -0.284496736, 1.421413741,
                          -1.453152027, 1.061405429)
    p = 0.3275911
    sgn = jnp.where(x >= 0.0, 1.0, -1.0)
    ax = jnp.abs(x)
    t = 1.0 / (1.0 + p * ax)
    poly = ((((a5 * t + a4) * t + a3) * t + a2) * t + a1) * t
    return sgn * (1.0 - poly * jnp.exp(-ax * ax))


def _gelu_exact(x):
    return 0.5 * x * (1.0 + _erf(x * 0.7071067811865476))


def _layernorm(x, gamma, beta):
    mu = jnp.mean(x, axis=-1, keepdims=True)
    var = jnp.mean((x - mu) ** 2, axis=-1, keepdims=True)
    return (x - mu) * lax.rsqrt(var + LN_EPS) * gamma + beta


def _pick_row_tile(M, target=512):
    # Largest multiple-of-8 divisor of M that is <= target; fall back to full M.
    upper = min(target, M)
    start = upper - (upper % 8)
    for t in range(start, 7, -8):
        if M % t == 0:
            return t
    return M


def _pick_images_per_step(B, nW, N, target_rows=512):
    # Largest g | B with g*nW*N <= target_rows (fill MXU M dim, amortize step overhead).
    best = 1
    for g in range(1, B + 1):
        if B % g == 0 and g * nW * N <= target_rows:
            best = g
    return best


# ----------------------------- host-side glue ---------------------------------
def relative_position_bias(table, ws, num_heads):
    # Identical index construction to WindowAttention.__init__ (torch.meshgrid is 'ij').
    coords = np.stack(np.meshgrid(np.arange(ws), np.arange(ws), indexing="ij"))
    cf = coords.reshape(2, -1)
    rel = cf[:, :, None] - cf[:, None, :]
    rel = rel.transpose(1, 2, 0).astype(np.int64)
    rel[:, :, 0] += ws - 1
    rel[:, :, 1] += ws - 1
    rel[:, :, 0] *= 2 * ws - 1
    idx = rel.sum(-1).reshape(-1)
    N = ws * ws
    bias = jnp.asarray(table)[idx].reshape(N, N, num_heads)
    return jnp.transpose(bias, (2, 0, 1)).astype(jnp.float32)  # (nH, N, N)


def make_attn_mask(Hp, Wp, ws, shift):
    # Standard Swin shift mask (same as BasicLayer.create_mask in the reference impl).
    img = np.zeros((1, Hp, Wp, 1), np.float32)
    h_slices = (slice(0, -ws), slice(-ws, -shift), slice(-shift, None))
    w_slices = (slice(0, -ws), slice(-ws, -shift), slice(-shift, None))
    cnt = 0
    for hs in h_slices:
        for wsl in w_slices:
            img[:, hs, wsl, :] = cnt
            cnt += 1
    mw = img.reshape(1, Hp // ws, ws, Wp // ws, ws, 1)
    mw = mw.transpose(0, 1, 3, 2, 4, 5).reshape(-1, ws * ws)
    am = mw[:, None, :] - mw[:, :, None]
    am = np.where(am != 0, -100.0, 0.0).astype(np.float32)
    return jnp.asarray(am)  # (nW, N, N)


def window_partition(x, ws):
    B, H, W, C = x.shape
    x = x.reshape(B, H // ws, ws, W // ws, ws, C).transpose(0, 1, 3, 2, 4, 5)
    return x.reshape(-1, ws * ws, C)


def window_reverse(win, ws, Hp, Wp, B, C):
    x = win.reshape(B, Hp // ws, Wp // ws, ws, ws, C).transpose(0, 1, 3, 2, 4, 5)
    return x.reshape(B, Hp, Wp, C)


# ----------------------------- Pallas kernels ---------------------------------
def window_attention_pallas(x_windows, rel_bias, p, num_heads, wt,
                            attn_mask=None, fuse_ln=True):
    """LN1 (optionally fused) + window multi-head attention + output projection.

    x_windows : (B*nW, N, C)   wt windows processed per grid step (wt = g*nW,
                               g whole images per step; grid length == B*nW // wt).
    attn_mask : (wt, N, N) or None (shift == 0 -> mask-free kernel variant).
    """
    Bn, N, C = x_windows.shape
    nH = num_heads
    hd = C // nH
    scale = hd ** (-0.5)
    use_mask = attn_mask is not None
    assert Bn % wt == 0
    if use_mask:
        assert attn_mask.shape[0] == wt, "mask must be tiled to wt windows per step"

    def kernel(*refs):
        i = 0
        x_ref = refs[i]; i += 1
        bias_ref = refs[i]; i += 1
        if use_mask:
            m_ref = refs[i]; i += 1
        if fuse_ln:
            g1_ref = refs[i]; i += 1
            be1_ref = refs[i]; i += 1
        qkvw_ref, qkvb_ref, projw_ref, projb_ref, o_ref = refs[i:]

        x = x_ref[...].astype(jnp.float32)          # (wt, N, C)
        xf = x.reshape(wt * N, C)                   # flatten windows -> fill MXU M dim
        if fuse_ln:
            xf = _layernorm(xf, g1_ref[0], be1_ref[0])

        qkv = jnp.dot(xf, qkvw_ref[...],
                      preferred_element_type=jnp.float32) + qkvb_ref[0]   # (wt*N, 3C)

        ctx_heads = []
        for h in range(nH):                          # static unroll over heads
            q = (qkv[:, h * hd:(h + 1) * hd] * scale).reshape(wt, N, hd)
            k = qkv[:, C + h * hd:C + (h + 1) * hd].reshape(wt, N, hd)
            v = qkv[:, 2 * C + h * hd:2 * C + (h + 1) * hd].reshape(wt, N, hd)
            # batched over windows (single batch dim -> clean MXU lowering)
            s = jnp.einsum("wnd,wmd->wnm", q, k,
                           preferred_element_type=jnp.float32)            # (wt, N, N)
            s = s + bias_ref[h][None]
            if use_mask:
                s = s + m_ref[...]
            s = s - jnp.max(s, axis=-1, keepdims=True)
            e = jnp.exp(s)
            pattn = e * pl.reciprocal(jnp.sum(e, axis=-1, keepdims=True), approx=True)
            ctx = jnp.einsum("wnm,wmd->wnd", pattn, v,
                             preferred_element_type=jnp.float32)          # (wt, N, hd)
            ctx_heads.append(ctx.reshape(wt * N, hd))

        # concat heads, then ONE full-K output projection
        ctx_all = jnp.concatenate(ctx_heads, axis=-1)                     # (wt*N, C)
        y = jnp.dot(ctx_all, projw_ref[...],
                    preferred_element_type=jnp.float32) + projb_ref[0]
        o_ref[...] = y.reshape(wt, N, C).astype(o_ref.dtype)

    def resident(shape):
        return pl.BlockSpec(shape, lambda *_: (0,) * len(shape))

    in_specs = [pl.BlockSpec((wt, N, C), lambda i: (i, 0, 0)),
                resident((nH, N, N))]
    args = [x_windows, rel_bias]
    if use_mask:
        in_specs.append(resident((wt, N, N)))        # full mask resident, no per-step DMA
        args.append(attn_mask)
    if fuse_ln:
        in_specs += [resident((1, C)), resident((1, C))]
        args += [p["g1"], p["beta1"]]
    in_specs += [resident((C, 3 * C)), resident((1, 3 * C)),
                 resident((C, C)), resident((1, C))]
    args += [p["qkv_w"], p["qkv_b"], p["proj_w"], p["proj_b"]]

    return pl.pallas_call(
        kernel,
        out_shape=jax.ShapeDtypeStruct((Bn, N, C), x_windows.dtype),
        grid=(Bn // wt,),
        in_specs=in_specs,
        out_specs=pl.BlockSpec((wt, N, C), lambda i: (i, 0, 0)),
        compiler_params=pltpu.CompilerParams(dimension_semantics=("parallel",)),
    )(*args)


def mlp_residual_pallas(shortcut2d, attn2d, p):
    """Fused: x1 = shortcut + attn;  out = x1 + MLP(LN2(x1))."""
    M, C = shortcut2d.shape
    hidden = p["w1"].shape[1]
    TM = _pick_row_tile(M)   # bigger row tiles -> amortize per-step overhead (mem-bound)

    def kernel(sc_ref, aw_ref, g2_ref, be2_ref, w1_ref, b1_ref, w2_ref, b2_ref, o_ref):
        x1 = sc_ref[...].astype(jnp.float32) + aw_ref[...].astype(jnp.float32)
        xn = _layernorm(x1, g2_ref[0], be2_ref[0])
        h = jnp.dot(xn, w1_ref[...], preferred_element_type=jnp.float32) + b1_ref[0]
        h = _gelu_exact(h)
        y = jnp.dot(h, w2_ref[...], preferred_element_type=jnp.float32) + b2_ref[0]
        o_ref[...] = (x1 + y).astype(o_ref.dtype)

    def resident(shape):
        return pl.BlockSpec(shape, lambda *_: (0,) * len(shape))

    return pl.pallas_call(
        kernel,
        out_shape=jax.ShapeDtypeStruct((M, C), shortcut2d.dtype),
        grid=(M // TM,),
        in_specs=[
            pl.BlockSpec((TM, C), lambda i: (i, 0)),
            pl.BlockSpec((TM, C), lambda i: (i, 0)),
            resident((1, C)), resident((1, C)),
            resident((C, hidden)), resident((1, hidden)),
            resident((hidden, C)), resident((1, C)),
        ],
        out_specs=pl.BlockSpec((TM, C), lambda i: (i, 0)),
        compiler_params=pltpu.CompilerParams(dimension_semantics=("parallel",)),
    )(shortcut2d, attn2d, p["g2"], p["beta2"], p["w1"], p["b1"], p["w2"], p["b2"])


# ----------------------------- full block forward ------------------------------
def swin_block_forward(x, params, H, W, ws, shift, num_heads):
    B, L, C = x.shape
    assert L == H * W
    shortcut = x
    rel_bias = relative_position_bias(params["rel_table"], ws, num_heads)

    pad_b = (ws - H % ws) % ws
    pad_r = (ws - W % ws) % ws
    fuse_ln = (pad_b == 0 and pad_r == 0)
    if fuse_ln:
        xi = x.reshape(B, H, W, C)                 # LN1 fused into the attention kernel
    else:
        # torch applies norm1 BEFORE F.pad: padded tokens must be exactly zero.
        xn = _layernorm(x, params["g1"][0], params["beta1"][0])
        xi = jnp.pad(xn.reshape(B, H, W, C), ((0, 0), (0, pad_b), (0, pad_r), (0, 0)))
    Hp, Wp = H + pad_b, W + pad_r

    if shift > 0:
        xi = jnp.roll(xi, (-shift, -shift), axis=(1, 2))
        attn_mask = make_attn_mask(Hp, Wp, ws, shift)
    else:
        attn_mask = None                            # mask-free kernel specialization

    nW = (Hp // ws) * (Wp // ws)
    N = ws * ws
    g = _pick_images_per_step(B, nW, N)             # batch g whole images per grid step
    wt = g * nW
    if attn_mask is not None and g > 1:
        attn_mask = jnp.tile(attn_mask, (g, 1, 1))  # (g*nW, N, N)

    xw = window_partition(xi, ws)                   # (B*nW, N, C)
    attn_out = window_attention_pallas(xw, rel_bias, params, num_heads,
                                       wt=wt, attn_mask=attn_mask, fuse_ln=fuse_ln)
    aw = window_reverse(attn_out, ws, Hp, Wp, B, C)

    if shift > 0:
        aw = jnp.roll(aw, (shift, shift), axis=(1, 2))
    aw = aw[:, :H, :W, :].reshape(B, L, C)

    # first residual + LN2 + MLP + second residual fused in one Pallas pass
    out = mlp_residual_pallas(shortcut.reshape(B * L, C), aw.reshape(B * L, C), params)
    return out.reshape(B, L, C)


# ----------------------------- pure-JAX reference ------------------------------
def swin_block_reference(x, params, H, W, ws, shift, num_heads):
    B, L, C = x.shape
    hd = C // num_heads
    scale = hd ** (-0.5)
    rel_bias = relative_position_bias(params["rel_table"], ws, num_heads)
    shortcut = x
    xn = _layernorm(x, params["g1"][0], params["beta1"][0])
    xi = xn.reshape(B, H, W, C)
    pad_b = (ws - H % ws) % ws
    pad_r = (ws - W % ws) % ws
    xi = jnp.pad(xi, ((0, 0), (0, pad_b), (0, pad_r), (0, 0)))
    Hp, Wp = H + pad_b, W + pad_r
    if shift > 0:
        xi = jnp.roll(xi, (-shift, -shift), axis=(1, 2))
        mask = make_attn_mask(Hp, Wp, ws, shift)
    else:
        mask = jnp.zeros((1, ws * ws, ws * ws), jnp.float32)
    xw = window_partition(xi, ws)
    Bw, N, _ = xw.shape
    qkv = xw @ params["qkv_w"] + params["qkv_b"][0]
    qkv = qkv.reshape(Bw, N, 3, num_heads, hd).transpose(2, 0, 3, 1, 4)
    q, k, v = qkv[0] * scale, qkv[1], qkv[2]
    attn = jnp.einsum("bhnd,bhmd->bhnm", q, k) + rel_bias[None]
    nW = mask.shape[0]
    attn = attn.reshape(Bw // nW, nW, num_heads, N, N) + mask[None, :, None, :, :]
    attn = jax.nn.softmax(attn.reshape(Bw, num_heads, N, N), axis=-1)
    ctx = jnp.einsum("bhnm,bhmd->bhnd", attn, v).transpose(0, 2, 1, 3).reshape(Bw, N, C)
    aout = ctx @ params["proj_w"] + params["proj_b"][0]
    aw = window_reverse(aout, ws, Hp, Wp, B, C)
    if shift > 0:
        aw = jnp.roll(aw, (shift, shift), axis=(1, 2))
    aw = aw[:, :H, :W, :].reshape(B, H * W, C)
    x1 = shortcut + aw
    xn2 = _layernorm(x1, params["g2"][0], params["beta2"][0])
    h = _gelu_exact(xn2 @ params["w1"] + params["b1"][0])
    return x1 + (h @ params["w2"] + params["b2"][0])


# ----------------------------- main --------------------------------------------
if __name__ == "__main__":
    def make_params(key, C, num_heads, ws, mlp_ratio=4.0):
        hidden = int(C * mlp_ratio)
        ks = jax.random.split(key, 9)
        return {
            "g1": jnp.ones((1, C), jnp.float32),
            "beta1": jnp.zeros((1, C), jnp.float32),
            "g2": jnp.ones((1, C), jnp.float32),
            "beta2": jnp.zeros((1, C), jnp.float32),
            "qkv_w": 0.02 * jax.random.normal(ks[0], (C, 3 * C), jnp.float32),
            "qkv_b": 0.02 * jax.random.normal(ks[1], (1, 3 * C), jnp.float32),
            "proj_w": 0.02 * jax.random.normal(ks[2], (C, C), jnp.float32),
            "proj_b": 0.02 * jax.random.normal(ks[3], (1, C), jnp.float32),
            "w1": 0.02 * jax.random.normal(ks[4], (C, hidden), jnp.float32),
            "b1": 0.02 * jax.random.normal(ks[5], (1, hidden), jnp.float32),
            "w2": 0.02 * jax.random.normal(ks[6], (hidden, C), jnp.float32),
            "b2": 0.02 * jax.random.normal(ks[7], (1, C), jnp.float32),
            "rel_table": 0.02 * jax.random.normal(
                ks[8], ((2 * ws - 1) * (2 * ws - 1), num_heads), jnp.float32),
        }

    key = jax.random.PRNGKey(0)
    configs = [
        # (B, H, W, C, num_heads, ws, shift)
        (2, 8, 8, 32, 4, 4, 2),   # shifted windows (masked kernel variant)
        (2, 8, 8, 32, 4, 4, 0),   # no shift (mask-free kernel variant)
        (2, 6, 6, 32, 4, 4, 2),   # H,W not divisible by ws (pad + external-LN1 fallback)
    ]
    for (B, H, W, C, num_heads, ws, shift) in configs:
        key, kp, kx = jax.random.split(key, 3)
        params = make_params(kp, C, num_heads, ws)
        x = jax.random.normal(kx, (B, H * W, C), jnp.float32)

        out = swin_block_forward(x, params, H, W, ws, shift, num_heads)
        out = jax.block_until_ready(out)

        ref = swin_block_reference(x, params, H, W, ws, shift, num_heads)
        np.testing.assert_allclose(np.asarray(out), np.asarray(ref),
                                   rtol=5e-3, atol=5e-3)
    print("KERNEL_OK")
</pallas_src>

<mosaic_0001>
module attributes {stable_mosaic.version = 11 : i64} {
  func.func @kernel(%arg0: i32, %arg1: memref<8x16x32xf32, #tpu.memory_space<vmem>>, %arg2: memref<4x16x16xf32, #tpu.memory_space<vmem>>, %arg3: memref<8x16x16xf32, #tpu.memory_space<vmem>>, %arg4: memref<1x32xf32, #tpu.memory_space<vmem>>, %arg5: memref<1x32xf32, #tpu.memory_space<vmem>>, %arg6: memref<32x96xf32, #tpu.memory_space<vmem>>, %arg7: memref<1x96xf32, #tpu.memory_space<vmem>>, %arg8: memref<32x32xf32, #tpu.memory_space<vmem>>, %arg9: memref<1x32xf32, #tpu.memory_space<vmem>>, %arg10: memref<8x16x32xf32, #tpu.memory_space<vmem>>) attributes {dimension_semantics = [#tpu.dimension_semantics<parallel>], iteration_bounds = array<i64: 1>, scalar_prefetch = 0 : i64, scratch_operands = 0 : i64, tpu.core_type = #tpu.core_type<tc>, window_params = [{transform_indices = @transform_0, window_bounds = array<i64: 8, 16, 32>}, {pipeline_mode = #tpu.pipeline_mode<synchronous>, transform_indices = @transform_1, window_bounds = array<i64: 4, 16, 16>}, {pipeline_mode = #tpu.pipeline_mode<synchronous>, transform_indices = @transform_2, window_bounds = array<i64: 8, 16, 16>}, {pipeline_mode = #tpu.pipeline_mode<synchronous>, transform_indices = @transform_3, window_bounds = array<i64: 1, 32>}, {pipeline_mode = #tpu.pipeline_mode<synchronous>, transform_indices = @transform_4, window_bounds = array<i64: 1, 32>}, {pipeline_mode = #tpu.pipeline_mode<synchronous>, transform_indices = @transform_5, window_bounds = array<i64: 32, 96>}, {pipeline_mode = #tpu.pipeline_mode<synchronous>, transform_indices = @transform_6, window_bounds = array<i64: 1, 96>}, {pipeline_mode = #tpu.pipeline_mode<synchronous>, transform_indices = @transform_7, window_bounds = array<i64: 32, 32>}, {pipeline_mode = #tpu.pipeline_mode<synchronous>, transform_indices = @transform_8, window_bounds = array<i64: 1, 32>}, {transform_indices = @transform_9, window_bounds = array<i64: 8, 16, 32>}]} {
    %c0 = arith.constant 0 : index
    %c0_0 = arith.constant 0 : index
    %c0_1 = arith.constant 0 : index
    %0 = vector.load %arg1[%c0, %c0_0, %c0_1] : memref<8x16x32xf32, #tpu.memory_space<vmem>>, vector<8x16x32xf32>
    %1 = vector.shape_cast %0 : vector<8x16x32xf32> to vector<128x32xf32>
    %c0_2 = arith.constant 0 : index
    %c0_3 = arith.constant 0 : index
    %2 = vector.load %arg4[%c0_2, %c0_3] : memref<1x32xf32, #tpu.memory_space<vmem>>, vector<1x32xf32>
    %3 = vector.shape_cast %2 : vector<1x32xf32> to vector<32xf32>
    %c0_4 = arith.constant 0 : index
    %c0_5 = arith.constant 0 : index
    %4 = vector.load %arg5[%c0_4, %c0_5] : memref<1x32xf32, #tpu.memory_space<vmem>>, vector<1x32xf32>
    %5 = vector.shape_cast %4 : vector<1x32xf32> to vector<32xf32>
    %cst = arith.constant dense<0.000000e+00> : vector<128xf32>
    %6 = vector.multi_reduction <add>, %1, %cst [1] : vector<128x32xf32> to vector<128xf32>
    %7 = vector.shape_cast %6 : vector<128xf32> to vector<128x1xf32>
    %cst_6 = arith.constant 3.200000e+01 : f32
    %8 = vector.broadcast %cst_6 : f32 to vector<128x1xf32>
    %9 = arith.divf %7, %8 : vector<128x1xf32>
    %10 = vector.broadcast %9 : vector<128x1xf32> to vector<128x32xf32>
    %11 = arith.subf %1, %10 : vector<128x32xf32>
    %12 = arith.mulf %11, %11 : vector<128x32xf32>
    %cst_7 = arith.constant dense<0.000000e+00> : vector<128xf32>
    %13 = vector.multi_reduction <add>, %12, %cst_7 [1] : vector<128x32xf32> to vector<128xf32>
    %14 = vector.shape_cast %13 : vector<128xf32> to vector<128x1xf32>
    %cst_8 = arith.constant 3.200000e+01 : f32
    %15 = vector.broadcast %cst_8 : f32 to vector<128x1xf32>
    %16 = arith.divf %14, %15 : vector<128x1xf32>
    %17 = vector.broadcast %9 : vector<128x1xf32> to vector<128x32xf32>
    %18 = arith.subf %1, %17 : vector<128x32xf32>
    %cst_9 = arith.constant 9.99999974E-6 : f32
    %19 = vector.broadcast %cst_9 : f32 to vector<128x1xf32>
    %20 = arith.addf %16, %19 : vector<128x1xf32>
    %21 = math.rsqrt %20 : vector<128x1xf32>
    %22 = vector.broadcast %21 : vector<128x1xf32> to vector<128x32xf32>
    %23 = arith.mulf %18, %22 : vector<128x32xf32>
    %24 = vector.shape_cast %3 : vector<32xf32> to vector<1x32xf32>
    %25 = vector.broadcast %24 : vector<1x32xf32> to vector<128x32xf32>
    %26 = arith.mulf %23, %25 : vector<128x32xf32>
    %27 = vector.shape_cast %5 : vector<32xf32> to vector<1x32xf32>
    %28 = vector.broadcast %27 : vector<1x32xf32> to vector<128x32xf32>
    %29 = arith.addf %26, %28 : vector<128x32xf32>
    %c0_10 = arith.constant 0 : index
    %c0_11 = arith.constant 0 : index
    %30 = vector.load %arg6[%c0_10, %c0_11] : memref<32x96xf32, #tpu.memory_space<vmem>>, vector<32x96xf32>
    %cst_12 = arith.constant dense<0.000000e+00> : vector<128x96xf32>
    %31 = tpu.matmul %29, %30, %cst_12 {dimension_numbers = #tpu.dot_dimension_numbers<[1], [0], [0], [1], [0, 0, 1, 1], [], []>} : vector<128x32xf32>, vector<32x96xf32>, vector<128x96xf32> -> vector<128x96xf32>
    %c0_13 = arith.constant 0 : index
    %c0_14 = arith.constant 0 : index
    %32 = vector.load %arg7[%c0_13, %c0_14] : memref<1x96xf32, #tpu.memory_space<vmem>>, vector<1x96xf32>
    %33 = vector.shape_cast %32 : vector<1x96xf32> to vector<96xf32>
    %34 = vector.shape_cast %33 : vector<96xf32> to vector<1x96xf32>
    %35 = vector.broadcast %34 : vector<1x96xf32> to vector<128x96xf32>
    %36 = arith.addf %31, %35 : vector<128x96xf32>
    %37 = vector.extract_strided_slice %36 {offsets = [0, 0], sizes = [128, 8], strides = [1, 1]} : vector<128x96xf32> to vector<128x8xf32>
    %cst_15 = arith.constant 0.353553385 : f32
    %38 = vector.broadcast %cst_15 : f32 to vector<128x8xf32>
    %39 = arith.mulf %37, %38 : vector<128x8xf32>
    %40 = vector.shape_cast %39 : vector<128x8xf32> to vector<8x16x8xf32>
    %41 = vector.extract_strided_slice %36 {offsets = [0, 32], sizes = [128, 8], strides = [1, 1]} : vector<128x96xf32> to vector<128x8xf32>
    %42 = vector.shape_cast %41 : vector<128x8xf32> to vector<8x16x8xf32>
    %43 = vector.extract_strided_slice %36 {offsets = [0, 64], sizes = [128, 8], strides = [1, 1]} : vector<128x96xf32> to vector<128x8xf32>
    %44 = vector.shape_cast %43 : vector<128x8xf32> to vector<8x16x8xf32>
    "tpu.trace_start"() <{level = 10 : i32, message = "wnd,wmd->wnm"}> : () -> ()
    %cst_16 = arith.constant dense<0.000000e+00> : vector<8x16x16xf32>
    %45 = tpu.matmul %40, %42, %cst_16 {dimension_numbers = #tpu.dot_dimension_numbers<[2], [2], [1], [1], [0, 0, 0, 1, 1, 1], [0], [0]>} : vector<8x16x8xf32>, vector<8x16x8xf32>, vector<8x16x16xf32> -> vector<8x16x16xf32>
    "tpu.trace_stop"() : () -> ()
    %c0_17 = arith.constant 0 : index
    %c0_18 = arith.constant 0 : index
    %c0_19 = arith.constant 0 : index
    %46 = vector.load %arg2[%c0_17, %c0_18, %c0_19] : memref<4x16x16xf32, #tpu.memory_space<vmem>>, vector<1x16x16xf32>
    %47 = vector.shape_cast %46 : vector<1x16x16xf32> to vector<16x16xf32>
    %48 = vector.shape_cast %47 : vector<16x16xf32> to vector<1x16x16xf32>
    %49 = vector.broadcast %48 : vector<1x16x16xf32> to vector<8x16x16xf32>
    %50 = arith.addf %45, %49 : vector<8x16x16xf32>
    %c0_20 = arith.constant 0 : index
    %c0_21 = arith.constant 0 : index
    %c0_22 = arith.constant 0 : index
    %51 = vector.load %arg3[%c0_20, %c0_21, %c0_22] : memref<8x16x16xf32, #tpu.memory_space<vmem>>, vector<8x16x16xf32>
    %52 = arith.addf %50, %51 : vector<8x16x16xf32>
    %cst_23 = arith.constant dense<0xFF800000> : vector<8x16xf32>
    %53 = vector.multi_reduction <maximumf>, %52, %cst_23 [2] : vector<8x16x16xf32> to vector<8x16xf32>
    %54 = vector.shape_cast %53 : vector<8x16xf32> to vector<8x16x1xf32>
    %55 = vector.broadcast %54 : vector<8x16x1xf32> to vector<8x16x16xf32>
    %56 = arith.subf %52, %55 : vector<8x16x16xf32>
    %57 = math.exp %56 : vector<8x16x16xf32>
    %cst_24 = arith.constant dense<0.000000e+00> : vector<8x16xf32>
    %58 = vector.multi_reduction <add>, %57, %cst_24 [2] : vector<8x16x16xf32> to vector<8x16xf32>
    %59 = vector.shape_cast %58 : vector<8x16xf32> to vector<8x16x1xf32>
    %60 = tpu.reciprocal %59 {approx = true} : vector<8x16x1xf32> -> vector<8x16x1xf32>
    %61 = vector.broadcast %60 : vector<8x16x1xf32> to vector<8x16x16xf32>
    %62 = arith.mulf %57, %61 : vector<8x16x16xf32>
    "tpu.trace_start"() <{level = 10 : i32, message = "wnm,wmd->wnd"}> : () -> ()
    %cst_25 = arith.constant dense<0.000000e+00> : vector<8x16x8xf32>
    %63 = tpu.matmul %62, %44, %cst_25 {dimension_numbers = #tpu.dot_dimension_numbers<[2], [1], [1], [2], [0, 0, 0, 1, 1, 2], [0], [0]>} : vector<8x16x16xf32>, vector<8x16x8xf32>, vector<8x16x8xf32> -> vector<8x16x8xf32>
    "tpu.trace_stop"() : () -> ()
    %64 = vector.shape_cast %63 : vector<8x16x8xf32> to vector<128x8xf32>
    %65 = vector.extract_strided_slice %36 {offsets = [0, 8], sizes = [128, 8], strides = [1, 1]} : vector<128x96xf32> to vector<128x8xf32>
    %cst_26 = arith.constant 0.353553385 : f32
    %66 = vector.broadcast %cst_26 : f32 to vector<128x8xf32>
    %67 = arith.mulf %65, %66 : vector<128x8xf32>
    %68 = vector.shape_cast %67 : vector<128x8xf32> to vector<8x16x8xf32>
    %69 = vector.extract_strided_slice %36 {offsets = [0, 40], sizes = [128, 8], strides = [1, 1]} : vector<128x96xf32> to vector<128x8xf32>
    %70 = vector.shape_cast %69 : vector<128x8xf32> to vector<8x16x8xf32>
    %71 = vector.extract_strided_slice %36 {offsets = [0, 72], sizes = [128, 8], strides = [1, 1]} : vector<128x96xf32> to vector<128x8xf32>
    %72 = vector.shape_cast %71 : vector<128x8xf32> to vector<8x16x8xf32>
    "tpu.trace_start"() <{level = 10 : i32, message = "wnd,wmd->wnm"}> : () -> ()
    %cst_27 = arith.constant dense<0.000000e+00> : vector<8x16x16xf32>
    %73 = tpu.matmul %68, %70, %cst_27 {dimension_numbers = #tpu.dot_dimension_numbers<[2], [2], [1], [1], [0, 0, 0, 1, 1, 1], [0], [0]>} : vector<8x16x8xf32>, vector<8x16x8xf32>, vector<8x16x16xf32> -> vector<8x16x16xf32>
    "tpu.trace_stop"() : () -> ()
    %c1 = arith.constant 1 : index
    %c0_28 = arith.constant 0 : index
    %c0_29 = arith.constant 0 : index
    %74 = vector.load %arg2[%c1, %c0_28, %c0_29] : memref<4x16x16xf32, #tpu.memory_space<vmem>>, vector<1x16x16xf32>
    %75 = vector.shape_cast %74 : vector<1x16x16xf32> to vector<16x16xf32>
    %76 = vector.shape_cast %75 : vector<16x16xf32> to vector<1x16x16xf32>
    %77 = vector.broadcast %76 : vector<1x16x16xf32> to vector<8x16x16xf32>
    %78 = arith.addf %73, %77 : vector<8x16x16xf32>
    %c0_30 = arith.constant 0 : index
    %c0_31 = arith.constant 0 : index
    %c0_32 = arith.constant 0 : index
    %79 = vector.load %arg3[%c0_30, %c0_31, %c0_32] : memref<8x16x16xf32, #tpu.memory_space<vmem>>, vector<8x16x16xf32>
    %80 = arith.addf %78, %79 : vector<8x16x16xf32>
    %cst_33 = arith.constant dense<0xFF800000> : vector<8x16xf32>
    %81 = vector.multi_reduction <maximumf>, %80, %cst_33 [2] : vector<8x16x16xf32> to vector<8x16xf32>
    %82 = vector.shape_cast %81 : vector<8x16xf32> to vector<8x16x1xf32>
    %83 = vector.broadcast %82 : vector<8x16x1xf32> to vector<8x16x16xf32>
    %84 = arith.subf %80, %83 : vector<8x16x16xf32>
    %85 = math.exp %84 : vector<8x16x16xf32>
    %cst_34 = arith.constant dense<0.000000e+00> : vector<8x16xf32>
    %86 = vector.multi_reduction <add>, %85, %cst_34 [2] : vector<8x16x16xf32> to vector<8x16xf32>
    %87 = vector.shape_cast %86 : vector<8x16xf32> to vector<8x16x1xf32>
    %88 = tpu.reciprocal %87 {approx = true} : vector<8x16x1xf32> -> vector<8x16x1xf32>
    %89 = vector.broadcast %88 : vector<8x16x1xf32> to vector<8x16x16xf32>
    %90 = arith.mulf %85, %89 : vector<8x16x16xf32>
    "tpu.trace_start"() <{level = 10 : i32, message = "wnm,wmd->wnd"}> : () -> ()
    %cst_35 = arith.constant dense<0.000000e+00> : vector<8x16x8xf32>
    %91 = tpu.matmul %90, %72, %cst_35 {dimension_numbers = #tpu.dot_dimension_numbers<[2], [1], [1], [2], [0, 0, 0, 1, 1, 2], [0], [0]>} : vector<8x16x16xf32>, vector<8x16x8xf32>, vector<8x16x8xf32> -> vector<8x16x8xf32>
    "tpu.trace_stop"() : () -> ()
    %92 = vector.shape_cast %91 : vector<8x16x8xf32> to vector<128x8xf32>
    %93 = vector.extract_strided_slice %36 {offsets = [0, 16], sizes = [128, 8], strides = [1, 1]} : vector<128x96xf32> to vector<128x8xf32>
    %cst_36 = arith.constant 0.353553385 : f32
    %94 = vector.broadcast %cst_36 : f32 to vector<128x8xf32>
    %95 = arith.mulf %93, %94 : vector<128x8xf32>
    %96 = vector.shape_cast %95 : vector<128x8xf32> to vector<8x16x8xf32>
    %97 = vector.extract_strided_slice %36 {offsets = [0, 48], sizes = [128, 8], strides = [1, 1]} : vector<128x96xf32> to vector<128x8xf32>
    %98 = vector.shape_cast %97 : vector<128x8xf32> to vector<8x16x8xf32>
    %99 = vector.extract_strided_slice %36 {offsets = [0, 80], sizes = [128, 8], strides = [1, 1]} : vector<128x96xf32> to vector<128x8xf32>
    %100 = vector.shape_cast %99 : vector<128x8xf32> to vector<8x16x8xf32>
    "tpu.trace_start"() <{level = 10 : i32, message = "wnd,wmd->wnm"}> : () -> ()
    %cst_37 = arith.constant dense<0.000000e+00> : vector<8x16x16xf32>
    %101 = tpu.matmul %96, %98, %cst_37 {dimension_numbers = #tpu.dot_dimension_numbers<[2], [2], [1], [1], [0, 0, 0, 1, 1, 1], [0], [0]>} : vector<8x16x8xf32>, vector<8x16x8xf32>, vector<8x16x16xf32> -> vector<8x16x16xf32>
    "tpu.trace_stop"() : () -> ()
    %c2 = arith.constant 2 : index
    %c0_38 = arith.constant 0 : index
    %c0_39 = arith.constant 0 : index
    %102 = vector.load %arg2[%c2, %c0_38, %c0_39] : memref<4x16x16xf32, #tpu.memory_space<vmem>>, vector<1x16x16xf32>
    %103 = vector.shape_cast %102 : vector<1x16x16xf32> to vector<16x16xf32>
    %104 = vector.shape_cast %103 : vector<16x16xf32> to vector<1x16x16xf32>
    %105 = vector.broadcast %104 : vector<1x16x16xf32> to vector<8x16x16xf32>
    %106 = arith.addf %101, %105 : vector<8x16x16xf32>
    %c0_40 = arith.constant 0 : index
    %c0_41 = arith.constant 0 : index
    %c0_42 = arith.constant 0 : index
    %107 = vector.load %arg3[%c0_40, %c0_41, %c0_42] : memref<8x16x16xf32, #tpu.memory_space<vmem>>, vector<8x16x16xf32>
    %108 = arith.addf %106, %107 : vector<8x16x16xf32>
    %cst_43 = arith.constant dense<0xFF800000> : vector<8x16xf32>
    %109 = vector.multi_reduction <maximumf>, %108, %cst_43 [2] : vector<8x16x16xf32> to vector<8x16xf32>
    %110 = vector.shape_cast %109 : vector<8x16xf32> to vector<8x16x1xf32>
    %111 = vector.broadcast %110 : vector<8x16x1xf32> to vector<8x16x16xf32>
    %112 = arith.subf %108, %111 : vector<8x16x16xf32>
    %113 = math.exp %112 : vector<8x16x16xf32>
    %cst_44 = arith.constant dense<0.000000e+00> : vector<8x16xf32>
    %114 = vector.multi_reduction <add>, %113, %cst_44 [2] : vector<8x16x16xf32> to vector<8x16xf32>
    %115 = vector.shape_cast %114 : vector<8x16xf32> to vector<8x16x1xf32>
    %116 = tpu.reciprocal %115 {approx = true} : vector<8x16x1xf32> -> vector<8x16x1xf32>
    %117 = vector.broadcast %116 : vector<8x16x1xf32> to vector<8x16x16xf32>
    %118 = arith.mulf %113, %117 : vector<8x16x16xf32>
    "tpu.trace_start"() <{level = 10 : i32, message = "wnm,wmd->wnd"}> : () -> ()
    %cst_45 = arith.constant dense<0.000000e+00> : vector<8x16x8xf32>
    %119 = tpu.matmul %118, %100, %cst_45 {dimension_numbers = #tpu.dot_dimension_numbers<[2], [1], [1], [2], [0, 0, 0, 1, 1, 2], [0], [0]>} : vector<8x16x16xf32>, vector<8x16x8xf32>, vector<8x16x8xf32> -> vector<8x16x8xf32>
    "tpu.trace_stop"() : () -> ()
    %120 = vector.shape_cast %119 : vector<8x16x8xf32> to vector<128x8xf32>
    %121 = vector.extract_strided_slice %36 {offsets = [0, 24], sizes = [128, 8], strides = [1, 1]} : vector<128x96xf32> to vector<128x8xf32>
    %cst_46 = arith.constant 0.353553385 : f32
    %122 = vector.broadcast %cst_46 : f32 to vector<128x8xf32>
    %123 = arith.mulf %121, %122 : vector<128x8xf32>
    %124 = vector.shape_cast %123 : vector<128x8xf32> to vector<8x16x8xf32>
    %125 = vector.extract_strided_slice %36 {offsets = [0, 56], sizes = [128, 8], strides = [1, 1]} : vector<128x96xf32> to vector<128x8xf32>
    %126 = vector.shape_cast %125 : vector<128x8xf32> to vector<8x16x8xf32>
    %127 = vector.extract_strided_slice %36 {offsets = [0, 88], sizes = [128, 8], strides = [1, 1]} : vector<128x96xf32> to vector<128x8xf32>
    %128 = vector.shape_cast %127 : vector<128x8xf32> to vector<8x16x8xf32>
    "tpu.trace_start"() <{level = 10 : i32, message = "wnd,wmd->wnm"}> : () -> ()
    %cst_47 = arith.constant dense<0.000000e+00> : vector<8x16x16xf32>
    %129 = tpu.matmul %124, %126, %cst_47 {dimension_numbers = #tpu.dot_dimension_numbers<[2], [2], [1], [1], [0, 0, 0, 1, 1, 1], [0], [0]>} : vector<8x16x8xf32>, vector<8x16x8xf32>, vector<8x16x16xf32> -> vector<8x16x16xf32>
    "tpu.trace_stop"() : () -> ()
    %c3 = arith.constant 3 : index
    %c0_48 = arith.constant 0 : index
    %c0_49 = arith.constant 0 : index
    %130 = vector.load %arg2[%c3, %c0_48, %c0_49] : memref<4x16x16xf32, #tpu.memory_space<vmem>>, vector<1x16x16xf32>
    %131 = vector.shape_cast %130 : vector<1x16x16xf32> to vector<16x16xf32>
    %132 = vector.shape_cast %131 : vector<16x16xf32> to vector<1x16x16xf32>
    %133 = vector.broadcast %132 : vector<1x16x16xf32> to vector<8x16x16xf32>
    %134 = arith.addf %129, %133 : vector<8x16x16xf32>
    %c0_50 = arith.constant 0 : index
    %c0_51 = arith.constant 0 : index
    %c0_52 = arith.constant 0 : index
    %135 = vector.load %arg3[%c0_50, %c0_51, %c0_52] : memref<8x16x16xf32, #tpu.memory_space<vmem>>, vector<8x16x16xf32>
    %136 = arith.addf %134, %135 : vector<8x16x16xf32>
    %cst_53 = arith.constant dense<0xFF800000> : vector<8x16xf32>
    %137 = vector.multi_reduction <maximumf>, %136, %cst_53 [2] : vector<8x16x16xf32> to vector<8x16xf32>
    %138 = vector.shape_cast %137 : vector<8x16xf32> to vector<8x16x1xf32>
    %139 = vector.broadcast %138 : vector<8x16x1xf32> to vector<8x16x16xf32>
    %140 = arith.subf %136, %139 : vector<8x16x16xf32>
    %141 = math.exp %140 : vector<8x16x16xf32>
    %cst_54 = arith.constant dense<0.000000e+00> : vector<8x16xf32>
    %142 = vector.multi_reduction <add>, %141, %cst_54 [2] : vector<8x16x16xf32> to vector<8x16xf32>
    %143 = vector.shape_cast %142 : vector<8x16xf32> to vector<8x16x1xf32>
    %144 = tpu.reciprocal %143 {approx = true} : vector<8x16x1xf32> -> vector<8x16x1xf32>
    %145 = vector.broadcast %144 : vector<8x16x1xf32> to vector<8x16x16xf32>
    %146 = arith.mulf %141, %145 : vector<8x16x16xf32>
    "tpu.trace_start"() <{level = 10 : i32, message = "wnm,wmd->wnd"}> : () -> ()
    %cst_55 = arith.constant dense<0.000000e+00> : vector<8x16x8xf32>
    %147 = tpu.matmul %146, %128, %cst_55 {dimension_numbers = #tpu.dot_dimension_numbers<[2], [1], [1], [2], [0, 0, 0, 1, 1, 2], [0], [0]>} : vector<8x16x16xf32>, vector<8x16x8xf32>, vector<8x16x8xf32> -> vector<8x16x8xf32>
    "tpu.trace_stop"() : () -> ()
    %148 = vector.shape_cast %147 : vector<8x16x8xf32> to vector<128x8xf32>
    %149 = tpu.concatenate %64, %92, %120, %148 in 1 : vector<128x8xf32>, vector<128x8xf32>, vector<128x8xf32>, vector<128x8xf32> -> vector<128x32xf32>
    %c0_56 = arith.constant 0 : index
    %c0_57 = arith.constant 0 : index
    %150 = vector.load %arg8[%c0_56, %c0_57] : memref<32x32xf32, #tpu.memory_space<vmem>>, vector<32x32xf32>
    %cst_58 = arith.constant dense<0.000000e+00> : vector<128x32xf32>
    %151 = tpu.matmul %149, %150, %cst_58 {dimension_numbers = #tpu.dot_dimension_numbers<[1], [0], [0], [1], [0, 0, 1, 1], [], []>} : vector<128x32xf32>, vector<32x32xf32>, vector<128x32xf32> -> vector<128x32xf32>
    %c0_59 = arith.constant 0 : index
    %c0_60 = arith.constant 0 : index
    %152 = vector.load %arg9[%c0_59, %c0_60] : memref<1x32xf32, #tpu.memory_space<vmem>>, vector<1x32xf32>
    %153 = vector.shape_cast %152 : vector<1x32xf32> to vector<32xf32>
    %154 = vector.shape_cast %153 : vector<32xf32> to vector<1x32xf32>
    %155 = vector.broadcast %154 : vector<1x32xf32> to vector<128x32xf32>
    %156 = arith.addf %151, %155 : vector<128x32xf32>
    %157 = vector.shape_cast %156 : vector<128x32xf32> to vector<8x16x32xf32>
    %c0_61 = arith.constant 0 : index
    %c0_62 = arith.constant 0 : index
    %c0_63 = arith.constant 0 : index
    %158 = vector.load %arg10[%c0_61, %c0_62, %c0_63] : memref<8x16x32xf32, #tpu.memory_space<vmem>>, vector<8x16x32xf32>
    tpu.vector_store %arg10[%c0_61, %c0_62, %c0_63], %157 {strides = array<i32>} : memref<8x16x32xf32, #tpu.memory_space<vmem>>, vector<8x16x32xf32>,
    return
  }
  func.func @transform_0(%arg0: i32) -> (i32, i32, i32) {
    %c0_i32 = arith.constant 0 : i32
    %c0_i32_0 = arith.constant 0 : i32
    %c0_i32_1 = arith.constant 0 : i32
    return %arg0, %c0_i32, %c0_i32_0 : i32, i32, i32
  }
  func.func @transform_1(%arg0: i32) -> (i32, i32, i32) {
    %c0_i32 = arith.constant 0 : i32
    %c0_i32_0 = arith.constant 0 : i32
    %c0_i32_1 = arith.constant 0 : i32
    %c0_i32_2 = arith.constant 0 : i32
    return %c0_i32, %c0_i32_0, %c0_i32_1 : i32, i32, i32
  }
  func.func @transform_2(%arg0: i32) -> (i32, i32, i32) {
    %c0_i32 = arith.constant 0 : i32
    %c0_i32_0 = arith.constant 0 : i32
    %c0_i32_1 = arith.constant 0 : i32
    %c0_i32_2 = arith.constant 0 : i32
    return %c0_i32, %c0_i32_0, %c0_i32_1 : i32, i32, i32
  }
  func.func @transform_3(%arg0: i32) -> (i32, i32) {
    %c0_i32 = arith.constant 0 : i32
    %c0_i32_0 = arith.constant 0 : i32
    %c0_i32_1 = arith.constant 0 : i32
    return %c0_i32, %c0_i32_0 : i32, i32
  }
  func.func @transform_4(%arg0: i32) -> (i32, i32) {
    %c0_i32 = arith.constant 0 : i32
    %c0_i32_0 = arith.constant 0 : i32
    %c0_i32_1 = arith.constant 0 : i32
    return %c0_i32, %c0_i32_0 : i32, i32
  }
  func.func @transform_5(%arg0: i32) -> (i32, i32) {
    %c0_i32 = arith.constant 0 : i32
    %c0_i32_0 = arith.constant 0 : i32
    %c0_i32_1 = arith.constant 0 : i32
    return %c0_i32, %c0_i32_0 : i32, i32
  }
  func.func @transform_6(%arg0: i32) -> (i32, i32) {
    %c0_i32 = arith.constant 0 : i32
    %c0_i32_0 = arith.constant 0 : i32
    %c0_i32_1 = arith.constant 0 : i32
    return %c0_i32, %c0_i32_0 : i32, i32
  }
  func.func @transform_7(%arg0: i32) -> (i32, i32) {
    %c0_i32 = arith.constant 0 : i32
    %c0_i32_0 = arith.constant 0 : i32
    %c0_i32_1 = arith.constant 0 : i32
    return %c0_i32, %c0_i32_0 : i32, i32
  }
  func.func @transform_8(%arg0: i32) -> (i32, i32) {
    %c0_i32 = arith.constant 0 : i32
    %c0_i32_0 = arith.constant 0 : i32
    %c0_i32_1 = arith.constant 0 : i32
    return %c0_i32, %c0_i32_0 : i32, i32
  }
  func.func @transform_9(%arg0: i32) -> (i32, i32, i32) {
    %c0_i32 = arith.constant 0 : i32
    %c0_i32_0 = arith.constant 0 : i32
    %c0_i32_1 = arith.constant 0 : i32
    return %arg0, %c0_i32, %c0_i32_0 : i32, i32, i32
  }
}

</mosaic_0001>

<bundles_post_ra>
// kernel: tpu_custom_call.1
= control target key start
LH: loop header
LB: loop body
LE: loop exit
PB: predicated region body
PF: predicated region fallthrough
CT: control target
= control target key end

     0   :  { %14 = vsyncpa [#allocation3], 0  ;;  %s11621_s0 = inlined_call_operand.hbm [shape: f32[8,16,32], index: 0, kind: input, shape index: {}]   ;;  %s11622_s1 = inlined_call_operand.hbm [shape: f32[4,16,16], index: 1, kind: input, shape index: {}]   ;;  %s11623_s2 = inlined_call_operand.hbm [shape: f32[8,16,16], index: 2, kind: input, shape index: {}]   ;;  %s11624_s3 = inlined_call_operand.vmem [shape: f32[1,32], index: 3, kind: input, shape index: {}]   ;;  %s11625_s4 = inlined_call_operand.vmem [shape: f32[1,32], index: 4, kind: input, shape index: {}]   ;;  %s11626_s5 = inlined_call_operand.hbm [shape: f32[32,96], index: 5, kind: input, shape index: {}]   ;;  %s11627_s6 = inlined_call_operand.vmem [shape: f32[1,96], index: 6, kind: input, shape index: {}]   ;;  %s11628_s7 = inlined_call_operand.hbm [shape: f32[32,32], index: 7, kind: input, shape index: {}]   ;;  %s11629_s8 = inlined_call_operand.vmem [shape: f32[1,32], index: 8, kind: input, shape index: {}]   ;;  %s11630_s9 = inlined_call_operand.hbm [shape: f32[8,16,32], index: 9, kind: output, shape index: {}]  }
   0x1   :  { %15 = vsyncpa [#allocation6], 0 }
   0x2   :  { %16 = vsyncpa [#allocation9], 0 }
   0x3   :  { %17 = vsyncpa [#allocation4], 0  ;;  %s9095_s30 = smov [#allocation5]   ;;  %s9096_s11 = smov [#allocation8]  }
   0x4   :  { %s35_s10 = sshll.u32 %s9095_s30, 4  ;;  %s63_s12 = sshll.u32 %s9096_s11, 4  ;;  %s36_s10 = int_to_ptr.vmem [resolvable:$true] %s35_s10  ;;  %s64_s12 = int_to_ptr.vmem [resolvable:$true] %s63_s12 }
   0x5   :  { %s8975_s13 = scalar_lea.vmem %s36_s10, 1024  ;;  %p8980_p1 = scmp.lt.s32.totalorder %s36_s10, %s36_s10 }
   0x6   :  { %p8976_p0 = scmp.ne.s32.totalorder %s36_s10, %s8975_s13  ;;  %p8981_p2 = scmp.lt.s32.totalorder %s8975_s13, %s8975_s13 }
   0x8   :  { %p8982_p3 = por %p8981_p2, %p8980_p1 }
   0xa   :  { %p8983_p4 = pnand %p8982_p3, %p8976_p0 }
   0xc   :  { %8986 = shalt.err (!%p8983_p4)
}
   0xd   :  { %s9097_s14 = smov 128   ;;  %s9098_s15 = smov 8  }
   0xe   :  { %41 = dma.hbm_to_vmem [thread:$0]  %s11622_s1, 1024, %s36_s10, [#allocation6], %s9097_s14, %s9097_s14, %s9098_s15  }
   0xf   :  { %s8995_s18 = scalar_lea.vmem %s64_s12, 512  ;;  %p9000_p6 = scmp.lt.s32.totalorder %s64_s12, %s64_s12 }
  0x10   :  { %p8996_p5 = scmp.ne.s32.totalorder %s64_s12, %s8995_s18  ;;  %p9001_p7 = scmp.lt.s32.totalorder %s8995_s18, %s8995_s18 }
  0x12   :  { %p9002_p8 = por %p9001_p7, %p9000_p6 }
  0x14   :  { %p9003_p9 = pnand %p9002_p8, %p8996_p5 }
  0x16   :  { %9006 = shalt.err (!%p9003_p9)
}
  0x17   :  { %69 = dma.hbm_to_vmem [thread:$0]  %s11626_s5, 512, %s64_s12, [#allocation9], %s9097_s14, %s9097_s14, %s9098_s15  }
  0x18   :  { %s9099_s21 = smov [#allocation2]   ;;  %s9100_s23 = smov [#allocation7]  }
  0x19   :  { %s23_s22 = sshll.u32 %s9099_s21, 4  ;;  %s47_s24 = sshll.u32 %s9100_s23, 4  ;;  %s24_s22 = int_to_ptr.vmem [resolvable:$true] %s23_s22  ;;  %s48_s24 = int_to_ptr.vmem [resolvable:$true] %s47_s24 }
  0x1a   :  { %s9015_s1 = scalar_lea.vmem %s24_s22, 2048  ;;  %p9020_p11 = scmp.lt.s32.totalorder %s24_s22, %s24_s22 }
  0x1b   :  { %p9016_p10 = scmp.ne.s32.totalorder %s24_s22, %s9015_s1  ;;  %p9021_p12 = scmp.lt.s32.totalorder %s9015_s1, %s9015_s1 }
  0x1d   :  { %p9022_p13 = por %p9021_p12, %p9020_p11 }
  0x1f   :  { %p9023_p0 = pnand %p9022_p13, %p9016_p10 }
  0x21   :  { %9026 = shalt.err (!%p9023_p0)
}
  0x22   :  { %29 = dma.hbm_to_vmem [thread:$0]  %s11621_s0, 2048, %s24_s22, [#allocation3], %s9097_s14, %s9097_s14, %s9098_s15  }
  0x23   :  { %s9035_s5 = scalar_lea.vmem %s48_s24, 2048  ;;  %p9040_p2 = scmp.lt.s32.totalorder %s48_s24, %s48_s24 }
  0x24   :  { %p9036_p1 = scmp.ne.s32.totalorder %s48_s24, %s9035_s5  ;;  %p9041_p3 = scmp.lt.s32.totalorder %s9035_s5, %s9035_s5 }
  0x26   :  { %p9042_p4 = por %p9041_p3, %p9040_p2 }
  0x28   :  { %p9043_p5 = pnand %p9042_p4, %p9036_p1 }
  0x2a   :  { %9046 = shalt.err (!%p9043_p5)
}
  0x2b   :  { %53 = dma.hbm_to_vmem [thread:$0]  %s11623_s2, 2048, %s48_s24, [#allocation6], %s9097_s14, %s9097_s14, %s9098_s15  }
  0x2c   :  { %s9101_s29 = smov [#allocation10]  }
  0x2d   :  { %s77_s30 = sshll.u32 %s9101_s29, 4  ;;  %s78_s30 = int_to_ptr.vmem [resolvable:$true] %s77_s30 }
  0x2e   :  { %s9055_s10 = scalar_lea.vmem %s78_s30, 512  ;;  %p9060_p7 = scmp.lt.s32.totalorder %s78_s30, %s78_s30 }
  0x2f   :  { %p9056_p6 = scmp.ne.s32.totalorder %s78_s30, %s9055_s10  ;;  %p9061_p8 = scmp.lt.s32.totalorder %s9055_s10, %s9055_s10 }
  0x31   :  { %p9062_p9 = por %p9061_p8, %p9060_p7 }
  0x33   :  { %p9063_p10 = pnand %p9062_p9, %p9056_p6 }
  0x35   :  { %9066 = shalt.err (!%p9063_p10)
}
  0x36   :  { %83 = dma.hbm_to_vmem [thread:$0]  %s11628_s7, 512, %s78_s30, [#allocation9], %s9097_s14, %s9097_s14, %s9098_s15  }
  0x37   :  { %9087 = dma.done.wait [#allocation3], 2048  }
  0x38   :  { %9088 = vsyncadd [#allocation3], 4294965248 }
  0x39   :  { %9089 = dma.done.wait [#allocation6], 3072  }
  0x3a   :  { %9090 = vsyncadd [#allocation6], 4294964224 }
  0x3b   :  { %9091 = dma.done.wait [#allocation9], 1024  }
  0x3c   :  { %9092 = vsyncadd [#allocation9], 4294966272  ;;  %vm119_vm0 = vcmask 261120   ;;  %v101_v0 = vld [vmem:[#allocation2] sm:$0xff]  ;;  %v103_v1 = vld [vmem:[#allocation2 + $0x10] sm:$0xff]  ;;  %s9102_s16 = smov 96  }
  0x3d   :  { %v102_v2 = vld [vmem:[#allocation2 + $0x8] sm:$0xff]  ;;  %v120_v3 = vsel %vm119_vm0, %v101_v0, 0.0  ;;  %v126_v4 = vsel %vm119_vm0, %v103_v1, 0.0  ;;  %v104_v5 = vld [vmem:[#allocation2 + $0x18] sm:$0xff]  ;;  %v105_v8 = vld [vmem:[#allocation2 + $0x20] sm:$0xff]  ;;  %vm601_vm1 = vcmask 64512  }
  0x3e   :  { %121 = vadd.xlane.f32.xlu0 %v120_v3  ;;  %127 = vadd.xlane.f32.xlu1 %v126_v4  ;;  %v123_v6 = vsel %vm119_vm0, %v102_v2, 0.0  ;;  %v129_v7 = vsel %vm119_vm0, %v104_v5, 0.0  ;;  %v106_v9 = vld [vmem:[#allocation2 + $0x28] sm:$0xff]  ;;  %v132_v10 = vsel %vm119_vm0, %v105_v8, 0.0  ;;  %v9202_v12 = vld [vmem:[#allocation2 + $0x30] sm:$0xff]  ;;  %v9204_v13 = vld [vmem:[#allocation2 + $0x38] sm:$0xff] }
  0x3f   :  { %v135_v11 = vsel %vm119_vm0, %v106_v9, 0.0  ;;  %v138_v14 = vsel %vm119_vm0, %v9202_v12, 0.0  ;;  %v141_v15 = vsel %vm119_vm0, %v9204_v13, 0.0  ;;  %v9210_v16 = vld [vmem:[#allocation2 + $0x40] sm:$0xff]  ;;  %v9212_v17 = vld [vmem:[#allocation2 + $0x48] sm:$0xff]  ;;  %v9218_v20 = vld [vmem:[#allocation2 + $0x50] sm:$0xff] }
  0x40   :  { %v144_v18 = vsel %vm119_vm0, %v9210_v16, 0.0  ;;  %v147_v19 = vsel %vm119_vm0, %v9212_v17, 0.0  ;;  %v9220_v21 = vld [vmem:[#allocation2 + $0x58] sm:$0xff]  ;;  %v150_v22 = vsel %vm119_vm0, %v9218_v20, 0.0  ;;  %v9226_v24 = vld [vmem:[#allocation2 + $0x60] sm:$0xff]  ;;  %v9228_v25 = vld [vmem:[#allocation2 + $0x68] sm:$0xff] }
  0x41   :  { %v153_v23 = vsel %vm119_vm0, %v9220_v21, 0.0  ;;  %v156_v26 = vsel %vm119_vm0, %v9226_v24, 0.0  ;;  %v159_v27 = vsel %vm119_vm0, %v9228_v25, 0.0  ;;  %v9234_v28 = vld [vmem:[#allocation2 + $0x70] sm:$0xff]  ;;  %v9236_v29 = vld [vmem:[#allocation2 + $0x78] sm:$0xff]  ;;  %s9104_s17 = smov 88  }
  0x42   :  { %124 = vadd.xlane.f32.xlu0 %v123_v6  ;;  %130 = vadd.xlane.f32.xlu1 %v129_v7  ;;  %v162_v30 = vsel %vm119_vm0, %v9234_v28, 0.0  ;;  %v165_v31 = vsel %vm119_vm0, %v9236_v29, 0.0  ;;  %s9105_s18 = smov 120   ;;  %vm1356_vm2 = vcmask 130048   ;;  %s9106_s19 = smov 56   ;;  %vm7358_vm3 = vcmask 195584  }
  0x43   :  { %s9107_s20 = smov 80   ;;  %s9108_s21 = smov 112  }
  0x44   :  { %s9109_s22 = smov 48   ;;  %s9110_s23 = smov 72  }
  0x45   :  { %s9111_s24 = smov 104   ;;  %s9112_s1 = smov 40  }
  0x46   :  { %133 = vadd.xlane.f32.xlu0 %v132_v10  ;;  %136 = vadd.xlane.f32.xlu1 %v135_v11  ;;  %s9113_s25 = smov 16   ;;  %s9114_s26 = smov 24  }
  0x4a   :  { %139 = vadd.xlane.f32.xlu0 %v138_v14  ;;  %142 = vadd.xlane.f32.xlu1 %v141_v15 }
  0x4e   :  { %145 = vadd.xlane.f32.xlu0 %v144_v18  ;;  %148 = vadd.xlane.f32.xlu1 %v147_v19 }
  0x52   :  { %151 = vadd.xlane.f32.xlu0 %v150_v22  ;;  %154 = vadd.xlane.f32.xlu1 %v153_v23 }
  0x56   :  { %157 = vadd.xlane.f32.xlu0 %v156_v26  ;;  %160 = vadd.xlane.f32.xlu1 %v159_v27 }
  0x5a   :  { %163 = vadd.xlane.f32.xlu0 %v162_v30  ;;  %166 = vadd.xlane.f32.xlu1 %v165_v31 }
  0xc7   :  { %v122_v32 = vpop.xlane.xlu0 %121  ;;  %v128_v33 = vpop.xlane.xlu1 %127 }
  0xc8   :  { %v169_v34 = vmul.f32 0.03125, %v122_v32  ;;  %v171_v35 = vmul.f32 0.03125, %v128_v33 }
  0xca   :  { %v9242_v36 = vsub.f32 %v101_v0, %v169_v34  ;;  %v9244_v37 = vsub.f32 %v103_v1, %v171_v35 }
  0xcb   :  { %v125_v38 = vpop.xlane.xlu0 %124  ;;  %v131_v39 = vpop.xlane.xlu1 %130 }
  0xcc   :  { %v170_v40 = vmul.f32 0.03125, %v125_v38  ;;  %v172_v41 = vmul.f32 0.03125, %v131_v39  ;;  %v201_v42 = vmul.f32 %v9242_v36, %v9242_v36  ;;  %v203_v43 = vmul.f32 %v9244_v37, %v9244_v37 }
  0xce   :  { %v9250_v44 = vsub.f32 %v102_v2, %v170_v40  ;;  %v9252_v45 = vsub.f32 %v104_v5, %v172_v41  ;;  %v217_v46 = vsel %vm119_vm0, %v201_v42, 0.0  ;;  %v223_v49 = vsel %vm119_vm0, %v203_v43, 0.0 }
  0xcf   :  { %218 = vadd.xlane.f32.xlu0 %v217_v46  ;;  %v134_v47 = vpop.xlane.xlu0 %133  ;;  %v137_v48 = vpop.xlane.xlu1 %136 }
  0xd0   :  { %v173_v50 = vmul.f32 0.03125, %v134_v47  ;;  %v174_v51 = vmul.f32 0.03125, %v137_v48  ;;  %v202_v52 = vmul.f32 %v9250_v44, %v9250_v44  ;;  %v204_v53 = vmul.f32 %v9252_v45, %v9252_v45 }
  0xd2   :  { %v9260_v54 = vsub.f32 %v105_v8, %v173_v50  ;;  %v9262_v55 = vsub.f32 %v106_v9, %v174_v51  ;;  %v220_v56 = vsel %vm119_vm0, %v202_v52, 0.0  ;;  %v226_v59 = vsel %vm119_vm0, %v204_v53, 0.0  ;;  %v375_v53 = vld [vmem:[#allocation8 + $0x10] sm:$0xff] }
  0xd3   :  { %224 = vadd.xlane.f32.xlu0 %v223_v49  ;;  %221 = vadd.xlane.f32.xlu1 %v220_v56  ;;  %v140_v57 = vpop.xlane.xlu0 %139  ;;  %v143_v58 = vpop.xlane.xlu1 %142  ;;  %v374_v56 = vld [vmem:[#allocation8 + $0x8] sm:$0xff] }
  0xd4   :  { %v175_v60 = vmul.f32 0.03125, %v140_v57  ;;  %v176_v61 = vmul.f32 0.03125, %v143_v58  ;;  %v205_v62 = vmul.f32 %v9260_v54, %v9260_v54  ;;  %v206_v63 = vmul.f32 %v9262_v55, %v9262_v55  ;;  %v373_v57 = vld [vmem:[#allocation8] sm:$0xff] }
  0xd6   :  { %v9271_v0 = vsub.f32 %v9202_v12, %v175_v60  ;;  %v9274_v1 = vsub.f32 %v9204_v13, %v176_v61  ;;  %v229_v2 = vsel %vm119_vm0, %v205_v62, 0.0  ;;  %v232_v5 = vsel %vm119_vm0, %v206_v63, 0.0 }
  0xd7   :  { %227 = vadd.xlane.f32.xlu1 %v226_v59  ;;  %230 = vadd.xlane.f32.xlu0 %v229_v2  ;;  %v146_v3 = vpop.xlane.xlu0 %145  ;;  %v149_v4 = vpop.xlane.xlu1 %148 }
  0xd8   :  { %v177_v6 = vmul.f32 0.03125, %v146_v3  ;;  %v178_v7 = vmul.f32 0.03125, %v149_v4  ;;  %v207_v8 = vmul.f32 %v9271_v0, %v9271_v0  ;;  %v208_v9 = vmul.f32 %v9274_v1, %v9274_v1 }
  0xda   :  { %v9283_v10 = vsub.f32 %v9210_v16, %v177_v6  ;;  %v9286_v11 = vsub.f32 %v9212_v17, %v178_v7  ;;  %v235_v12 = vsel %vm119_vm0, %v207_v8, 0.0  ;;  %v238_v15 = vsel %vm119_vm0, %v208_v9, 0.0 }
  0xdb   :  { %233 = vadd.xlane.f32.xlu1 %v232_v5  ;;  %236 = vadd.xlane.f32.xlu0 %v235_v12  ;;  %v152_v13 = vpop.xlane.xlu0 %151  ;;  %v155_v14 = vpop.xlane.xlu1 %154 }
  0xdc   :  { %v179_v18 = vmul.f32 0.03125, %v152_v13  ;;  %v180_v19 = vmul.f32 0.03125, %v155_v14  ;;  %v209_v22 = vmul.f32 %v9283_v10, %v9283_v10  ;;  %v210_v16 = vmul.f32 %v9286_v11, %v9286_v11 }
  0xde   :  { %v9295_v23 = vsub.f32 %v9218_v20, %v179_v18  ;;  %v9298_v17 = vsub.f32 %v9220_v21, %v180_v19  ;;  %v241_v26 = vsel %vm119_vm0, %v209_v22, 0.0  ;;  %v244_v31 = vsel %vm119_vm0, %v210_v16, 0.0 }
  0xdf   :  { %239 = vadd.xlane.f32.xlu1 %v238_v15  ;;  %242 = vadd.xlane.f32.xlu0 %v241_v26  ;;  %v158_v27 = vpop.xlane.xlu0 %157  ;;  %v161_v30 = vpop.xlane.xlu1 %160 }
  0xe0   :  { %v181_v32 = vmul.f32 0.03125, %v158_v27  ;;  %v182_v33 = vmul.f32 0.03125, %v161_v30  ;;  %v211_v34 = vmul.f32 %v9295_v23, %v9295_v23  ;;  %v212_v20 = vmul.f32 %v9298_v17, %v9298_v17 }
  0xe2   :  { %v9307_v35 = vsub.f32 %v9226_v24, %v181_v32  ;;  %v9310_v21 = vsub.f32 %v9228_v25, %v182_v33  ;;  %v247_v38 = vsel %vm119_vm0, %v211_v34, 0.0  ;;  %v250_v41 = vsel %vm119_vm0, %v212_v20, 0.0  ;;  %v9335_v32 = vld [vmem:[%s11624_s3] ss:$0 sm:$0xff] }
  0xe3   :  { %245 = vadd.xlane.f32.xlu1 %v244_v31  ;;  %248 = vadd.xlane.f32.xlu0 %v247_v38  ;;  %v164_v39 = vpop.xlane.xlu0 %163  ;;  %v167_v40 = vpop.xlane.xlu1 %166 }
  0xe4   :  { %v183_v42 = vmul.f32 0.03125, %v164_v39  ;;  %v184_v43 = vmul.f32 0.03125, %v167_v40  ;;  %v213_v46 = vmul.f32 %v9307_v35, %v9307_v35  ;;  %v214_v24 = vmul.f32 %v9310_v21, %v9310_v21  ;;  %v9341_v40 = vld [vmem:[%s11625_s4] ss:$0 sm:$0xff] }
  0xe6   :  { %v9319_v47 = vsub.f32 %v9234_v28, %v183_v42  ;;  %v9322_v25 = vsub.f32 %v9236_v29, %v184_v43  ;;  %v253_v48 = vsel %vm119_vm0, %v213_v46, 0.0  ;;  %v256_v49 = vsel %vm119_vm0, %v214_v24, 0.0  ;;  %v376_v29 = vld [vmem:[#allocation8 + $0x18] sm:$0xff] }
  0xe7   :  { %251 = vadd.xlane.f32.xlu1 %v250_v41  ;;  %254 = vadd.xlane.f32.xlu0 %v253_v48 }
  0xe8   :  { %v215_v50 = vmul.f32 %v9319_v47, %v9319_v47  ;;  %v216_v51 = vmul.f32 %v9322_v25, %v9322_v25  ;;  %8138 = vmatprep.subr.mxu0 %v376_v29  ;;  %8650 = vmatprep.subr.mxu1 %v376_v29 }
  0xe9   :  { %8139 = vmatpush3.msra.mxu0 %v376_v29  ;;  %8654 = vmatpush3.msra.mxu1 %v376_v29 }
  0xea   :  { %v259_v52 = vsel %vm119_vm0, %v215_v50, 0.0  ;;  %v262_v28 = vsel %vm119_vm0, %v216_v51, 0.0  ;;  %8140 = vmatprep.subr.mxu0 %v375_v53  ;;  %8651 = vmatprep.subr.mxu1 %v375_v53 }
  0xeb   :  { %257 = vadd.xlane.f32.xlu1 %v256_v49  ;;  %260 = vadd.xlane.f32.xlu0 %v259_v52 }
  0xec   :  { %8141 = vmatpush3.msra.mxu0 %v375_v53  ;;  %8655 = vmatpush3.msra.mxu1 %v375_v53 }
  0xed   :  { %8142 = vmatprep.subr.mxu0 %v374_v56  ;;  %8652 = vmatprep.subr.mxu1 %v374_v56 }
  0xee   :  { %8143 = vmatpush3.msra.mxu0 %v374_v56  ;;  %8656 = vmatpush3.msra.mxu1 %v374_v56 }
  0xef   :  { %263 = vadd.xlane.f32.xlu1 %v262_v28  ;;  %8144 = vmatprep.subr.mxu0 %v373_v57 }
  0xf0   :  { %8145 = vmatpush3.msra.mxu0 %v373_v57  ;;  %8653 = vmatprep.subr.mxu1 %v373_v57 }
  0xf1   :  { %8657 = vmatpush3.msra.mxu1 %v373_v57 }
 0x158   :  { %v219_v58 = vpop.xlane.xlu0 %218 }
 0x159   :  { %v265_v59 = vmul.f32 0.03125, %v219_v58 }
 0x15b   :  { %v281_v60 = vadd.f32 1e-05, %v265_v59 }
 0x15c   :  { %v222_v61 = vpop.xlane.xlu1 %221  ;;  %v225_v62 = vpop.xlane.xlu0 %224 }
 0x15d   :  { %8679 = vrsqrt.f32 %v281_v60  ;;  %v266_v63 = vmul.f32 0.03125, %v222_v61  ;;  %v267_v2 = vmul.f32 0.03125, %v225_v62 }
 0x15f   :  { %v282_v3 = vadd.f32 1e-05, %v266_v63  ;;  %v283_v4 = vadd.f32 1e-05, %v267_v2 }
 0x160   :  { %v228_v5 = vpop.xlane.xlu1 %227  ;;  %v231_v6 = vpop.xlane.xlu0 %230 }
 0x161   :  { %8681 = vrsqrt.f32 %v282_v3  ;;  %v268_v7 = vmul.f32 0.03125, %v228_v5  ;;  %v269_v8 = vmul.f32 0.03125, %v231_v6 }
 0x162   :  { %8683 = vrsqrt.f32 %v283_v4 }
 0x163   :  { %v284_v9 = vadd.f32 1e-05, %v268_v7  ;;  %v285_v12 = vadd.f32 1e-05, %v269_v8 }
 0x164   :  { %v234_v13 = vpop.xlane.xlu1 %233  ;;  %v237_v14 = vpop.xlane.xlu0 %236 }
 0x165   :  { %8685 = vrsqrt.f32 %v284_v9  ;;  %v270_v15 = vmul.f32 0.03125, %v234_v13  ;;  %v271_v18 = vmul.f32 0.03125, %v237_v14 }
 0x166   :  { %8687 = vrsqrt.f32 %v285_v12 }
 0x167   :  { %v286_v19 = vadd.f32 1e-05, %v270_v15  ;;  %v287_v22 = vadd.f32 1e-05, %v271_v18 }
 0x168   :  { %v240_v16 = vpop.xlane.xlu1 %239  ;;  %v243_v26 = vpop.xlane.xlu0 %242 }
 0x169   :  { %8689 = vrsqrt.f32 %v286_v19  ;;  %v272_v27 = vmul.f32 0.03125, %v240_v16  ;;  %v273_v30 = vmul.f32 0.03125, %v243_v26 }
 0x16a   :  { %v8680_v31 = vpop.eup %8679  ;;  %8691 = vrsqrt.f32 %v287_v22 }
 0x16b   :  { %v288_v33 = vadd.f32 1e-05, %v272_v27  ;;  %v289_v34 = vadd.f32 1e-05, %v273_v30  ;;  %v313_v20 = vmul.f32 %v8680_v31, %v9242_v36 }
 0x16c   :  { %v246_v38 = vpop.xlane.xlu1 %245  ;;  %v249_v39 = vpop.xlane.xlu0 %248 }
 0x16d   :  { %8693 = vrsqrt.f32 %v288_v33  ;;  %v274_v41 = vmul.f32 0.03125, %v246_v38  ;;  %v275_v42 = vmul.f32 0.03125, %v249_v39  ;;  %v335_v43 = vmul.f32 %v9335_v32, %v313_v20 }
 0x16e   :  { %v8682_v46 = vpop.eup %8681  ;;  %8695 = vrsqrt.f32 %v289_v34 }
 0x16f   :  { %v8684_v24 = vpop.eup %8683  ;;  %v290_v48 = vadd.f32 1e-05, %v274_v41  ;;  %v291_v49 = vadd.f32 1e-05, %v275_v42  ;;  %v357_v50 = vadd.f32 %v9341_v40, %v335_v43  ;;  %v314_v36 = vmul.f32 %v8682_v46, %v9250_v44 }
 0x170   :  { %v252_v51 = vpop.xlane.xlu1 %251  ;;  %v255_v52 = vpop.xlane.xlu0 %254  ;;  %v315_v28 = vmul.f32 %v8684_v24, %v9244_v37 }
 0x171   :  { %8697 = vrsqrt.f32 %v290_v48  ;;  %v276_v29 = vmul.f32 0.03125, %v252_v51  ;;  %v277_v53 = vmul.f32 0.03125, %v255_v52  ;;  %8146 = vmatprep.mubr.msk.f32.mxu0 %vm119_vm0, %v357_v50  ;;  %v336_v56 = vmul.f32 %v9335_v32, %v314_v36 }
 0x172   :  { %v8686_v57 = vpop.eup %8685  ;;  %8699 = vrsqrt.f32 %v291_v49  ;;  %v337_v58 = vmul.f32 %v9335_v32, %v315_v28 }
 0x173   :  { %v8688_v59 = vpop.eup %8687  ;;  %v292_v60 = vadd.f32 1e-05, %v276_v29  ;;  %v293_v61 = vadd.f32 1e-05, %v277_v53  ;;  %v358_v44 = vadd.f32 %v9341_v40, %v336_v56  ;;  %v316_v62 = vmul.f32 %v8686_v57, %v9252_v45 }
 0x174   :  { %v258_v63 = vpop.xlane.xlu1 %257  ;;  %v261_v37 = vpop.xlane.xlu0 %260  ;;  %v359_v2 = vadd.f32 %v9341_v40, %v337_v58  ;;  %v317_v3 = vmul.f32 %v8688_v59, %v9260_v54 }
 0x175   :  { %8701 = vrsqrt.f32 %v292_v60  ;;  %v278_v4 = vmul.f32 0.03125, %v258_v63  ;;  %v279_v5 = vmul.f32 0.03125, %v261_v37  ;;  %8147 = vmatmul.mubr.msk.f32.vlgmr.msra.gmra.mxu0 %vm119_vm0, %v358_v44  ;;  %v338_v6 = vmul.f32 %v9335_v32, %v316_v62  ;;  %v7616_v44 = vld [vmem:[%s11627_s6] ss:$0 sm:$0xff]  ;;  %s9103_s6 = smov 64  }
 0x176   :  { %v8690_v7 = vpop.eup %8689  ;;  %8703 = vrsqrt.f32 %v293_v61  ;;  %8149 = vmatprep.mubr.msk.f32.mxu0 %vm119_vm0, %v359_v2  ;;  %v339_v8 = vmul.f32 %v9335_v32, %v317_v3 }
 0x177   :  { %v8692_v45 = vpop.eup %8691  ;;  %v294_v9 = vadd.f32 1e-05, %v278_v4  ;;  %v295_v12 = vadd.f32 1e-05, %v279_v5  ;;  %v360_v13 = vadd.f32 %v9341_v40, %v338_v6  ;;  %v318_v54 = vmul.f32 %v8690_v7, %v9262_v55 }
 0x178   :  { %v264_v14 = vpop.xlane.xlu1 %263  ;;  %v361_v15 = vadd.f32 %v9341_v40, %v339_v8  ;;  %v319_v18 = vmul.f32 %v8692_v45, %v9271_v0 }
 0x179   :  { %8705 = vrsqrt.f32 %v294_v9  ;;  %v280_v19 = vmul.f32 0.03125, %v264_v14  ;;  %8150 = vmatmul.mubr.msk.f32.gmra.mxu0 %vm119_vm0, %v360_v13  ;;  %v340_v22 = vmul.f32 %v9335_v32, %v318_v54 }
 0x17a   :  { %v8694_v16 = vpop.eup %8693  ;;  %8707 = vrsqrt.f32 %v295_v12  ;;  %8152 = vmatprep.mubr.msk.f32.mxu0 %vm119_vm0, %v361_v15  ;;  %v341_v26 = vmul.f32 %v9335_v32, %v319_v18 }
 0x17b   :  { %v8696_v27 = vpop.eup %8695  ;;  %v296_v30 = vadd.f32 1e-05, %v280_v19  ;;  %v362_v55 = vadd.f32 %v9341_v40, %v340_v22  ;;  %v320_v31 = vmul.f32 %v8694_v16, %v9274_v1 }
 0x17c   :  { %v363_v0 = vadd.f32 %v9341_v40, %v341_v26  ;;  %v321_v33 = vmul.f32 %v8696_v27, %v9283_v10 }
 0x17d   :  { %8709 = vrsqrt.f32 %v296_v30  ;;  %8153 = vmatmul.mubr.msk.f32.gmra.mxu0 %vm119_vm0, %v362_v55  ;;  %v342_v34 = vmul.f32 %v9335_v32, %v320_v31 }
 0x17e   :  { %v8698_v20 = vpop.eup %8697  ;;  %8155 = vmatprep.mubr.msk.f32.mxu0 %vm119_vm0, %v363_v0  ;;  %v343_v38 = vmul.f32 %v9335_v32, %v321_v33 }
 0x17f   :  { %v8700_v39 = vpop.eup %8699  ;;  %v364_v41 = vadd.f32 %v9341_v40, %v342_v34  ;;  %v322_v42 = vmul.f32 %v8698_v20, %v9286_v11 }
 0x180   :  { %v365_v1 = vadd.f32 %v9341_v40, %v343_v38  ;;  %v323_v43 = vmul.f32 %v8700_v39, %v9295_v23 }
 0x181   :  { %8156 = vmatmul.mubr.msk.f32.gmra.mxu0 %vm119_vm0, %v364_v41  ;;  %v344_v10 = vmul.f32 %v9335_v32, %v322_v42 }
 0x182   :  { %v8702_v46 = vpop.eup %8701  ;;  %8158 = vmatprep.mubr.msk.f32.mxu1 %vm119_vm0, %v365_v1  ;;  %v345_v24 = vmul.f32 %v9335_v32, %v323_v43 }
 0x183   :  { %v8704_v48 = vpop.eup %8703  ;;  %v366_v49 = vadd.f32 %v9341_v40, %v344_v10  ;;  %v324_v50 = vmul.f32 %v8702_v46, %v9298_v17 }
 0x184   :  { %v367_v11 = vadd.f32 %v9341_v40, %v345_v24  ;;  %v325_v36 = vmul.f32 %v8704_v48, %v9307_v35 }
 0x185   :  { %8159 = vmatmul.mubr.msk.f32.vlgmr.msra.gmra.mxu1 %vm119_vm0, %v366_v49  ;;  %v346_v23 = vmul.f32 %v9335_v32, %v324_v50 }
 0x186   :  { %v8706_v51 = vpop.eup %8705  ;;  %8161 = vmatprep.mubr.msk.f32.mxu1 %vm119_vm0, %v367_v11  ;;  %v347_v52 = vmul.f32 %v9335_v32, %v325_v36 }
 0x187   :  { %v8708_v28 = vpop.eup %8707  ;;  %v368_v29 = vadd.f32 %v9341_v40, %v346_v23  ;;  %v326_v53 = vmul.f32 %v8706_v51, %v9310_v21 }
 0x188   :  { %v369_v17 = vadd.f32 %v9341_v40, %v347_v52  ;;  %v327_v56 = vmul.f32 %v8708_v28, %v9319_v47 }
 0x189   :  { %8162 = vmatmul.mubr.msk.f32.gmra.mxu1 %vm119_vm0, %v368_v29  ;;  %v348_v35 = vmul.f32 %v9335_v32, %v326_v53 }
 0x18a   :  { %v8710_v57 = vpop.eup %8709  ;;  %8164 = vmatprep.mubr.msk.f32.mxu1 %vm119_vm0, %v369_v17  ;;  %v349_v58 = vmul.f32 %v9335_v32, %v327_v56 }
 0x18b   :  { %v370_v59 = vadd.f32 %v9341_v40, %v348_v35  ;;  %v328_v60 = vmul.f32 %v8710_v57, %v9322_v25 }
 0x18c   :  { %v371_v61 = vadd.f32 %v9341_v40, %v349_v58 }
 0x18d   :  { %8165 = vmatmul.mubr.msk.f32.gmra.mxu1 %vm119_vm0, %v370_v59  ;;  %v350_v21 = vmul.f32 %v9335_v32, %v328_v60 }
 0x18e   :  { %8167 = vmatprep.mubr.msk.f32.mxu1 %vm119_vm0, %v371_v61 }
 0x18f   :  { %v372_v47 = vadd.f32 %v9341_v40, %v350_v21 }
 0x191   :  { %8168 = vmatmul.mubr.msk.f32.gmra.mxu1 %vm119_vm0, %v372_v47 }
 0x235   :  { %v8148_v62 = vpop.f32.mrf.mxu0 }
 0x236   :  { %v9409_v63 = vadd.f32 %v8148_v62, %v7616_v44 }
 0x237   :  { %v498_v25 = vpop.f32.mrf.mxu0 }
 0x238   :  { %v9411_v37 = vadd.f32 %v7616_v44, %v498_v25  ;;  %599 = vrot.lane.b32.xlu0 %v9409_v63, %s9102_s16  ;;  %v9501_v39 = vmul.f32 0.35355338, %v9409_v63 }
 0x239   :  { %v8151_v32 = vpop.f32.mrf.mxu0 }
 0x23a   :  { %597 = vrot.lane.b32.xlu1 %v9411_v37, %s9102_s16  ;;  %v9418_v40 = vmul.f32 0.35355338, %v9411_v37  ;;  %v9420_v3 = vadd.f32 %v8151_v32, %v7616_v44 }
 0x23b   :  { %v508_v2 = vpop.f32.mrf.mxu0 }
 0x23c   :  { %8174 = vmatprep.mubr.msk.f32.mxu1 %vm601_vm1, %v9418_v40  ;;  %v9428_v7 = vadd.f32 %v7616_v44, %v508_v2  ;;  %v9539_v49 = vmul.f32 0.35355338, %v9420_v3 }
 0x23d   :  { %v8154_v4 = vpop.f32.mrf.mxu0 }
 0x23e   :  { %v9424_v5 = vadd.f32 %v8154_v4, %v7616_v44  ;;  %691 = vrot.lane.b32.xlu1 %v9420_v3, %s9102_s16  ;;  %v9519_v41 = vmul.f32 0.35355338, %v9428_v7  ;;  %11707 = vst [vmem:[#allocation18_spill] sm:$0xff] %v9539_v49 }
 0x23f   :  { %v518_v6 = vpop.f32.mrf.mxu0 }
 0x240   :  { %782 = vrot.lane.b32.xlu0 %v9424_v5, %s9102_s16  ;;  %v9436_v9 = vadd.f32 %v7616_v44, %v518_v6  ;;  %11706 = vst [vmem:[#allocation17_spill] sm:$0xff] %v9519_v41  ;;  %v9556_v52 = vmul.f32 0.35355338, %v9424_v5 }
 0x241   :  { %v8157_v8 = vpop.f32.mrf.mxu0 }
 0x242   :  { %v9432_v45 = vadd.f32 %v8157_v8, %v7616_v44  ;;  %689 = vrot.lane.b32.xlu1 %v9428_v7, %s9102_s16  ;;  %v9542_v11 = vmul.f32 0.35355338, %v9436_v9  ;;  %11709 = vst [vmem:[#allocation20_spill] sm:$0xff] %v9556_v52  ;;  %v9627_v8 = vld [vmem:[#allocation5 + $0x8] sm:$0xff] }
 0x243   :  { %v528_v12 = vpop.f32.mrf.mxu0 }
 0x244   :  { %873 = vrot.lane.b32.xlu0 %v9432_v45, %s9102_s16  ;;  %v9444_v15 = vadd.f32 %v7616_v44, %v528_v12  ;;  %11708 = vst [vmem:[#allocation19_spill] sm:$0xff] %v9542_v11  ;;  %v9584_v58 = vmul.f32 0.35355338, %v9432_v45 }
 0x245   :  { %v8160_v13 = vpop.f32.mrf.mxu1 }
 0x246   :  { %v9440_v54 = vadd.f32 %v8160_v13, %v7616_v44  ;;  %780 = vrot.lane.b32.xlu1 %v9436_v9, %s9102_s16  ;;  %v9560_v29 = vmul.f32 0.35355338, %v9444_v15  ;;  %v9629_v13 = vld [vmem:[#allocation5] sm:$0xff] }
 0x247   :  { %v538_v14 = vpop.f32.mrf.mxu1 }
 0x248   :  { %11705 = vst [vmem:[#allocation16_spill] sm:$0xff] %v9440_v54  ;;  %v9446_v18 = vadd.f32 %v7616_v44, %v538_v14  ;;  %964 = vrot.lane.b32.xlu0 %v9440_v54, %s9102_s16  ;;  %11710 = vst [vmem:[#allocation21_spill] sm:$0xff] %v9560_v29  ;;  %v9566_v53 = vmul.f32 0.35355338, %v9440_v54  ;;  %v9631_v14 = vld [vmem:[#allocation7 + $0x8] sm:$0xff] }
 0x249   :  { %v8163_v19 = vpop.f32.mrf.mxu1  ;;  %11711 = vst [vmem:[#allocation22_spill] sm:$0xff] %v9631_v14 }
 0x24a   :  { %v9450_v22 = vadd.f32 %v8163_v19, %v7616_v44  ;;  %871 = vrot.lane.b32.xlu1 %v9444_v15, %s9102_s16  ;;  %v9455_v16 = vmul.f32 0.35355338, %v9446_v18 }
 0x24b   :  { %v548_v26 = vpop.f32.mrf.mxu1 }
 0x24c   :  { %8202 = vmatprep.mubr.msk.f32.mxu0 %vm601_vm1, %v9455_v16  ;;  %1055 = vrot.lane.b32.xlu0 %v9450_v22, %s9102_s16  ;;  %v9465_v31 = vadd.f32 %v7616_v44, %v548_v26 }
 0x24d   :  { %v8166_v27 = vpop.f32.mrf.mxu1 }
 0x24e   :  { %v9461_v30 = vadd.f32 %v8166_v27, %v7616_v44  ;;  %962 = vrot.lane.b32.xlu1 %v9446_v18, %s9102_s16  ;;  %v9588_v60 = vmul.f32 0.35355338, %v9465_v31  ;;  %v9634_v27 = vld [vmem:[#allocation7] sm:$0xff] }
 0x24f   :  { %v558_v55 = vpop.f32.mrf.mxu1  ;;  %11712 = vst [vmem:[#allocation23_spill] sm:$0xff] %v9634_v27 }
 0x250   :  { %1146 = vrot.lane.b32.xlu0 %v9461_v30, %s9102_s16  ;;  %v9473_v34 = vadd.f32 %v7616_v44, %v558_v55  ;;  %v9593_v61 = vmul.f32 0.35355338, %v9461_v30 }
 0x251   :  { %v8169_v0 = vpop.f32.mrf.mxu1 }
 0x252   :  { %v9469_v33 = vadd.f32 %v8169_v0, %v7616_v44  ;;  %1053 = vrot.lane.b32.xlu1 %v9465_v31, %s9102_s16  ;;  %v9572_v56 = vmul.f32 0.35355338, %v9473_v34 }
 0x253   :  { %v568_v20 = vpop.f32.mrf.mxu1 }
 0x254   :  { %1237 = vrot.lane.b32.xlu0 %v9469_v33, %s9102_s16  ;;  %v9479_v38 = vadd.f32 %v7616_v44, %v568_v20  ;;  %v9604_v44 = vmul.f32 0.35355338, %v9450_v22  ;;  %v9620_v4 = vmul.f32 0.35355338, %v9469_v33 }
 0x256   :  { %1144 = vrot.lane.b32.xlu1 %v9473_v34, %s9102_s16  ;;  %v9607_v62 = vmul.f32 0.35355338, %v9479_v38 }
 0x258   :  { %1535 = vrot.lane.b32.xlu0 %v9409_v63, %s9103_s6 }
 0x25a   :  { %1235 = vrot.lane.b32.xlu1 %v9479_v38, %s9102_s16 }
 0x25c   :  { %1620 = vrot.lane.b32.xlu0 %v9428_v7, %s9103_s6 }
 0x25e   :  { %1533 = vrot.lane.b32.xlu1 %v9411_v37, %s9103_s6 }
 0x260   :  { %1796 = vrot.lane.b32.xlu0 %v9432_v45, %s9103_s6 }
 0x262   :  { %1622 = vrot.lane.b32.xlu1 %v9420_v3, %s9103_s6 }
 0x264   :  { %1970 = vrot.lane.b32.xlu0 %v9450_v22, %s9103_s6 }
 0x266   :  { %1709 = vrot.lane.b32.xlu1 %v9424_v5, %s9103_s6 }
 0x268   :  { %1968 = vrot.lane.b32.xlu0 %v9465_v31, %s9103_s6 }
 0x26a   :  { %1707 = vrot.lane.b32.xlu1 %v9436_v9, %s9103_s6 }
 0x26c   :  { %2144 = vrot.lane.b32.xlu0 %v9469_v33, %s9103_s6 }
 0x26e   :  { %1883 = vrot.lane.b32.xlu1 %v9440_v54, %s9103_s6 }
 0x270   :  { %2329 = vrot.lane.b32.xlu0 %v9420_v3, %s9104_s17 }
 0x272   :  { %1881 = vrot.lane.b32.xlu1 %v9446_v18, %s9103_s6 }
 0x274   :  { %2327 = vrot.lane.b32.xlu0 %v9428_v7, %s9104_s17 }
 0x276   :  { %2057 = vrot.lane.b32.xlu1 %v9461_v30, %s9103_s6 }
 0x278   :  { %2234 = vrot.lane.b32.xlu0 %v9501_v39, %s9105_s18 }
 0x27a   :  { %2055 = vrot.lane.b32.xlu1 %v9473_v34, %s9103_s6 }
 0x27c   :  { %2418 = vrot.lane.b32.xlu0 %v9436_v9, %s9104_s17 }
 0x27e   :  { %2238 = vrot.lane.b32.xlu1 %v9409_v63, %s9104_s17 }
 0x280   :  { %1794 = vrot.lane.b32.xlu0 %v9444_v15, %s9103_s6 }
 0x282   :  { %2236 = vrot.lane.b32.xlu1 %v9411_v37, %s9104_s17 }
 0x284   :  { %2142 = vrot.lane.b32.xlu0 %v9479_v38, %s9103_s6 }
 0x286   :  { %2232 = vrot.lane.b32.xlu1 %v9418_v40, %s9105_s18 }
 0x28a   :  { %2420 = vrot.lane.b32.xlu1 %v9424_v5, %s9104_s17 }
 0x28e   :  { %2323 = vrot.lane.b32.xlu1 %v9519_v41, %s9105_s18 }
 0x292   :  { %2511 = vrot.lane.b32.xlu1 %v9432_v45, %s9104_s17 }
 0x2aa   :  { %v600_v42 = vpop.permute.xlu0 %599 }
 0x2ab   :  { %8170 = vmatprep.subr.msk.mxu1 %vm601_vm1, %v600_v42 }
 0x2ac   :  { %v598_v1 = vpop.permute.xlu1 %597  ;;  %8171 = vmatpush3.xpose.msk.msra.mxu1 %vm601_vm1, %v600_v42 }
 0x2ad   :  { %8172 = vmatprep.subr.msk.mxu1 %vm601_vm1, %v598_v1 }
 0x2b0   :  { %v692_v43 = vpop.permute.xlu1 %691  ;;  %8173 = vmatpush3.xpose.msk.msra.mxu1 %vm601_vm1, %v598_v1 }
 0x2b1   :  { %8177 = vmatprep.subr.msk.mxu1 %vm601_vm1, %v692_v43 }
 0x2b2   :  { %v783_v10 = vpop.permute.xlu0 %782 }
 0x2b3   :  { %8175 = vmatmul.mubr.msk.f32.vlgmr.msra.gmra.mxu1 %vm601_vm1, %v9501_v39 }
 0x2b4   :  { %v690_v46 = vpop.permute.xlu1 %689  ;;  %8178 = vmatpush3.xpose.msk.msra.mxu1 %vm601_vm1, %v692_v43  ;;  %8181 = vmatprep.mubr.msk.f32.mxu1 %vm601_vm1, %v9519_v41 }
 0x2b5   :  { %8179 = vmatprep.subr.msk.mxu1 %vm601_vm1, %v690_v46 }
 0x2b6   :  { %v874_v24 = vpop.permute.xlu0 %873 }
 0x2b8   :  { %v781_v48 = vpop.permute.xlu1 %780  ;;  %8180 = vmatpush3.xpose.msk.msra.mxu1 %vm601_vm1, %v690_v46 }
 0x2b9   :  { %8184 = vmatprep.subr.msk.mxu1 %vm601_vm1, %v783_v10 }
 0x2ba   :  { %v965_v50 = vpop.permute.xlu0 %964 }
 0x2bb   :  { %8182 = vmatmul.mubr.msk.f32.vlgmr.msra.gmra.mxu1 %vm601_vm1, %v9539_v49  ;;  %8198 = vmatprep.subr.msk.mxu0 %vm601_vm1, %v965_v50 }
 0x2bc   :  { %v872_v36 = vpop.permute.xlu1 %871  ;;  %8185 = vmatpush3.xpose.msk.msra.mxu1 %vm601_vm1, %v783_v10  ;;  %8188 = vmatprep.mubr.msk.f32.mxu1 %vm601_vm1, %v9542_v11  ;;  %v9647_v10 = vld [vmem:[#allocation7 + $0x18] sm:$0xff] }
 0x2bd   :  { %8199 = vmatpush3.xpose.msk.msra.mxu0 %vm601_vm1, %v965_v50  ;;  %8186 = vmatprep.subr.msk.mxu1 %vm601_vm1, %v781_v48  ;;  %11713 = vst [vmem:[#allocation24_spill] sm:$0xff] %v9647_v10 }
 0x2be   :  { %v1056_v23 = vpop.permute.xlu0 %1055 }
 0x2c0   :  { %v963_v51 = vpop.permute.xlu1 %962  ;;  %8187 = vmatpush3.xpose.msk.msra.mxu1 %vm601_vm1, %v781_v48  ;;  %v9650_v48 = vld [vmem:[#allocation7 + $0x10] sm:$0xff] }
 0x2c1   :  { %8191 = vmatprep.subr.msk.mxu1 %vm601_vm1, %v874_v24  ;;  %8200 = vmatprep.subr.msk.mxu0 %vm601_vm1, %v963_v51  ;;  %11714 = vst [vmem:[#allocation25_spill] sm:$0xff] %v9650_v48 }
 0x2c2   :  { %8201 = vmatpush3.xpose.msk.msra.mxu0 %vm601_vm1, %v963_v51  ;;  %v1147_v28 = vpop.permute.xlu0 %1146 }
 0x2c3   :  { %8189 = vmatmul.mubr.msk.f32.vlgmr.msra.gmra.mxu1 %vm601_vm1, %v9556_v52  ;;  %8212 = vmatprep.subr.msk.mxu0 %vm601_vm1, %v1147_v28 }
 0x2c4   :  { %v1054_v17 = vpop.permute.xlu1 %1053  ;;  %8192 = vmatpush3.xpose.msk.msra.mxu1 %vm601_vm1, %v874_v24  ;;  %8195 = vmatprep.mubr.msk.f32.mxu1 %vm601_vm1, %v9560_v29 }
 0x2c5   :  { %8193 = vmatprep.subr.msk.mxu1 %vm601_vm1, %v872_v36  ;;  %8203 = vmatmul.mubr.msk.f32.vlgmr.msra.gmra.mxu0 %vm601_vm1, %v9566_v53 }
 0x2c6   :  { %8213 = vmatpush3.xpose.msk.msra.mxu0 %vm601_vm1, %v1147_v28  ;;  %8216 = vmatprep.mubr.msk.f32.mxu0 %vm601_vm1, %v9572_v56  ;;  %v1238_v35 = vpop.permute.xlu0 %1237 }
 0x2c8   :  { %v1145_v57 = vpop.permute.xlu1 %1144  ;;  %8194 = vmatpush3.xpose.msk.msra.mxu1 %vm601_vm1, %v872_v36 }
 0x2c9   :  { %8205 = vmatprep.subr.msk.mxu1 %vm601_vm1, %v1056_v23  ;;  %8214 = vmatprep.subr.msk.mxu0 %vm601_vm1, %v1145_v57 }
 0x2ca   :  { %8215 = vmatpush3.xpose.msk.msra.mxu0 %vm601_vm1, %v1145_v57  ;;  %v1536_v59 = vpop.permute.xlu0 %1535 }
 0x2cb   :  { %8196 = vmatmul.mubr.msk.f32.vlgmr.msra.gmra.mxu1 %vm601_vm1, %v9584_v58  ;;  %8226 = vmatprep.subr.mxu0 %v1536_v59 }
 0x2cc   :  { %v1236_v21 = vpop.permute.xlu1 %1235  ;;  %8206 = vmatpush3.xpose.msk.msra.mxu1 %vm601_vm1, %v1056_v23  ;;  %8209 = vmatprep.mubr.msk.f32.mxu1 %vm601_vm1, %v9588_v60 }
 0x2cd   :  { %8207 = vmatprep.subr.msk.mxu1 %vm601_vm1, %v1054_v17  ;;  %8217 = vmatmul.mubr.msk.f32.vlgmr.msra.gmra.mxu0 %vm601_vm1, %v9593_v61 }
 0x2ce   :  { %8227 = vmatpush3.msra.mxu0 %v1536_v59  ;;  %v1621_v32 = vpop.permute.xlu0 %1620  ;;  %v9663_v59 = vld [vmem:[#allocation7 + $0x20] sm:$0xff] }
 0x2cf   :  { %11715 = vst [vmem:[#allocation26_spill] sm:$0xff] %v9663_v59 }
 0x2d0   :  { %v1534_v47 = vpop.permute.xlu1 %1533  ;;  %8208 = vmatpush3.xpose.msk.msra.mxu1 %vm601_vm1, %v1054_v17 }
 0x2d1   :  { %8219 = vmatprep.subr.msk.mxu1 %vm601_vm1, %v1238_v35  ;;  %8228 = vmatprep.subr.mxu0 %v1534_v47 }
 0x2d2   :  { %8229 = vmatpush3.msra.mxu0 %v1534_v47  ;;  %v9624_v6 = vpop.permute.xlu0 %1796 }
 0x2d3   :  { %8210 = vmatmul.mubr.msk.f32.vlgmr.msra.gmra.mxu1 %vm601_vm1, %v9604_v44 }
 0x2d4   :  { %v1623_v25 = vpop.permute.xlu1 %1622  ;;  %8220 = vmatpush3.xpose.msk.msra.mxu1 %vm601_vm1, %v1238_v35  ;;  %8223 = vmatprep.mubr.msk.f32.mxu1 %vm601_vm1, %v9607_v62 }
 0x2d5   :  { %8221 = vmatprep.subr.msk.mxu1 %vm601_vm1, %v1236_v21 }
 0x2d8   :  { %v9615_v2 = vpop.permute.xlu1 %1709  ;;  %8222 = vmatpush3.xpose.msk.msra.mxu1 %vm601_vm1, %v1236_v21  ;;  %v9665_v21 = vld [vmem:[#allocation7 + $0x48] sm:$0xff] }
 0x2d9   :  { %8233 = vmatprep.subr.mxu1 %v1623_v25  ;;  %8240 = vmatprep.subr.mxu0 %v9615_v2  ;;  %11716 = vst [vmem:[#allocation27_spill] sm:$0xff] %v9665_v21 }
 0x2db   :  { %8224 = vmatmul.mubr.msk.f32.vlgmr.msra.gmra.mxu1 %vm601_vm1, %v9620_v4 }
 0x2dc   :  { %8234 = vmatpush3.msra.mxu1 %v1623_v25 }
 0x2dd   :  { %8235 = vmatprep.subr.mxu1 %v1621_v32 }
 0x2de   :  { %8236 = vmatpush3.msra.mxu1 %v1621_v32 }
 0x2df   :  { %8247 = vmatprep.subr.mxu1 %v9624_v6 }
 0x373   :  { %v8176_v12 = vpop.f32.mrf.mxu1 }
 0x374   :  { %v684_v19 = vadd.f32 %v8176_v12, %v9627_v8  ;;  %v9669_v12 = vld [vmem:[#allocation7 + $0x40] sm:$0xff] }
 0x375   :  { %v678_v26 = vpop.f32.mrf.mxu1  ;;  %11717 = vst [vmem:[#allocation28_spill] sm:$0xff] %v9669_v12 }
 0x376   :  { %v679_v55 = vadd.f32 %v678_v26, %v9629_v13  ;;  %v9638_v0 = vadd.f32 %v9631_v14, %v684_v19 }
 0x378   :  { %v1360_v20 = vsel %vm1356_vm2, %v9638_v0, -inf  ;;  %v9643_v42 = vadd.f32 %v9634_v27, %v679_v55 }
 0x379   :  { %1361 = vmax.xlane.f32.xlu1 %v1360_v20 }
 0x37a   :  { %v1357_v1 = vsel %vm1356_vm2, %v9643_v42, -inf }
 0x37b   :  { %v8183_v43 = vpop.f32.mrf.mxu1  ;;  %1358 = vmax.xlane.f32.xlu0 %v1357_v1 }
 0x37c   :  { %v775_v46 = vadd.f32 %v8183_v43, %v9627_v8 }
 0x37d   :  { %v769_v24 = vpop.f32.mrf.mxu1 }
 0x37e   :  { %v770_v50 = vadd.f32 %v769_v24, %v9629_v13  ;;  %v9654_v36 = vadd.f32 %v9647_v10, %v775_v46  ;;  %v9685_v24 = vld [vmem:[#allocation7 + $0x38] sm:$0xff] }
 0x37f   :  { %11718 = vst [vmem:[#allocation29_spill] sm:$0xff] %v9685_v24 }
 0x380   :  { %v1366_v23 = vsel %vm1356_vm2, %v9654_v36, -inf  ;;  %v9659_v51 = vadd.f32 %v9650_v48, %v770_v50 }
 0x381   :  { %1367 = vmax.xlane.f32.xlu0 %v1366_v23 }
 0x382   :  { %v1363_v17 = vsel %vm1356_vm2, %v9659_v51, -inf }
 0x383   :  { %v8190_v28 = vpop.f32.mrf.mxu1 }
 0x385   :  { %1364 = vmax.xlane.f32.xlu0 %v1363_v17  ;;  %v860_v35 = vpop.f32.mrf.mxu1  ;;  %v8204_v57 = vpop.f32.mrf.mxu0 }
 0x386   :  { %v861_v47 = vadd.f32 %v860_v35, %v9629_v13  ;;  %v1048_v25 = vadd.f32 %v8204_v57, %v9627_v8  ;;  %v9688_v35 = vld [vmem:[#allocation7 + $0x68] sm:$0xff]  ;;  %v9690_v57 = vld [vmem:[#allocation7 + $0x30] sm:$0xff] }
 0x387   :  { %v1042_v32 = vpop.f32.mrf.mxu0  ;;  %11719 = vst [vmem:[#allocation30_spill] sm:$0xff] %v9688_v35  ;;  %11720 = vst [vmem:[#allocation31_spill] sm:$0xff] %v9690_v57 }
 0x388   :  { %v1043_v19 = vadd.f32 %v1042_v32, %v9629_v13  ;;  %v9673_v26 = vadd.f32 %v9663_v59, %v861_v47  ;;  %v9676_v55 = vadd.f32 %v9665_v21, %v1048_v25  ;;  %v9741_v21 = vld [vmem:[#allocation7 + $0x78] sm:$0xff] }
 0x389   :  { %11725 = vst [vmem:[#allocation36_spill] sm:$0xff] %v9741_v21 }
 0x38a   :  { %v1369_v20 = vsel %vm1356_vm2, %v9673_v26, -inf  ;;  %v1384_v1 = vsel %vm1356_vm2, %v9676_v55, -inf  ;;  %v9683_v43 = vadd.f32 %v9669_v12, %v1043_v19  ;;  %v9718_v12 = vld [vmem:[#allocation7 + $0x28] sm:$0xff] }
 0x38b   :  { %1370 = vmax.xlane.f32.xlu0 %v1369_v20  ;;  %v8197_v46 = vpop.f32.mrf.mxu1  ;;  %1385 = vmax.xlane.f32.xlu1 %v1384_v1  ;;  %v9699_v1 = vld [vmem:[#allocation7 + $0x60] sm:$0xff]  ;;  %11723 = vst [vmem:[#allocation34_spill] sm:$0xff] %v9718_v12 }
 0x38c   :  { %v957_v50 = vadd.f32 %v8197_v46, %v9627_v8  ;;  %v1381_v32 = vsel %vm1356_vm2, %v9683_v43, -inf  ;;  %11721 = vst [vmem:[#allocation32_spill] sm:$0xff] %v9699_v1 }
 0x38d   :  { %v951_v23 = vpop.f32.mrf.mxu1  ;;  %v8218_v17 = vpop.f32.mrf.mxu0 }
 0x38e   :  { %v952_v47 = vadd.f32 %v951_v23, %v9629_v13  ;;  %v1230_v25 = vadd.f32 %v8218_v17, %v9627_v8  ;;  %v9697_v19 = vadd.f32 %v9685_v24, %v957_v50  ;;  %v866_v17 = vadd.f32 %v8190_v28, %v9627_v8  ;;  %v9723_v28 = vld [vmem:[#allocation7 + $0x50] sm:$0xff] }
 0x38f   :  { %1382 = vmax.xlane.f32.xlu1 %v1381_v32  ;;  %v1224_v20 = vpop.f32.mrf.mxu0  ;;  %11724 = vst [vmem:[#allocation35_spill] sm:$0xff] %v9723_v28 }
 0x390   :  { %v1225_v46 = vadd.f32 %v1224_v20, %v9629_v13  ;;  %v1378_v48 = vsel %vm1356_vm2, %v9697_v19, -inf  ;;  %v9705_v10 = vadd.f32 %v9688_v35, %v1230_v25  ;;  %v9708_v23 = vadd.f32 %v9690_v57, %v952_v47  ;;  %v9716_v20 = vld [vmem:[#allocation7 + $0x58] sm:$0xff] }
 0x391   :  { %1379 = vmax.xlane.f32.xlu0 %v1378_v48  ;;  %11722 = vst [vmem:[#allocation33_spill] sm:$0xff] %v9716_v20 }
 0x392   :  { %v1396_v50 = vsel %vm1356_vm2, %v9705_v10, -inf  ;;  %v9714_v32 = vadd.f32 %v9699_v1, %v1225_v46  ;;  %v1375_v47 = vsel %vm1356_vm2, %v9708_v23, -inf  ;;  %v9732_v1 = vadd.f32 %v9718_v12, %v866_v17 }
 0x393   :  { %v8211_v24 = vpop.f32.mrf.mxu1  ;;  %1397 = vmax.xlane.f32.xlu1 %v1396_v50 }
 0x394   :  { %v1139_v25 = vadd.f32 %v8211_v24, %v9627_v8  ;;  %v1393_v46 = vsel %vm1356_vm2, %v9714_v32, -inf }
 0x395   :  { %1376 = vmax.xlane.f32.xlu0 %v1375_v47  ;;  %v1133_v48 = vpop.f32.mrf.mxu1 }
 0x396   :  { %v1134_v57 = vadd.f32 %v1133_v48, %v9629_v13  ;;  %v9729_v50 = vadd.f32 %v9716_v20, %v1139_v25  ;;  %v1372_v48 = vsel %vm1356_vm2, %v9732_v1, -inf  ;;  %v9746_v20 = vld [vmem:[#allocation7 + $0x70] sm:$0xff] }
 0x397   :  { %1394 = vmax.xlane.f32.xlu1 %v1393_v46  ;;  %11726 = vst [vmem:[#allocation37_spill] sm:$0xff] %v9746_v20 }
 0x398   :  { %v1390_v24 = vsel %vm1356_vm2, %v9729_v50, -inf  ;;  %v9737_v47 = vadd.f32 %v9723_v28, %v1134_v57 }
 0x399   :  { %1391 = vmax.xlane.f32.xlu0 %v1390_v24 }
 0x39a   :  { %v1387_v17 = vsel %vm1356_vm2, %v9737_v47, -inf }
 0x39b   :  { %1373 = vmax.xlane.f32.xlu1 %v1372_v48  ;;  %v8225_v35 = vpop.f32.mrf.mxu1 }
 0x39c   :  { %v1321_v25 = vadd.f32 %v8225_v35, %v9627_v8 }
 0x39d   :  { %1388 = vmax.xlane.f32.xlu0 %v1387_v17  ;;  %v1315_v46 = vpop.f32.mrf.mxu1  ;;  %v9775_v17 = vpop.permute.xlu0 %1970 }
 0x39e   :  { %v1316_v57 = vadd.f32 %v1315_v46, %v9629_v13  ;;  %v9750_v24 = vadd.f32 %v9741_v21, %v1321_v25  ;;  %v9769_v13 = vpop.permute.xlu1 %1707 }
 0x3a0   :  { %v1402_v48 = vsel %vm1356_vm2, %v9750_v24, -inf  ;;  %v9755_v28 = vadd.f32 %v9746_v20, %v1316_v57 }
 0x3a1   :  { %1403 = vmax.xlane.f32.xlu1 %v1402_v48  ;;  %v9779_v57 = vpop.permute.xlu0 %1968 }
 0x3a2   :  { %v1399_v8 = vsel %vm1356_vm2, %v9755_v28, -inf  ;;  %v9771_v35 = vpop.permute.xlu1 %1883 }
 0x3a3   :  { %1400 = vmax.xlane.f32.xlu0 %v1399_v8 }
 0x3a5   :  { %v9783_v8 = vpop.permute.xlu0 %2144 }
 0x3a6   :  { %v9773_v25 = vpop.permute.xlu1 %1881  ;;  %11730 = vst [vmem:[#allocation41_spill] sm:$0xff] %v9783_v8 }
 0x3a7   :  { %11727 = vst [vmem:[#allocation38_spill] sm:$0xff] %v9773_v25 }
 0x3aa   :  { %v9777_v46 = vpop.permute.xlu1 %2057 }
 0x3ab   :  { %11728 = vst [vmem:[#allocation39_spill] sm:$0xff] %v9777_v46 }
 0x3ae   :  { %v9781_v48 = vpop.permute.xlu1 %2055 }
 0x3af   :  { %11729 = vst [vmem:[#allocation40_spill] sm:$0xff] %v9781_v48 }
 0x3b2   :  { %2414 = vrot.lane.b32.xlu1 %v9542_v11, %s9105_s18  ;;  %v9787_v11 = vpop.permute.xlu0 %2329 }
 0x3b3   :  { %11732 = vst [vmem:[#allocation43_spill] sm:$0xff] %v9787_v11 }
 0x3b6   :  { %2602 = vrot.lane.b32.xlu1 %v9440_v54, %s9104_s17  ;;  %v9791_v20 = vpop.permute.xlu0 %2327 }
 0x3b7   :  { %11734 = vst [vmem:[#allocation45_spill] sm:$0xff] %v9791_v20 }
 0x3b9   :  { %2325 = vrot.lane.b32.xlu0 %v9539_v49, %s9105_s18  ;;  %v9785_v49 = vpop.permute.xlu1 %2238 }
 0x3ba   :  { %11731 = vst [vmem:[#allocation42_spill] sm:$0xff] %v9785_v49  ;;  %v9795_v59 = vpop.permute.xlu0 %2234 }
 0x3bb   :  { %11736 = vst [vmem:[#allocation47_spill] sm:$0xff] %v9795_v59 }
 0x3bd   :  { %2509 = vrot.lane.b32.xlu0 %v9444_v15, %s9104_s17 }
 0x3be   :  { %v9799_v27 = vpop.permute.xlu0 %2418 }
 0x3bf   :  { %11738 = vst [vmem:[#allocation49_spill] sm:$0xff] %v9799_v27 }
 0x3c1   :  { %2416 = vrot.lane.b32.xlu0 %v9556_v52, %s9105_s18  ;;  %v9789_v52 = vpop.permute.xlu1 %2236 }
 0x3c2   :  { %11733 = vst [vmem:[#allocation44_spill] sm:$0xff] %v9789_v52  ;;  %v9803_v48 = vpop.permute.xlu0 %1794 }
 0x3c5   :  { %v9793_v21 = vpop.permute.xlu1 %2232 }
 0x3c6   :  { %11735 = vst [vmem:[#allocation46_spill] sm:$0xff] %v9793_v21  ;;  %v9807_v49 = vpop.permute.xlu0 %2142 }
 0x3c7   :  { %11741 = vst [vmem:[#allocation52_spill] sm:$0xff] %v9807_v49 }
 0x3c9   :  { %v9797_v12 = vpop.permute.xlu1 %2420 }
 0x3ca   :  { %11737 = vst [vmem:[#allocation48_spill] sm:$0xff] %v9797_v12 }
 0x3cd   :  { %v9801_v14 = vpop.permute.xlu1 %2323 }
 0x3ce   :  { %11739 = vst [vmem:[#allocation50_spill] sm:$0xff] %v9801_v14 }
 0x3d1   :  { %v9805_v46 = vpop.permute.xlu1 %2511 }
 0x3d2   :  { %11740 = vst [vmem:[#allocation51_spill] sm:$0xff] %v9805_v46 }
 0x402   :  { %v1362_v11 = vpop.xlane.xlu1 %1361 }
 0x403   :  { %v1406_v52 = vsub.f32 %v9638_v0, %v1362_v11 }
 0x404   :  { %v1359_v20 = vpop.xlane.xlu0 %1358 }
 0x405   :  { %v1423_v25 = vmul.f32 1.442695, %v1406_v52  ;;  %v1405_v21 = vsub.f32 %v9643_v42, %v1359_v20 }
 0x407   :  { %8711 = vpow2.f32 %v1423_v25  ;;  %v1421_v59 = vmul.f32 1.442695, %v1405_v21 }
 0x409   :  { %8713 = vpow2.f32 %v1421_v59 }
 0x40a   :  { %v1368_v12 = vpop.xlane.xlu0 %1367 }
 0x40b   :  { %v1408_v27 = vsub.f32 %v9654_v36, %v1368_v12 }
 0x40d   :  { %v1427_v14 = vmul.f32 1.442695, %v1408_v27 }
 0x40e   :  { %v1365_v41 = vpop.xlane.xlu0 %1364 }
 0x40f   :  { %8715 = vpow2.f32 %v1427_v14  ;;  %v1407_v46 = vsub.f32 %v9659_v51, %v1365_v41 }
 0x411   :  { %v1425_v8 = vmul.f32 1.442695, %v1407_v46 }
 0x413   :  { %8717 = vpow2.f32 %v1425_v8 }
 0x414   :  { %v9813_v49 = vpop.eup %8711  ;;  %v1386_v11 = vpop.xlane.xlu1 %1385 }
 0x415   :  { %v1414_v52 = vsub.f32 %v9676_v55, %v1386_v11  ;;  %v1456_v0 = vsel %vm1356_vm2, %v9813_v49, 0.0  ;;  %v1371_v59 = vpop.xlane.xlu0 %1370 }
 0x416   :  { %v9818_v42 = vpop.eup %8713  ;;  %1457 = vadd.xlane.f32.xlu1 %v1456_v0 }
 0x417   :  { %v1439_v36 = vmul.f32 1.442695, %v1414_v52  ;;  %v1453_v14 = vsel %vm1356_vm2, %v9818_v42, 0.0 }
 0x418   :  { %v1383_v27 = vpop.xlane.xlu1 %1382  ;;  %1454 = vadd.xlane.f32.xlu0 %v1453_v14 }
 0x419   :  { %8719 = vpow2.f32 %v1439_v36  ;;  %v1413_v41 = vsub.f32 %v9683_v43, %v1383_v27 }
 0x41a   :  { %v1380_v51 = vpop.xlane.xlu0 %1379 }
 0x41b   :  { %v1437_v21 = vmul.f32 1.442695, %v1413_v41  ;;  %v1412_v12 = vsub.f32 %v9697_v19, %v1380_v51 }
 0x41c   :  { %v9824_v55 = vpop.eup %8715  ;;  %v1398_v20 = vpop.xlane.xlu1 %1397 }
 0x41d   :  { %8721 = vpow2.f32 %v1437_v21  ;;  %v1435_v25 = vmul.f32 1.442695, %v1412_v12  ;;  %v1418_v46 = vsub.f32 %v9705_v10, %v1398_v20  ;;  %v1462_v8 = vsel %vm1356_vm2, %v9824_v55, 0.0 }
 0x41e   :  { %1463 = vadd.xlane.f32.xlu0 %v1462_v8  ;;  %v1377_v11 = vpop.xlane.xlu0 %1376  ;;  %v1409_v10 = vsub.f32 %v9673_v26, %v1371_v59 }
 0x41f   :  { %8723 = vpow2.f32 %v1435_v25  ;;  %v1447_v52 = vmul.f32 1.442695, %v1418_v46  ;;  %v1411_v43 = vsub.f32 %v9708_v23, %v1377_v11 }
 0x420   :  { %v9830_v0 = vpop.eup %8717  ;;  %v1395_v36 = vpop.xlane.xlu1 %1394  ;;  %v1429_v46 = vmul.f32 1.442695, %v1409_v10 }
 0x421   :  { %8725 = vpow2.f32 %v1447_v52  ;;  %v1433_v19 = vmul.f32 1.442695, %v1411_v43  ;;  %v1417_v14 = vsub.f32 %v9714_v32, %v1395_v36  ;;  %v1459_v27 = vsel %vm1356_vm2, %v9830_v0, 0.0 }
 0x422   :  { %1460 = vadd.xlane.f32.xlu0 %v1459_v27  ;;  %v1392_v41 = vpop.xlane.xlu0 %1391 }
 0x423   :  { %8727 = vpow2.f32 %v1433_v19  ;;  %v1445_v51 = vmul.f32 1.442695, %v1417_v14  ;;  %v1416_v21 = vsub.f32 %v9729_v50, %v1392_v41 }
 0x424   :  { %v1374_v12 = vpop.xlane.xlu1 %1373 }
 0x425   :  { %8729 = vpow2.f32 %v1445_v51  ;;  %v1443_v23 = vmul.f32 1.442695, %v1416_v21  ;;  %v1410_v20 = vsub.f32 %v9732_v1, %v1374_v12 }
 0x426   :  { %v9838_v25 = vpop.eup %8719  ;;  %v1389_v32 = vpop.xlane.xlu0 %1388 }
 0x427   :  { %8731 = vpow2.f32 %v1443_v23  ;;  %v1431_v8 = vmul.f32 1.442695, %v1410_v20  ;;  %v1415_v11 = vsub.f32 %v9737_v47, %v1389_v32  ;;  %v1480_v26 = vsel %vm1356_vm2, %v9838_v25, 0.0 }
 0x428   :  { %1481 = vadd.xlane.f32.xlu1 %v1480_v26 }
 0x429   :  { %8733 = vpow2.f32 %v1431_v8  ;;  %v1441_v59 = vmul.f32 1.442695, %v1415_v11 }
 0x42a   :  { %v9843_v50 = vpop.eup %8721  ;;  %8735 = vpow2.f32 %v1429_v46 }
 0x42b   :  { %8737 = vpow2.f32 %v1441_v59  ;;  %v1477_v1 = vsel %vm1356_vm2, %v9843_v50, 0.0 }
 0x42c   :  { %v9847_v52 = vpop.eup %8723  ;;  %1478 = vadd.xlane.f32.xlu1 %v1477_v1  ;;  %v1401_v43 = vpop.xlane.xlu0 %1400 }
 0x42d   :  { %v1419_v36 = vsub.f32 %v9755_v28, %v1401_v43  ;;  %v1474_v47 = vsel %vm1356_vm2, %v9847_v52, 0.0  ;;  %v1404_v1 = vpop.xlane.xlu1 %1403 }
 0x42e   :  { %v9852_v19 = vpop.eup %8725  ;;  %1475 = vadd.xlane.f32.xlu0 %v1474_v47  ;;  %v1420_v43 = vsub.f32 %v9750_v24, %v1404_v1 }
 0x42f   :  { %v1449_v14 = vmul.f32 1.442695, %v1419_v36  ;;  %v1492_v27 = vsel %vm1356_vm2, %v9852_v19, 0.0 }
 0x430   :  { %v9856_v10 = vpop.eup %8727  ;;  %1493 = vadd.xlane.f32.xlu1 %v1492_v27  ;;  %v1451_v36 = vmul.f32 1.442695, %v1420_v43 }
 0x431   :  { %8739 = vpow2.f32 %v1449_v14  ;;  %v1471_v41 = vsel %vm1356_vm2, %v9856_v10, 0.0  ;;  %v9929_v14 = vpop.permute.xlu0 %2325  ;;  %v9935_v27 = vpop.permute.xlu1 %2414 }
 0x432   :  { %v9860_v51 = vpop.eup %8729  ;;  %1472 = vadd.xlane.f32.xlu0 %v1471_v41  ;;  %8741 = vpow2.f32 %v1451_v36 }
 0x433   :  { %v1489_v28 = vsel %vm1356_vm2, %v9860_v51, 0.0 }
 0x434   :  { %v9864_v21 = vpop.eup %8731  ;;  %1490 = vadd.xlane.f32.xlu1 %v1489_v28 }
 0x435   :  { %v1486_v12 = vsel %vm1356_vm2, %v9864_v21, 0.0  ;;  %v9941_v41 = vpop.permute.xlu0 %2509  ;;  %v9947_v28 = vpop.permute.xlu1 %2602 }
 0x436   :  { %v9868_v23 = vpop.eup %8733  ;;  %1487 = vadd.xlane.f32.xlu0 %v1486_v12 }
 0x437   :  { %v9870_v20 = vpop.eup %8735  ;;  %v1468_v46 = vsel %vm1356_vm2, %v9868_v23, 0.0 }
 0x438   :  { %v9874_v32 = vpop.eup %8737  ;;  %1469 = vadd.xlane.f32.xlu1 %v1468_v46  ;;  %v1465_v11 = vsel %vm1356_vm2, %v9870_v20, 0.0 }
 0x439   :  { %v1483_v8 = vsel %vm1356_vm2, %v9874_v32, 0.0  ;;  %v9949_v12 = vpop.permute.xlu0 %2416 }
 0x43a   :  { %1484 = vadd.xlane.f32.xlu0 %v1483_v8 }
 0x43c   :  { %1466 = vadd.xlane.f32.xlu1 %v1465_v11 }
 0x43e   :  { %v9880_v26 = vpop.eup %8739 }
 0x43f   :  { %v1495_v59 = vsel %vm1356_vm2, %v9880_v26, 0.0  ;;  %v9899_v47 = vpop.eup %8741 }
 0x440   :  { %1496 = vadd.xlane.f32.xlu0 %v1495_v59  ;;  %v1498_v24 = vsel %vm1356_vm2, %v9899_v47, 0.0 }
 0x44d   :  { %2505 = vrot.lane.b32.xlu1 %v9560_v29, %s9105_s18 }
 0x456   :  { %2600 = vrot.lane.b32.xlu0 %v9446_v18, %s9104_s17 }
 0x45a   :  { %2507 = vrot.lane.b32.xlu0 %v9584_v58, %s9105_s18 }
 0x45e   :  { %2691 = vrot.lane.b32.xlu0 %v9465_v31, %s9104_s17 }
 0x462   :  { %2598 = vrot.lane.b32.xlu0 %v9566_v53, %s9105_s18 }
 0x466   :  { %2782 = vrot.lane.b32.xlu0 %v9473_v34, %s9104_s17 }
 0x46a   :  { %2689 = vrot.lane.b32.xlu0 %v9604_v44, %s9105_s18 }
 0x46e   :  { %2780 = vrot.lane.b32.xlu0 %v9593_v61, %s9105_s18 }
 0x471   :  { %1499 = vadd.xlane.f32.xlu1 %v1498_v24 }
 0x472   :  { %2869 = vrot.lane.b32.xlu0 %v9607_v62, %s9105_s18 }
 0x476   :  { %3170 = vrot.lane.b32.xlu0 %v9409_v63, %s9106_s19 }
 0x47a   :  { %3255 = vrot.lane.b32.xlu0 %v9428_v7, %s9106_s19 }
 0x47e   :  { %3431 = vrot.lane.b32.xlu0 %v9432_v45, %s9106_s19 }
 0x482   :  { %2693 = vrot.lane.b32.xlu1 %v9450_v22, %s9104_s17  ;;  %3429 = vrot.lane.b32.xlu0 %v9444_v15, %s9106_s19 }
 0x486   :  { %2596 = vrot.lane.b32.xlu1 %v9455_v16, %s9105_s18  ;;  %3605 = vrot.lane.b32.xlu0 %v9450_v22, %s9106_s19 }
 0x48a   :  { %2784 = vrot.lane.b32.xlu1 %v9461_v30, %s9104_s17  ;;  %3603 = vrot.lane.b32.xlu0 %v9465_v31, %s9106_s19 }
 0x48e   :  { %2687 = vrot.lane.b32.xlu1 %v9588_v60, %s9105_s18  ;;  %3779 = vrot.lane.b32.xlu0 %v9469_v33, %s9106_s19 }
 0x492   :  { %2875 = vrot.lane.b32.xlu1 %v9469_v33, %s9104_s17  ;;  %3777 = vrot.lane.b32.xlu0 %v9479_v38, %s9106_s19 }
 0x496   :  { %2778 = vrot.lane.b32.xlu1 %v9572_v56, %s9105_s18  ;;  %3964 = vrot.lane.b32.xlu0 %v9420_v3, %s9107_s20 }
 0x49a   :  { %2873 = vrot.lane.b32.xlu1 %v9479_v38, %s9104_s17  ;;  %3962 = vrot.lane.b32.xlu0 %v9428_v7, %s9107_s20 }
 0x49e   :  { %2871 = vrot.lane.b32.xlu1 %v9620_v4, %s9105_s18  ;;  %3869 = vrot.lane.b32.xlu0 %v9501_v39, %s9108_s21 }
 0x49f   :  { %v1458_v46 = vpop.xlane.xlu1 %1457 }
 0x4a0   :  { %8743 = vrcp.f32 %v1458_v46 }
 0x4a1   :  { %v1455_v8 = vpop.xlane.xlu0 %1454 }
 0x4a2   :  { %8745 = vrcp.f32 %v1455_v8  ;;  %3168 = vrot.lane.b32.xlu1 %v9411_v37, %s9106_s19  ;;  %4053 = vrot.lane.b32.xlu0 %v9436_v9, %s9107_s20 }
 0x4a6   :  { %3257 = vrot.lane.b32.xlu1 %v9420_v3, %s9106_s19 }
 0x4a7   :  { %v1464_v11 = vpop.xlane.xlu0 %1463 }
 0x4a8   :  { %8747 = vrcp.f32 %v1464_v11 }
 0x4aa   :  { %3344 = vrot.lane.b32.xlu1 %v9424_v5, %s9106_s19 }
 0x4ab   :  { %v1461_v59 = vpop.xlane.xlu0 %1460 }
 0x4ac   :  { %8749 = vrcp.f32 %v1461_v59 }
 0x4ad   :  { %v8744_v1 = vpop.eup %8743 }
 0x4ae   :  { %3342 = vrot.lane.b32.xlu1 %v9436_v9, %s9106_s19  ;;  %v1518_v46 = vmul.f32 %v8744_v1, %v9813_v49 }
 0x4af   :  { %v8746_v43 = vpop.eup %8745 }
 0x4b0   :  { %v1517_v36 = vmul.f32 %v8746_v43, %v9818_v42 }
 0x4b1   :  { %v1482_v24 = vpop.xlane.xlu1 %1481 }
 0x4b2   :  { %3518 = vrot.lane.b32.xlu1 %v9440_v54, %s9106_s19  ;;  %8230 = vmatprep.mubr.msk.f32.mxu0 %vm1356_vm2, %v1517_v36 }
 0x4b3   :  { %8231 = vmatmul.mubr.msk.f32.vlgmr.msra.gmra.mxu0 %vm1356_vm2, %v1518_v46 }
 0x4b4   :  { %8241 = vmatpush3.msra.mxu0 %v9615_v2 }
 0x4b5   :  { %8242 = vmatprep.subr.mxu0 %v9769_v13  ;;  %v1479_v8 = vpop.xlane.xlu1 %1478  ;;  %v8748_v42 = vpop.eup %8747 }
 0x4b6   :  { %8243 = vmatpush3.msra.mxu0 %v9769_v13  ;;  %3516 = vrot.lane.b32.xlu1 %v9446_v18, %s9106_s19  ;;  %v1520_v43 = vmul.f32 %v8748_v42, %v9824_v55 }
 0x4b7   :  { %8254 = vmatprep.subr.mxu0 %v9771_v35  ;;  %v1476_v49 = vpop.xlane.xlu0 %1475 }
 0x4b8   :  { %8751 = vrcp.f32 %v1476_v49 }
 0x4b9   :  { %v8750_v11 = vpop.eup %8749  ;;  %v1494_v59 = vpop.xlane.xlu1 %1493 }
 0x4ba   :  { %3692 = vrot.lane.b32.xlu1 %v9461_v30, %s9106_s19  ;;  %v1519_v1 = vmul.f32 %v8750_v11, %v9830_v0 }
 0x4bb   :  { %v1473_v2 = vpop.xlane.xlu0 %1472 }
 0x4bc   :  { %8753 = vrcp.f32 %v1473_v2  ;;  %8237 = vmatprep.mubr.msk.f32.mxu1 %vm1356_vm2, %v1519_v1 }
 0x4bd   :  { %v1491_v13 = vpop.xlane.xlu1 %1490  ;;  %8238 = vmatmul.mubr.msk.f32.vlgmr.msra.gmra.mxu1 %vm1356_vm2, %v1520_v43 }
 0x4be   :  { %8248 = vmatpush3.msra.mxu1 %v9624_v6  ;;  %3690 = vrot.lane.b32.xlu1 %v9473_v34, %s9106_s19 }
 0x4bf   :  { %8249 = vmatprep.subr.mxu1 %v9803_v48  ;;  %v1488_v36 = vpop.xlane.xlu0 %1487 }
 0x4c0   :  { %8250 = vmatpush3.msra.mxu1 %v9803_v48  ;;  %8755 = vrcp.f32 %v1488_v36 }
 0x4c1   :  { %8261 = vmatprep.subr.mxu1 %v9775_v17  ;;  %v1470_v0 = vpop.xlane.xlu1 %1469 }
 0x4c2   :  { %3873 = vrot.lane.b32.xlu1 %v9409_v63, %s9107_s20 }
 0x4c3   :  { %v1485_v55 = vpop.xlane.xlu0 %1484 }
 0x4c4   :  { %8757 = vrcp.f32 %v1485_v55 }
 0x4c5   :  { %8759 = vrcp.f32 %v1470_v0  ;;  %v1467_v46 = vpop.xlane.xlu1 %1466  ;;  %v8752_v6 = vpop.eup %8751 }
 0x4c6   :  { %8761 = vrcp.f32 %v1467_v46  ;;  %3871 = vrot.lane.b32.xlu1 %v9411_v37, %s9107_s20  ;;  %v1524_v11 = vmul.f32 %v8752_v6, %v9847_v52  ;;  %v11743_v52 = vld [vmem:[#allocation17_spill] sm:$0xff]  ;;  %v11745_v46 = vld [vmem:[#allocation38_spill] sm:$0xff] }
 0x4c7   :  { %8763 = vrcp.f32 %v1479_v8 }
 0x4c8   :  { %8765 = vrcp.f32 %v1482_v24 }
 0x4c9   :  { %v8754_v49 = vpop.eup %8753  ;;  %v1497_v48 = vpop.xlane.xlu0 %1496 }
 0x4ca   :  { %8767 = vrcp.f32 %v1497_v48  ;;  %3867 = vrot.lane.b32.xlu1 %v9418_v40, %s9108_s21  ;;  %v1523_v42 = vmul.f32 %v8754_v49, %v9856_v10  ;;  %v11742_v10 = vld [vmem:[#allocation41_spill] sm:$0xff]  ;;  %v11747_v48 = vld [vmem:[#allocation39_spill] sm:$0xff] }
 0x4cb   :  { %8769 = vrcp.f32 %v1491_v13 }
 0x4cc   :  { %8251 = vmatprep.mubr.msk.f32.mxu1 %vm1356_vm2, %v1523_v42  ;;  %8771 = vrcp.f32 %v1494_v59  ;;  %v11749_v42 = vld [vmem:[#allocation42_spill] sm:$0xff] }
 0x4cd   :  { %8252 = vmatmul.mubr.msk.f32.vlgmr.msra.gmra.mxu1 %vm1356_vm2, %v1524_v11  ;;  %v8756_v24 = vpop.eup %8755  ;;  %v11751_v11 = vld [vmem:[#allocation44_spill] sm:$0xff] }
 0x4ce   :  { %8262 = vmatpush3.msra.mxu1 %v9775_v17  ;;  %4055 = vrot.lane.b32.xlu1 %v9424_v5, %s9107_s20  ;;  %v1528_v17 = vmul.f32 %v8756_v24, %v9864_v21 }
 0x4cf   :  { %8263 = vmatprep.subr.mxu1 %v9779_v57 }
 0x4d0   :  { %8264 = vmatpush3.msra.mxu1 %v9779_v57 }
 0x4d1   :  { %v8758_v8 = vpop.eup %8757  ;;  %8275 = vmatprep.subr.mxu1 %v11742_v10 }
 0x4d2   :  { %v8760_v1 = vpop.eup %8759  ;;  %3958 = vrot.lane.b32.xlu1 %v11743_v52, %s9108_s21  ;;  %v1527_v2 = vmul.f32 %v8758_v8, %v9874_v32  ;;  %v11744_v32 = vld [vmem:[#allocation52_spill] sm:$0xff]  ;;  %v11753_v8 = vld [vmem:[#allocation47_spill] sm:$0xff] }
 0x4d3   :  { %v8762_v59 = vpop.eup %8761  ;;  %v1522_v36 = vmul.f32 %v8760_v1, %v9868_v23  ;;  %v11746_v23 = vld [vmem:[#allocation43_spill] sm:$0xff]  ;;  %v11754_v1 = vld [vmem:[#allocation49_spill] sm:$0xff] }
 0x4d4   :  { %v8764_v43 = vpop.eup %8763  ;;  %8265 = vmatprep.mubr.msk.f32.mxu1 %vm1356_vm2, %v1527_v2  ;;  %v1521_v13 = vmul.f32 %v8762_v59, %v9870_v20 }
 0x4d5   :  { %8266 = vmatmul.mubr.msk.f32.vlgmr.msra.gmra.mxu1 %vm1356_vm2, %v1528_v17  ;;  %v8766_v57 = vpop.eup %8765  ;;  %v1525_v21 = vmul.f32 %v8764_v43, %v9843_v50 }
 0x4d6   :  { %8276 = vmatpush3.msra.mxu1 %v11742_v10  ;;  %4146 = vrot.lane.b32.xlu1 %v9432_v45, %s9107_s20  ;;  %v1526_v6 = vmul.f32 %v8766_v57, %v9838_v25 }
 0x4d7   :  { %v8768_v0 = vpop.eup %8767  ;;  %8244 = vmatprep.mubr.msk.f32.mxu0 %vm1356_vm2, %v1521_v13  ;;  %8277 = vmatprep.subr.mxu1 %v11744_v32 }
 0x4d8   :  { %v8770_v55 = vpop.eup %8769  ;;  %8245 = vmatmul.mubr.msk.f32.vlgmr.msra.gmra.mxu0 %vm1356_vm2, %v1522_v36  ;;  %8278 = vmatpush3.msra.mxu1 %v11744_v32  ;;  %v1531_v20 = vmul.f32 %v8768_v0, %v9880_v26  ;;  %v11748_v26 = vld [vmem:[#allocation40_spill] sm:$0xff] }
 0x4d9   :  { %8255 = vmatpush3.msra.mxu0 %v9771_v35  ;;  %8258 = vmatprep.mubr.msk.f32.mxu0 %vm1356_vm2, %v1525_v21  ;;  %v8772_v49 = vpop.eup %8771  ;;  %v1529_v50 = vmul.f32 %v8770_v55, %v9860_v51  ;;  %v2601_v35 = vpop.permute.xlu0 %2600  ;;  %v11750_v51 = vld [vmem:[#allocation46_spill] sm:$0xff] }
 0x4da   :  { %8256 = vmatprep.subr.mxu0 %v11745_v46  ;;  %8289 = vmatprep.subr.msk.mxu1 %vm601_vm1, %v11746_v23  ;;  %v1530_v25 = vmul.f32 %v8772_v49, %v9852_v19  ;;  %v11752_v19 = vld [vmem:[#allocation48_spill] sm:$0xff]  ;;  %v11755_v55 = vld [vmem:[#allocation50_spill] sm:$0xff] }
 0x4db   :  { %8257 = vmatpush3.msra.mxu0 %v11745_v46  ;;  %8279 = vmatprep.mubr.msk.f32.mxu1 %vm1356_vm2, %v1531_v20  ;;  %v11756_v46 = vld [vmem:[#allocation45_spill] sm:$0xff] }
 0x4dc   :  { %8268 = vmatprep.subr.mxu0 %v11747_v48  ;;  %8259 = vmatmul.mubr.msk.f32.vlgmr.msra.gmra.mxu0 %vm1356_vm2, %v1526_v6 }
 0x4dd   :  { %8269 = vmatpush3.msra.mxu0 %v11747_v48  ;;  %8272 = vmatprep.mubr.msk.f32.mxu0 %vm1356_vm2, %v1529_v50  ;;  %v2508_v24 = vpop.permute.xlu0 %2507 }
 0x4de   :  { %8270 = vmatprep.subr.mxu0 %v11748_v26 }
 0x4df   :  { %8271 = vmatpush3.msra.mxu0 %v11748_v26 }
 0x4e0   :  { %8282 = vmatprep.subr.msk.mxu0 %vm601_vm1, %v11749_v42  ;;  %8273 = vmatmul.mubr.msk.f32.vlgmr.msra.gmra.mxu0 %vm1356_vm2, %v1530_v25 }
 0x4e1   :  { %8283 = vmatpush3.xpose.msk.msra.mxu0 %vm601_vm1, %v11749_v42  ;;  %8286 = vmatprep.mubr.msk.f32.mxu0 %vm601_vm1, %v11750_v51  ;;  %v2692_v10 = vpop.permute.xlu0 %2691 }
 0x4e2   :  { %8284 = vmatprep.subr.msk.mxu0 %vm601_vm1, %v11751_v11 }
 0x4e5   :  { %8285 = vmatpush3.xpose.msk.msra.mxu0 %vm601_vm1, %v11751_v11  ;;  %v2599_v2 = vpop.permute.xlu0 %2598 }
 0x4e6   :  { %8296 = vmatprep.subr.msk.mxu0 %vm601_vm1, %v11752_v19 }
 0x4e8   :  { %8287 = vmatmul.mubr.msk.f32.vlgmr.msra.gmra.mxu0 %vm601_vm1, %v11753_v8 }
 0x4e9   :  { %8297 = vmatpush3.xpose.msk.msra.mxu0 %vm601_vm1, %v11752_v19  ;;  %8300 = vmatprep.mubr.msk.f32.mxu0 %vm601_vm1, %v9935_v27  ;;  %v2783_v59 = vpop.permute.xlu0 %2782  ;;  %v2506_v27 = vpop.permute.xlu1 %2505 }
 0x4ea   :  { %8298 = vmatprep.subr.msk.mxu0 %vm601_vm1, %v11754_v1 }
 0x4ed   :  { %8299 = vmatpush3.xpose.msk.msra.mxu0 %vm601_vm1, %v11754_v1  ;;  %v2690_v43 = vpop.permute.xlu0 %2689  ;;  %v10133_v1 = vld [vmem:[#allocation5 + $0x18] sm:$0xff] }
 0x4ee   :  { %8310 = vmatprep.subr.msk.mxu0 %vm601_vm1, %v9947_v28 }
 0x4f0   :  { %8301 = vmatmul.mubr.msk.f32.vlgmr.msra.gmra.mxu0 %vm601_vm1, %v9949_v12 }
 0x4f1   :  { %8311 = vmatpush3.xpose.msk.msra.mxu0 %vm601_vm1, %v9947_v28  ;;  %v2781_v57 = vpop.permute.xlu0 %2780 }
 0x4f2   :  { %8312 = vmatprep.subr.msk.mxu0 %vm601_vm1, %v2601_v35 }
 0x4f5   :  { %8313 = vmatpush3.xpose.msk.msra.mxu0 %vm601_vm1, %v2601_v35  ;;  %v2870_v0 = vpop.permute.xlu0 %2869 }
 0x4f9   :  { %v3171_v20 = vpop.permute.xlu0 %3170 }
 0x4fa   :  { %v1500_v17 = vpop.xlane.xlu1 %1499 }
 0x4fb   :  { %8773 = vrcp.f32 %v1500_v17 }
 0x4fd   :  { %v3256_v35 = vpop.permute.xlu0 %3255 }
 0x4fe   :  { %v2694_v13 = vpop.permute.xlu1 %2693 }
 0x501   :  { %v10114_v26 = vpop.permute.xlu0 %3431 }
 0x502   :  { %v2597_v36 = vpop.permute.xlu1 %2596  ;;  %11758 = vst [vmem:[#allocation41_spill] sm:$0xff] %v10114_v26 }
 0x503   :  { %8314 = vmatprep.mubr.msk.f32.mxu0 %vm601_vm1, %v2597_v36  ;;  %v11768_v36 = vld [vmem:[#allocation23_spill] sm:$0xff] }
 0x504   :  { %8315 = vmatmul.mubr.msk.f32.vlgmr.msra.gmra.mxu0 %vm601_vm1, %v2599_v2 }
 0x506   :  { %v2785_v12 = vpop.permute.xlu1 %2784 }
 0x507   :  { %8324 = vmatprep.subr.msk.mxu0 %vm601_vm1, %v2785_v12 }
 0x508   :  { %v8774_v28 = vpop.eup %8773  ;;  %8325 = vmatpush3.xpose.msk.msra.mxu0 %vm601_vm1, %v2785_v12 }
 0x509   :  { %8326 = vmatprep.subr.msk.mxu0 %vm601_vm1, %v2783_v59  ;;  %v1532_v32 = vmul.f32 %v8774_v28, %v9899_v47  ;;  %v11757_v47 = vld [vmem:[#allocation51_spill] sm:$0xff] }
 0x50a   :  { %v2688_v21 = vpop.permute.xlu1 %2687 }
 0x50b   :  { %8280 = vmatmul.mubr.msk.f32.vlgmr.msra.gmra.mxu1 %vm1356_vm2, %v1532_v32 }
 0x50c   :  { %8290 = vmatpush3.xpose.msk.msra.mxu1 %vm601_vm1, %v11746_v23  ;;  %8293 = vmatprep.mubr.msk.f32.mxu1 %vm601_vm1, %v11755_v55 }
 0x50d   :  { %8291 = vmatprep.subr.msk.mxu1 %vm601_vm1, %v11756_v46  ;;  %8327 = vmatpush3.xpose.msk.msra.mxu0 %vm601_vm1, %v2783_v59  ;;  %v10135_v59 = vld [vmem:[#allocation5 + $0x10] sm:$0xff] }
 0x50e   :  { %8338 = vmatprep.subr.mxu0 %v3171_v20  ;;  %v2876_v6 = vpop.permute.xlu1 %2875 }
 0x510   :  { %8292 = vmatpush3.xpose.msk.msra.mxu1 %vm601_vm1, %v11756_v46 }
 0x511   :  { %8303 = vmatprep.subr.msk.mxu1 %vm601_vm1, %v11757_v47 }
 0x512   :  { %v2779_v49 = vpop.permute.xlu1 %2778 }
 0x513   :  { %8294 = vmatmul.mubr.msk.f32.vlgmr.msra.gmra.mxu1 %vm601_vm1, %v9929_v14  ;;  %8328 = vmatprep.mubr.msk.f32.mxu0 %vm601_vm1, %v2779_v49 }
 0x514   :  { %8304 = vmatpush3.xpose.msk.msra.mxu1 %vm601_vm1, %v11757_v47  ;;  %8307 = vmatprep.mubr.msk.f32.mxu1 %vm601_vm1, %v2506_v27  ;;  %v11770_v47 = vld [vmem:[#allocation26_spill] sm:$0xff] }
 0x515   :  { %8305 = vmatprep.subr.msk.mxu1 %vm601_vm1, %v9941_v41  ;;  %8329 = vmatmul.mubr.msk.f32.vlgmr.msra.gmra.mxu0 %vm601_vm1, %v2781_v57 }
 0x516   :  { %8339 = vmatpush3.msra.mxu0 %v3171_v20  ;;  %v2874_v23 = vpop.permute.xlu1 %2873  ;;  %v11769_v20 = vld [vmem:[#allocation34_spill] sm:$0xff] }
 0x518   :  { %8306 = vmatpush3.xpose.msk.msra.mxu1 %vm601_vm1, %v9941_v41 }
 0x519   :  { %8317 = vmatprep.subr.msk.mxu1 %vm601_vm1, %v2694_v13 }
 0x51a   :  { %v2872_v14 = vpop.permute.xlu1 %2871 }
 0x51b   :  { %8308 = vmatmul.mubr.msk.f32.vlgmr.msra.gmra.mxu1 %vm601_vm1, %v2508_v24 }
 0x51c   :  { %8318 = vmatpush3.xpose.msk.msra.mxu1 %vm601_vm1, %v2694_v13  ;;  %8321 = vmatprep.mubr.msk.f32.mxu1 %vm601_vm1, %v2688_v21 }
 0x51d   :  { %8319 = vmatprep.subr.msk.mxu1 %vm601_vm1, %v2692_v10 }
 0x51e   :  { %v3169_v50 = vpop.permute.xlu1 %3168 }
 0x51f   :  { %8340 = vmatprep.subr.mxu0 %v3169_v50 }
 0x520   :  { %8320 = vmatpush3.xpose.msk.msra.mxu1 %vm601_vm1, %v2692_v10  ;;  %8341 = vmatpush3.msra.mxu0 %v3169_v50 }
 0x521   :  { %8331 = vmatprep.subr.msk.mxu1 %vm601_vm1, %v2876_v6 }
 0x522   :  { %v3258_v48 = vpop.permute.xlu1 %3257 }
 0x523   :  { %8322 = vmatmul.mubr.msk.f32.vlgmr.msra.gmra.mxu1 %vm601_vm1, %v2690_v43  ;;  %v11767_v43 = vld [vmem:[#allocation22_spill] sm:$0xff] }
 0x524   :  { %8332 = vmatpush3.xpose.msk.msra.mxu1 %vm601_vm1, %v2876_v6  ;;  %8335 = vmatprep.mubr.msk.f32.mxu1 %vm601_vm1, %v2870_v0 }
 0x525   :  { %8333 = vmatprep.subr.msk.mxu1 %vm601_vm1, %v2874_v23 }
 0x526   :  { %v10109_v41 = vpop.permute.xlu1 %3344 }
 0x527   :  { %8352 = vmatprep.subr.mxu0 %v10109_v41 }
 0x528   :  { %8334 = vmatpush3.xpose.msk.msra.mxu1 %vm601_vm1, %v2874_v23 }
 0x529   :  { %8345 = vmatprep.subr.mxu1 %v3258_v48 }
 0x52b   :  { %8336 = vmatmul.mubr.msk.f32.vlgmr.msra.gmra.mxu1 %vm601_vm1, %v2872_v14 }
 0x52c   :  { %8346 = vmatpush3.msra.mxu1 %v3258_v48 }
 0x52d   :  { %8347 = vmatprep.subr.mxu1 %v3256_v35 }
 0x52e   :  { %8348 = vmatpush3.msra.mxu1 %v3256_v35 }
 0x52f   :  { %8359 = vmatprep.subr.mxu1 %v10114_v26 }
 0x573   :  { %v10117_v25 = vpop.f32.mrf.mxu0 }
 0x574   :  { %11759 = vst [vmem:[#allocation17_spill] sm:$0xff] %v10117_v25 }
 0x575   :  { %v10119_v42 = vpop.f32.mrf.mxu0 }
 0x576   :  { %11760 = vst [vmem:[#allocation52_spill] sm:$0xff] %v10119_v42 }
 0x57d   :  { %v10161_v50 = vpop.f32.mrf.mxu1 }
 0x57e   :  { %11771 = vst [vmem:[#allocation44_spill] sm:$0xff] %v10161_v50 }
 0x57f   :  { %v10163_v48 = vpop.f32.mrf.mxu1 }
 0x580   :  { %11772 = vst [vmem:[#allocation48_spill] sm:$0xff] %v10163_v48 }
 0x58d   :  { %v10165_v35 = vpop.f32.mrf.mxu1 }
 0x58e   :  { %11773 = vst [vmem:[#allocation47_spill] sm:$0xff] %v10165_v35 }
 0x598   :  { %v10121_v51 = vpop.f32.mrf.mxu0 }
 0x599   :  { %11761 = vst [vmem:[#allocation38_spill] sm:$0xff] %v10121_v51 }
 0x59a   :  { %v10123_v11 = vpop.f32.mrf.mxu0 }
 0x59b   :  { %11762 = vst [vmem:[#allocation43_spill] sm:$0xff] %v10123_v11 }
 0x59c   :  { %v10125_v24 = vpop.f32.mrf.mxu0 }
 0x59d   :  { %11763 = vst [vmem:[#allocation39_spill] sm:$0xff] %v10125_v24 }
 0x59e   :  { %v10127_v19 = vpop.f32.mrf.mxu0 }
 0x59f   :  { %11764 = vst [vmem:[#allocation40_spill] sm:$0xff] %v10127_v19  ;;  %v11788_v19 = vld [vmem:[#allocation35_spill] sm:$0xff] }
 0x5a0   :  { %v10129_v8 = vpop.f32.mrf.mxu0 }
 0x5a1   :  { %11765 = vst [vmem:[#allocation42_spill] sm:$0xff] %v10129_v8 }
 0x5a2   :  { %v10131_v10 = vpop.f32.mrf.mxu0 }
 0x5a3   :  { %11766 = vst [vmem:[#allocation46_spill] sm:$0xff] %v10131_v10 }
 0x5a8   :  { %v8288_v2 = vpop.f32.mrf.mxu0 }
 0x5a9   :  { %v2320_v27 = vadd.f32 %v8288_v2, %v10133_v1 }
 0x5aa   :  { %v2314_v17 = vpop.f32.mrf.mxu0 }
 0x5ab   :  { %v10139_v13 = vadd.f32 %v2320_v27, %v11767_v43  ;;  %v2315_v57 = vadd.f32 %v2314_v17, %v10135_v59  ;;  %v10167_v27 = vpop.f32.mrf.mxu1 }
 0x5ac   :  { %11774 = vst [vmem:[#allocation49_spill] sm:$0xff] %v10167_v27  ;;  %v11789_v27 = vld [vmem:[#allocation36_spill] sm:$0xff] }
 0x5ad   :  { %v10143_v12 = vadd.f32 %v2315_v57, %v11768_v36  ;;  %v2995_v0 = vsel %vm1356_vm2, %v10139_v13, -inf  ;;  %v10170_v57 = vpop.f32.mrf.mxu1  ;;  %v11776_v36 = vld [vmem:[#allocation27_spill] sm:$0xff] }
 0x5ae   :  { %2996 = vmax.xlane.f32.xlu1 %v2995_v0  ;;  %11775 = vst [vmem:[#allocation50_spill] sm:$0xff] %v10170_v57  ;;  %v11783_v57 = vld [vmem:[#allocation30_spill] sm:$0xff] }
 0x5af   :  { %v2992_v28 = vsel %vm1356_vm2, %v10143_v12, -inf }
 0x5b0   :  { %v8302_v32 = vpop.f32.mrf.mxu0  ;;  %2993 = vmax.xlane.f32.xlu0 %v2992_v28 }
 0x5b1   :  { %v2502_v21 = vadd.f32 %v8302_v32, %v10133_v1  ;;  %v11777_v32 = vld [vmem:[#allocation28_spill] sm:$0xff] }
 0x5b2   :  { %v2496_v55 = vpop.f32.mrf.mxu0 }
 0x5b3   :  { %v10151_v46 = vadd.f32 %v2502_v21, %v11769_v20  ;;  %v2497_v6 = vadd.f32 %v2496_v55, %v10135_v59  ;;  %v10181_v20 = vpop.f32.mrf.mxu1 }
 0x5b4   :  { %11778 = vst [vmem:[#allocation45_spill] sm:$0xff] %v10181_v20  ;;  %v11784_v20 = vld [vmem:[#allocation32_spill] sm:$0xff] }
 0x5b5   :  { %v10155_v49 = vadd.f32 %v2497_v6, %v11770_v47  ;;  %v3007_v23 = vsel %vm1356_vm2, %v10151_v46, -inf }
 0x5b6   :  { %3008 = vmax.xlane.f32.xlu1 %v3007_v23 }
 0x5b7   :  { %v3004_v14 = vsel %vm1356_vm2, %v10155_v49, -inf }
 0x5b8   :  { %3005 = vmax.xlane.f32.xlu0 %v3004_v14 }
 0x5c4   :  { %v8316_v2 = vpop.f32.mrf.mxu0 }
 0x5c5   :  { %v2684_v17 = vadd.f32 %v8316_v2, %v10133_v1 }
 0x5c6   :  { %v2678_v43 = vpop.f32.mrf.mxu0 }
 0x5c7   :  { %v10173_v0 = vadd.f32 %v2684_v17, %v11776_v36  ;;  %v2679_v28 = vadd.f32 %v2678_v43, %v10135_v59  ;;  %v11781_v36 = vld [vmem:[#allocation24_spill] sm:$0xff] }
 0x5c9   :  { %v10177_v21 = vadd.f32 %v2679_v28, %v11777_v32  ;;  %v3019_v55 = vsel %vm1356_vm2, %v10173_v0, -inf }
 0x5ca   :  { %3020 = vmax.xlane.f32.xlu1 %v3019_v55 }
 0x5cb   :  { %v10183_v6 = vpop.f32.mrf.mxu1  ;;  %v3016_v47 = vsel %vm1356_vm2, %v10177_v21, -inf }
 0x5cc   :  { %11779 = vst [vmem:[#allocation51_spill] sm:$0xff] %v10183_v6  ;;  %v11782_v6 = vld [vmem:[#allocation25_spill] sm:$0xff] }
 0x5cd   :  { %v10187_v23 = vpop.f32.mrf.mxu1 }
 0x5ce   :  { %3017 = vmax.xlane.f32.xlu1 %v3016_v47  ;;  %11780 = vst [vmem:[#allocation22_spill] sm:$0xff] %v10187_v23 }
 0x5d3   :  { %v8295_v14 = vpop.f32.mrf.mxu1 }
 0x5d4   :  { %v2411_v2 = vadd.f32 %v8295_v14, %v10133_v1 }
 0x5d5   :  { %v2405_v17 = vpop.f32.mrf.mxu1  ;;  %v8330_v43 = vpop.f32.mrf.mxu0 }
 0x5d6   :  { %v10191_v28 = vadd.f32 %v2411_v2, %v11781_v36  ;;  %v2406_v32 = vadd.f32 %v2405_v17, %v10135_v59  ;;  %v2866_v55 = vadd.f32 %v8330_v43, %v10133_v1 }
 0x5d7   :  { %v2860_v8 = vpop.f32.mrf.mxu0 }
 0x5d8   :  { %v10196_v10 = vadd.f32 %v2406_v32, %v11782_v6  ;;  %v10199_v47 = vadd.f32 %v2866_v55, %v11783_v57  ;;  %v2861_v23 = vadd.f32 %v2860_v8, %v10135_v59  ;;  %v3001_v14 = vsel %vm1356_vm2, %v10191_v28, -inf  ;;  %v11785_v8 = vld [vmem:[#allocation29_spill] sm:$0xff] }
 0x5d9   :  { %3002 = vmax.xlane.f32.xlu0 %v3001_v14 }
 0x5da   :  { %v10205_v2 = vadd.f32 %v2861_v23, %v11784_v20  ;;  %v3031_v17 = vsel %vm1356_vm2, %v10199_v47, -inf  ;;  %v2998_v57 = vsel %vm1356_vm2, %v10196_v10, -inf  ;;  %v11786_v23 = vld [vmem:[#allocation31_spill] sm:$0xff] }
 0x5db   :  { %v8309_v43 = vpop.f32.mrf.mxu1  ;;  %3032 = vmax.xlane.f32.xlu1 %v3031_v17 }
 0x5dc   :  { %v2593_v6 = vadd.f32 %v8309_v43, %v10133_v1  ;;  %v3028_v20 = vsel %vm1356_vm2, %v10205_v2, -inf }
 0x5dd   :  { %2999 = vmax.xlane.f32.xlu0 %v2998_v57  ;;  %v2587_v36 = vpop.f32.mrf.mxu1 }
 0x5de   :  { %v10213_v32 = vadd.f32 %v2593_v6, %v11785_v8  ;;  %v2588_v55 = vadd.f32 %v2587_v36, %v10135_v59  ;;  %v11787_v36 = vld [vmem:[#allocation33_spill] sm:$0xff] }
 0x5df   :  { %3029 = vmax.xlane.f32.xlu1 %v3028_v20 }
 0x5e0   :  { %v10219_v14 = vadd.f32 %v2588_v55, %v11786_v23  ;;  %v3013_v17 = vsel %vm1356_vm2, %v10213_v32, -inf }
 0x5e1   :  { %3014 = vmax.xlane.f32.xlu0 %v3013_v17 }
 0x5e2   :  { %v3010_v6 = vsel %vm1356_vm2, %v10219_v14, -inf }
 0x5e3   :  { %v8323_v43 = vpop.f32.mrf.mxu1 }
 0x5e4   :  { %v2775_v57 = vadd.f32 %v8323_v43, %v10133_v1 }
 0x5e5   :  { %3011 = vmax.xlane.f32.xlu0 %v3010_v6  ;;  %v2769_v8 = vpop.f32.mrf.mxu1 }
 0x5e6   :  { %v10227_v24 = vadd.f32 %v2775_v57, %v11787_v36  ;;  %v2770_v20 = vadd.f32 %v2769_v8, %v10135_v59  ;;  %v11790_v36 = vld [vmem:[#allocation37_spill] sm:$0xff] }
 0x5e8   :  { %v10231_v55 = vadd.f32 %v2770_v20, %v11788_v19  ;;  %v3025_v23 = vsel %vm1356_vm2, %v10227_v24, -inf }
 0x5e9   :  { %3026 = vmax.xlane.f32.xlu0 %v3025_v23  ;;  %v10249_v23 = vpop.permute.xlu1 %3342 }
 0x5ea   :  { %v3022_v35 = vsel %vm1356_vm2, %v10231_v55, -inf }
 0x5eb   :  { %v8337_v17 = vpop.f32.mrf.mxu1 }
 0x5ec   :  { %v2957_v43 = vadd.f32 %v8337_v17, %v10133_v1 }
 0x5ed   :  { %3023 = vmax.xlane.f32.xlu0 %v3022_v35  ;;  %v2951_v6 = vpop.f32.mrf.mxu1  ;;  %v10251_v35 = vpop.permute.xlu1 %3518 }
 0x5ee   :  { %v10239_v57 = vadd.f32 %v2957_v43, %v11789_v27  ;;  %v2952_v8 = vadd.f32 %v2951_v6, %v10135_v59  ;;  %v11791_v27 = vld [vmem:[#allocation19_spill] sm:$0xff]  ;;  %v10257_v59 = vpop.permute.xlu0 %3429  ;;  %v11793_v6 = vld [vmem:[#allocation18_spill] sm:$0xff] }
 0x5ef   :  { %11792 = vst [vmem:[#allocation23_spill] sm:$0xff] %v10257_v59 }
 0x5f0   :  { %v10243_v19 = vadd.f32 %v2952_v8, %v11790_v36  ;;  %v3037_v20 = vsel %vm1356_vm2, %v10239_v57, -inf }
 0x5f1   :  { %3038 = vmax.xlane.f32.xlu1 %v3037_v20  ;;  %v10255_v17 = vpop.permute.xlu1 %3516 }
 0x5f2   :  { %v3034_v1 = vsel %vm1356_vm2, %v10243_v19, -inf  ;;  %v10267_v8 = vpop.permute.xlu0 %3605 }
 0x5f3   :  { %3035 = vmax.xlane.f32.xlu0 %v3034_v1  ;;  %11794 = vst [vmem:[#allocation34_spill] sm:$0xff] %v10267_v8  ;;  %v11796_v1 = vld [vmem:[#allocation20_spill] sm:$0xff] }
 0x5f5   :  { %v10261_v43 = vpop.permute.xlu1 %3692 }
 0x5f6   :  { %v10273_v20 = vpop.permute.xlu0 %3603 }
 0x5f7   :  { %11795 = vst [vmem:[#allocation26_spill] sm:$0xff] %v10273_v20 }
 0x5f9   :  { %v10271_v36 = vpop.permute.xlu1 %3690 }
 0x5fa   :  { %v10279_v25 = vpop.permute.xlu0 %3779 }
 0x5fb   :  { %11798 = vst [vmem:[#allocation28_spill] sm:$0xff] %v10279_v25 }
 0x5fd   :  { %v10277_v11 = vpop.permute.xlu1 %3873 }
 0x5fe   :  { %11797 = vst [vmem:[#allocation27_spill] sm:$0xff] %v10277_v11  ;;  %v10283_v51 = vpop.permute.xlu0 %3777 }
 0x5ff   :  { %11800 = vst [vmem:[#allocation25_spill] sm:$0xff] %v10283_v51 }
 0x601   :  { %v10281_v42 = vpop.permute.xlu1 %3871 }
 0x602   :  { %4049 = vrot.lane.b32.xlu1 %v11791_v27, %s9108_s21  ;;  %11799 = vst [vmem:[#allocation24_spill] sm:$0xff] %v10281_v42  ;;  %v10287_v48 = vpop.permute.xlu0 %3964 }
 0x603   :  { %11802 = vst [vmem:[#allocation32_spill] sm:$0xff] %v10287_v48 }
 0x605   :  { %v10285_v50 = vpop.permute.xlu1 %3867 }
 0x606   :  { %4237 = vrot.lane.b32.xlu1 %v9440_v54, %s9107_s20  ;;  %11801 = vst [vmem:[#allocation30_spill] sm:$0xff] %v10285_v50  ;;  %v10291_v27 = vpop.permute.xlu0 %3962 }
 0x607   :  { %11804 = vst [vmem:[#allocation31_spill] sm:$0xff] %v10291_v27 }
 0x609   :  { %3960 = vrot.lane.b32.xlu0 %v11793_v6, %s9108_s21 }
 0x60a   :  { %4140 = vrot.lane.b32.xlu1 %v9560_v29, %s9108_s21  ;;  %v10289_v29 = vpop.permute.xlu1 %4055  ;;  %v10295_v8 = vpop.permute.xlu0 %3869 }
 0x60b   :  { %11803 = vst [vmem:[#allocation29_spill] sm:$0xff] %v10289_v29  ;;  %11806 = vst [vmem:[#allocation35_spill] sm:$0xff] %v10295_v8 }
 0x60d   :  { %4144 = vrot.lane.b32.xlu0 %v9444_v15, %s9107_s20 }
 0x60e   :  { %v10293_v20 = vpop.permute.xlu1 %3958  ;;  %v10299_v59 = vpop.permute.xlu0 %4053 }
 0x60f   :  { %11805 = vst [vmem:[#allocation33_spill] sm:$0xff] %v10293_v20  ;;  %11808 = vst [vmem:[#allocation37_spill] sm:$0xff] %v10299_v59 }
 0x611   :  { %4051 = vrot.lane.b32.xlu0 %v11796_v1, %s9108_s21 }
 0x612   :  { %v10297_v1 = vpop.permute.xlu1 %4146 }
 0x613   :  { %11807 = vst [vmem:[#allocation36_spill] sm:$0xff] %v10297_v1 }
 0x637   :  { %v2997_v25 = vpop.xlane.xlu1 %2996 }
 0x638   :  { %v3041_v42 = vsub.f32 %v10139_v13, %v2997_v25 }
 0x639   :  { %v2994_v51 = vpop.xlane.xlu0 %2993 }
 0x63a   :  { %v3058_v26 = vmul.f32 1.442695, %v3041_v42  ;;  %v3040_v50 = vsub.f32 %v10143_v12, %v2994_v51 }
 0x63c   :  { %8775 = vpow2.f32 %v3058_v26  ;;  %v3056_v48 = vmul.f32 1.442695, %v3040_v50 }
 0x63e   :  { %8777 = vpow2.f32 %v3056_v48 }
 0x63f   :  { %v3009_v29 = vpop.xlane.xlu1 %3008 }
 0x640   :  { %v3045_v27 = vsub.f32 %v10151_v46, %v3009_v29 }
 0x641   :  { %v3006_v20 = vpop.xlane.xlu0 %3005 }
 0x642   :  { %v3066_v11 = vmul.f32 1.442695, %v3045_v27  ;;  %v3044_v8 = vsub.f32 %v10155_v49, %v3006_v20 }
 0x644   :  { %8779 = vpow2.f32 %v3066_v11  ;;  %v3064_v1 = vmul.f32 1.442695, %v3044_v8 }
 0x646   :  { %8781 = vpow2.f32 %v3064_v1 }
 0x649   :  { %v10305_v59 = vpop.eup %8775 }
 0x64a   :  { %v3091_v25 = vsel %vm1356_vm2, %v10305_v59, 0.0 }
 0x64b   :  { %v10309_v42 = vpop.eup %8777  ;;  %3092 = vadd.xlane.f32.xlu1 %v3091_v25 }
 0x64c   :  { %v3088_v26 = vsel %vm1356_vm2, %v10309_v42, 0.0 }
 0x64d   :  { %3089 = vadd.xlane.f32.xlu0 %v3088_v26 }
 0x651   :  { %v10313_v29 = vpop.eup %8779 }
 0x652   :  { %v3103_v51 = vsel %vm1356_vm2, %v10313_v29, 0.0 }
 0x653   :  { %v10317_v11 = vpop.eup %8781  ;;  %3104 = vadd.xlane.f32.xlu1 %v3103_v51  ;;  %v3021_v13 = vpop.xlane.xlu1 %3020 }
 0x654   :  { %v3049_v12 = vsub.f32 %v10173_v0, %v3021_v13  ;;  %v3100_v49 = vsel %vm1356_vm2, %v10317_v11, 0.0 }
 0x656   :  { %v3074_v46 = vmul.f32 1.442695, %v3049_v12 }
 0x657   :  { %3101 = vadd.xlane.f32.xlu1 %v3100_v49  ;;  %v3018_v50 = vpop.xlane.xlu1 %3017 }
 0x658   :  { %8783 = vpow2.f32 %v3074_v46  ;;  %v3048_v48 = vsub.f32 %v10177_v21, %v3018_v50 }
 0x65a   :  { %v3072_v27 = vmul.f32 1.442695, %v3048_v48 }
 0x65c   :  { %8785 = vpow2.f32 %v3072_v27 }
 0x662   :  { %v3003_v8 = vpop.xlane.xlu0 %3002 }
 0x663   :  { %v3043_v20 = vsub.f32 %v10191_v28, %v3003_v8 }
 0x664   :  { %v3033_v1 = vpop.xlane.xlu1 %3032 }
 0x665   :  { %v10324_v25 = vpop.eup %8783  ;;  %v3062_v26 = vmul.f32 1.442695, %v3043_v20  ;;  %v3053_v0 = vsub.f32 %v10199_v47, %v3033_v1 }
 0x666   :  { %v3000_v51 = vpop.xlane.xlu0 %2999  ;;  %v3115_v13 = vsel %vm1356_vm2, %v10324_v25, 0.0 }
 0x667   :  { %8787 = vpow2.f32 %v3062_v26  ;;  %v3082_v12 = vmul.f32 1.442695, %v3053_v0  ;;  %v3042_v46 = vsub.f32 %v10196_v10, %v3000_v51  ;;  %3116 = vadd.xlane.f32.xlu1 %v3115_v13 }
 0x668   :  { %v3030_v21 = vpop.xlane.xlu1 %3029 }
 0x669   :  { %v10330_v49 = vpop.eup %8785  ;;  %8789 = vpow2.f32 %v3082_v12  ;;  %v3060_v28 = vmul.f32 1.442695, %v3042_v46  ;;  %v3052_v50 = vsub.f32 %v10205_v2, %v3030_v21 }
 0x66a   :  { %v3015_v48 = vpop.xlane.xlu0 %3014  ;;  %v3112_v47 = vsel %vm1356_vm2, %v10330_v49, 0.0 }
 0x66b   :  { %8791 = vpow2.f32 %v3060_v28  ;;  %v3080_v27 = vmul.f32 1.442695, %v3052_v50  ;;  %v3047_v8 = vsub.f32 %v10213_v32, %v3015_v48  ;;  %3113 = vadd.xlane.f32.xlu1 %v3112_v47 }
 0x66d   :  { %8793 = vpow2.f32 %v3080_v27  ;;  %v3070_v20 = vmul.f32 1.442695, %v3047_v8 }
 0x66e   :  { %v3012_v10 = vpop.xlane.xlu0 %3011 }
 0x66f   :  { %8795 = vpow2.f32 %v3070_v20  ;;  %v3046_v1 = vsub.f32 %v10219_v14, %v3012_v10 }
 0x671   :  { %v3068_v26 = vmul.f32 1.442695, %v3046_v1 }
 0x672   :  { %v3027_v0 = vpop.xlane.xlu0 %3026 }
 0x673   :  { %8797 = vpow2.f32 %v3068_v26  ;;  %v3051_v2 = vsub.f32 %v10227_v24, %v3027_v0 }
 0x674   :  { %v10338_v51 = vpop.eup %8787 }
 0x675   :  { %v3078_v13 = vmul.f32 1.442695, %v3051_v2  ;;  %v3097_v12 = vsel %vm1356_vm2, %v10338_v51, 0.0 }
 0x676   :  { %v10342_v46 = vpop.eup %8789  ;;  %3098 = vadd.xlane.f32.xlu0 %v3097_v12  ;;  %v3024_v32 = vpop.xlane.xlu0 %3023 }
 0x677   :  { %8799 = vpow2.f32 %v3078_v13  ;;  %v3050_v21 = vsub.f32 %v10231_v55, %v3024_v32  ;;  %v3127_v14 = vsel %vm1356_vm2, %v10342_v46, 0.0 }
 0x678   :  { %v10347_v28 = vpop.eup %8791  ;;  %3128 = vadd.xlane.f32.xlu1 %v3127_v14 }
 0x679   :  { %v3076_v24 = vmul.f32 1.442695, %v3050_v21  ;;  %v3094_v50 = vsel %vm1356_vm2, %v10347_v28, 0.0 }
 0x67a   :  { %v10351_v48 = vpop.eup %8793  ;;  %v3039_v47 = vpop.xlane.xlu1 %3038  ;;  %3095 = vadd.xlane.f32.xlu0 %v3094_v50 }
 0x67b   :  { %8801 = vpow2.f32 %v3076_v24  ;;  %v3055_v27 = vsub.f32 %v10239_v57, %v3039_v47  ;;  %v3124_v55 = vsel %vm1356_vm2, %v10351_v48, 0.0 }
 0x67c   :  { %v10356_v8 = vpop.eup %8795  ;;  %3125 = vadd.xlane.f32.xlu1 %v3124_v55  ;;  %v3036_v20 = vpop.xlane.xlu0 %3035 }
 0x67d   :  { %v3086_v10 = vmul.f32 1.442695, %v3055_v27  ;;  %v3054_v1 = vsub.f32 %v10243_v19, %v3036_v20  ;;  %v3109_v26 = vsel %vm1356_vm2, %v10356_v8, 0.0 }
 0x67e   :  { %3110 = vadd.xlane.f32.xlu0 %v3109_v26  ;;  %v10417_v47 = vpop.permute.xlu1 %4049 }
 0x67f   :  { %8803 = vpow2.f32 %v3086_v10  ;;  %v3084_v0 = vmul.f32 1.442695, %v3054_v1 }
 0x680   :  { %v10361_v2 = vpop.eup %8797  ;;  %v10419_v27 = vpop.permute.xlu0 %3960 }
 0x681   :  { %8805 = vpow2.f32 %v3084_v0  ;;  %v3106_v57 = vsel %vm1356_vm2, %v10361_v2, 0.0 }
 0x682   :  { %3107 = vadd.xlane.f32.xlu0 %v3106_v57  ;;  %v10425_v55 = vpop.permute.xlu1 %4237 }
 0x684   :  { %v10365_v13 = vpop.eup %8799  ;;  %v10431_v20 = vpop.permute.xlu0 %4144 }
 0x685   :  { %v3121_v12 = vsel %vm1356_vm2, %v10365_v13, 0.0 }
 0x686   :  { %3122 = vadd.xlane.f32.xlu0 %v3121_v12  ;;  %v10437_v10 = vpop.permute.xlu1 %4140 }
 0x688   :  { %v10369_v19 = vpop.eup %8801  ;;  %v10439_v1 = vpop.permute.xlu0 %4051 }
 0x689   :  { %v3118_v32 = vsel %vm1356_vm2, %v10369_v19, 0.0 }
 0x68a   :  { %3119 = vadd.xlane.f32.xlu0 %v3118_v32 }
 0x68c   :  { %v10373_v21 = vpop.eup %8803 }
 0x68d   :  { %v3133_v14 = vsel %vm1356_vm2, %v10373_v21, 0.0 }
 0x68e   :  { %v10377_v24 = vpop.eup %8805  ;;  %3134 = vadd.xlane.f32.xlu1 %v3133_v14 }
 0x68f   :  { %v3130_v50 = vsel %vm1356_vm2, %v10377_v24, 0.0 }
 0x690   :  { %3131 = vadd.xlane.f32.xlu0 %v3130_v50 }
 0x69f   :  { %4328 = vrot.lane.b32.xlu1 %v9450_v22, %s9107_s20 }
 0x6a3   :  { %4231 = vrot.lane.b32.xlu1 %v9455_v16, %s9108_s21 }
 0x6a6   :  { %4235 = vrot.lane.b32.xlu0 %v9446_v18, %s9107_s20 }
 0x6a7   :  { %4419 = vrot.lane.b32.xlu1 %v9461_v30, %s9107_s20 }
 0x6aa   :  { %4142 = vrot.lane.b32.xlu0 %v9584_v58, %s9108_s21 }
 0x6ab   :  { %4322 = vrot.lane.b32.xlu1 %v9588_v60, %s9108_s21 }
 0x6ae   :  { %4326 = vrot.lane.b32.xlu0 %v9465_v31, %s9107_s20 }
 0x6af   :  { %4510 = vrot.lane.b32.xlu1 %v9469_v33, %s9107_s20 }
 0x6b2   :  { %4233 = vrot.lane.b32.xlu0 %v9566_v53, %s9108_s21 }
 0x6b3   :  { %4413 = vrot.lane.b32.xlu1 %v9572_v56, %s9108_s21 }
 0x6b6   :  { %4417 = vrot.lane.b32.xlu0 %v9473_v34, %s9107_s20 }
 0x6b7   :  { %4508 = vrot.lane.b32.xlu1 %v9479_v38, %s9107_s20 }
 0x6ba   :  { %4324 = vrot.lane.b32.xlu0 %v9604_v44, %s9108_s21 }
 0x6bb   :  { %4506 = vrot.lane.b32.xlu1 %v9620_v4, %s9108_s21 }
 0x6be   :  { %4415 = vrot.lane.b32.xlu0 %v9593_v61, %s9108_s21 }
 0x6bf   :  { %4803 = vrot.lane.b32.xlu1 %v9411_v37, %s9109_s22 }
 0x6c2   :  { %4504 = vrot.lane.b32.xlu0 %v9607_v62, %s9108_s21 }
 0x6c3   :  { %4892 = vrot.lane.b32.xlu1 %v9420_v3, %s9109_s22 }
 0x6c6   :  { %4805 = vrot.lane.b32.xlu0 %v9409_v63, %s9109_s22 }
 0x6c7   :  { %4979 = vrot.lane.b32.xlu1 %v9424_v5, %s9109_s22 }
 0x6ca   :  { %4890 = vrot.lane.b32.xlu0 %v9428_v7, %s9109_s22 }
 0x6cb   :  { %4977 = vrot.lane.b32.xlu1 %v9436_v9, %s9109_s22 }
 0x6ce   :  { %5066 = vrot.lane.b32.xlu0 %v9432_v45, %s9109_s22 }
 0x6cf   :  { %5153 = vrot.lane.b32.xlu1 %v9440_v54, %s9109_s22 }
 0x6d2   :  { %5064 = vrot.lane.b32.xlu0 %v9444_v15, %s9109_s22 }
 0x6d3   :  { %5151 = vrot.lane.b32.xlu1 %v9446_v18, %s9109_s22 }
 0x6d4   :  { %v3093_v26 = vpop.xlane.xlu1 %3092 }
 0x6d5   :  { %8807 = vrcp.f32 %v3093_v26 }
 0x6d6   :  { %v3090_v0 = vpop.xlane.xlu0 %3089  ;;  %5240 = vrot.lane.b32.xlu0 %v9450_v22, %s9109_s22 }
 0x6d7   :  { %8809 = vrcp.f32 %v3090_v0  ;;  %5327 = vrot.lane.b32.xlu1 %v9461_v30, %s9109_s22 }
 0x6da   :  { %5238 = vrot.lane.b32.xlu0 %v9465_v31, %s9109_s22 }
 0x6db   :  { %5325 = vrot.lane.b32.xlu1 %v9473_v34, %s9109_s22 }
 0x6dc   :  { %v3105_v57 = vpop.xlane.xlu1 %3104 }
 0x6dd   :  { %8811 = vrcp.f32 %v3105_v57 }
 0x6de   :  { %5414 = vrot.lane.b32.xlu0 %v9469_v33, %s9109_s22 }
 0x6df   :  { %5508 = vrot.lane.b32.xlu1 %v9409_v63, %s9110_s23 }
 0x6e0   :  { %v3102_v12 = vpop.xlane.xlu1 %3101 }
 0x6e1   :  { %8813 = vrcp.f32 %v3102_v12 }
 0x6e2   :  { %5412 = vrot.lane.b32.xlu0 %v9479_v38, %s9109_s22  ;;  %v8808_v32 = vpop.eup %8807 }
 0x6e3   :  { %5506 = vrot.lane.b32.xlu1 %v9411_v37, %s9110_s23  ;;  %v3153_v26 = vmul.f32 %v8808_v32, %v10305_v59  ;;  %v11809_v32 = vld [vmem:[#allocation27_spill] sm:$0xff] }
 0x6e4   :  { %v8810_v14 = vpop.eup %8809 }
 0x6e5   :  { %v3152_v50 = vmul.f32 %v8810_v14, %v10309_v42 }
 0x6e6   :  { %5599 = vrot.lane.b32.xlu0 %v9420_v3, %s9110_s23 }
 0x6e7   :  { %8342 = vmatprep.mubr.msk.f32.mxu0 %vm1356_vm2, %v3152_v50  ;;  %5502 = vrot.lane.b32.xlu1 %v9418_v40, %s9111_s24 }
 0x6e8   :  { %8343 = vmatmul.mubr.msk.f32.vlgmr.msra.gmra.mxu0 %vm1356_vm2, %v3153_v26 }
 0x6e9   :  { %8353 = vmatpush3.msra.mxu0 %v10109_v41 }
 0x6ea   :  { %8354 = vmatprep.subr.mxu0 %v10249_v23  ;;  %5504 = vrot.lane.b32.xlu0 %v9501_v39, %s9111_s24  ;;  %v8812_v59 = vpop.eup %8811 }
 0x6eb   :  { %8355 = vmatpush3.msra.mxu0 %v10249_v23  ;;  %5597 = vrot.lane.b32.xlu1 %v9428_v7, %s9110_s23  ;;  %v3157_v39 = vmul.f32 %v8812_v59, %v10313_v29 }
 0x6ec   :  { %8366 = vmatprep.subr.mxu0 %v10251_v35 }
 0x6ee   :  { %v8814_v42 = vpop.eup %8813  ;;  %5690 = vrot.lane.b32.xlu0 %v9424_v5, %s9110_s23 }
 0x6ef   :  { %5593 = vrot.lane.b32.xlu1 %v11743_v52, %s9111_s24  ;;  %v3156_v40 = vmul.f32 %v8814_v42, %v10317_v11 }
 0x6f0   :  { %v3117_v41 = vpop.xlane.xlu1 %3116 }
 0x6f1   :  { %8356 = vmatprep.mubr.msk.f32.mxu0 %vm1356_vm2, %v3156_v40  ;;  %8815 = vrcp.f32 %v3117_v41 }
 0x6f2   :  { %8357 = vmatmul.mubr.msk.f32.vlgmr.msra.gmra.mxu0 %vm1356_vm2, %v3157_v39  ;;  %5595 = vrot.lane.b32.xlu0 %v11793_v6, %s9111_s24  ;;  %v11810_v39 = vld [vmem:[#allocation41_spill] sm:$0xff] }
 0x6f3   :  { %8367 = vmatpush3.msra.mxu0 %v10251_v35  ;;  %5688 = vrot.lane.b32.xlu1 %v9436_v9, %s9110_s23 }
 0x6f4   :  { %8368 = vmatprep.subr.mxu0 %v10255_v17  ;;  %v3114_v52 = vpop.xlane.xlu1 %3113 }
 0x6f5   :  { %8369 = vmatpush3.msra.mxu0 %v10255_v17  ;;  %8817 = vrcp.f32 %v3114_v52  ;;  %v11811_v52 = vld [vmem:[#allocation23_spill] sm:$0xff] }
 0x6f6   :  { %8380 = vmatprep.subr.mxu0 %v10261_v43 }
 0x6fe   :  { %v8816_v29 = vpop.eup %8815 }
 0x6ff   :  { %v3099_v23 = vpop.xlane.xlu0 %3098  ;;  %v3161_v57 = vmul.f32 %v8816_v29, %v10324_v25 }
 0x700   :  { %8819 = vrcp.f32 %v3099_v23 }
 0x701   :  { %v3129_v11 = vpop.xlane.xlu1 %3128 }
 0x702   :  { %v8818_v0 = vpop.eup %8817 }
 0x703   :  { %v3096_v6 = vpop.xlane.xlu0 %3095  ;;  %v3160_v35 = vmul.f32 %v8818_v0, %v10330_v49 }
 0x704   :  { %8821 = vrcp.f32 %v3096_v6 }
 0x705   :  { %8823 = vrcp.f32 %v3129_v11  ;;  %v3126_v12 = vpop.xlane.xlu1 %3125  ;;  %8370 = vmatprep.mubr.msk.f32.mxu0 %vm1356_vm2, %v3160_v35  ;;  %v11814_v11 = vld [vmem:[#allocation30_spill] sm:$0xff] }
 0x706   :  { %8825 = vrcp.f32 %v3126_v12  ;;  %8371 = vmatmul.mubr.msk.f32.vlgmr.msra.gmra.mxu0 %vm1356_vm2, %v3161_v57  ;;  %v11815_v57 = vld [vmem:[#allocation29_spill] sm:$0xff] }
 0x707   :  { %8381 = vmatpush3.msra.mxu0 %v10261_v43  ;;  %v3111_v17 = vpop.xlane.xlu0 %3110 }
 0x708   :  { %8382 = vmatprep.subr.mxu0 %v10271_v36  ;;  %8827 = vrcp.f32 %v3111_v17  ;;  %v11816_v17 = vld [vmem:[#allocation26_spill] sm:$0xff] }
 0x709   :  { %8383 = vmatpush3.msra.mxu0 %v10271_v36 }
 0x70a   :  { %8394 = vmatprep.subr.msk.mxu0 %vm601_vm1, %v11809_v32 }
 0x70b   :  { %v3108_v49 = vpop.xlane.xlu0 %3107 }
 0x70c   :  { %8829 = vrcp.f32 %v3108_v49 }
 0x70d   :  { %v8820_v14 = vpop.eup %8819 }
 0x70e   :  { %v3155_v40 = vmul.f32 %v8820_v14, %v10338_v51 }
 0x70f   :  { %v3123_v25 = vpop.xlane.xlu0 %3122 }
 0x710   :  { %8831 = vrcp.f32 %v3123_v25  ;;  %v11818_v25 = vld [vmem:[#allocation28_spill] sm:$0xff] }
 0x711   :  { %v8822_v50 = vpop.eup %8821 }
 0x712   :  { %v8824_v26 = vpop.eup %8823  ;;  %v3154_v59 = vmul.f32 %v8822_v50, %v10347_v28  ;;  %v11819_v50 = vld [vmem:[#allocation37_spill] sm:$0xff] }
 0x713   :  { %v8826_v42 = vpop.eup %8825  ;;  %v3120_v43 = vpop.xlane.xlu0 %3119  ;;  %v3165_v41 = vmul.f32 %v8824_v26, %v10342_v46  ;;  %v11813_v46 = vld [vmem:[#allocation24_spill] sm:$0xff] }
 0x714   :  { %8833 = vrcp.f32 %v3120_v43  ;;  %8349 = vmatprep.mubr.msk.f32.mxu1 %vm1356_vm2, %v3154_v59  ;;  %v3164_v36 = vmul.f32 %v8826_v42, %v10351_v48  ;;  %v11812_v48 = vld [vmem:[#allocation34_spill] sm:$0xff] }
 0x715   :  { %8350 = vmatmul.mubr.msk.f32.vlgmr.msra.gmra.mxu1 %vm1356_vm2, %v3155_v40  ;;  %v8828_v23 = vpop.eup %8827 }
 0x716   :  { %8360 = vmatpush3.msra.mxu1 %v11810_v39  ;;  %8384 = vmatprep.mubr.msk.f32.mxu0 %vm1356_vm2, %v3164_v36  ;;  %v3159_v35 = vmul.f32 %v8828_v23, %v10356_v8  ;;  %v11820_v36 = vld [vmem:[#allocation25_spill] sm:$0xff]  ;;  %v11824_v23 = vld [vmem:[#allocation36_spill] sm:$0xff] }
 0x717   :  { %8361 = vmatprep.subr.mxu1 %v11811_v52  ;;  %v3135_v28 = vpop.xlane.xlu1 %3134  ;;  %8385 = vmatmul.mubr.msk.f32.vlgmr.msra.gmra.mxu0 %vm1356_vm2, %v3165_v41  ;;  %v11821_v41 = vld [vmem:[#allocation32_spill] sm:$0xff] }
 0x718   :  { %8362 = vmatpush3.msra.mxu1 %v11811_v52  ;;  %8395 = vmatpush3.xpose.msk.msra.mxu0 %vm601_vm1, %v11809_v32  ;;  %8835 = vrcp.f32 %v3135_v28 }
 0x719   :  { %v8830_v51 = vpop.eup %8829  ;;  %8373 = vmatprep.subr.mxu1 %v11812_v48  ;;  %8396 = vmatprep.subr.msk.mxu0 %vm601_vm1, %v11813_v46  ;;  %v3132_v29 = vpop.xlane.xlu0 %3131 }
 0x71a   :  { %8398 = vmatprep.mubr.msk.f32.mxu0 %vm601_vm1, %v11814_v11  ;;  %8837 = vrcp.f32 %v3132_v29  ;;  %v3158_v0 = vmul.f32 %v8830_v51, %v10361_v2  ;;  %v11817_v2 = vld [vmem:[#allocation35_spill] sm:$0xff] }
 0x71b   :  { %v10521_v6 = vpop.permute.xlu1 %4328 }
 0x71c   :  { %8397 = vmatpush3.xpose.msk.msra.mxu0 %vm601_vm1, %v11813_v46  ;;  %8363 = vmatprep.mubr.msk.f32.mxu1 %vm1356_vm2, %v3158_v0 }
 0x71d   :  { %8408 = vmatprep.subr.msk.mxu0 %vm601_vm1, %v11815_v57  ;;  %8364 = vmatmul.mubr.msk.f32.vlgmr.msra.gmra.mxu1 %vm1356_vm2, %v3159_v35  ;;  %v4236_v12 = vpop.permute.xlu0 %4235  ;;  %v8832_v8 = vpop.eup %8831 }
 0x71e   :  { %8374 = vmatpush3.msra.mxu1 %v11812_v48  ;;  %v3163_v42 = vmul.f32 %v8832_v8, %v10365_v13 }
 0x71f   :  { %8375 = vmatprep.subr.mxu1 %v11816_v17  ;;  %8399 = vmatmul.mubr.msk.f32.vlgmr.msra.gmra.mxu0 %vm601_vm1, %v11817_v2  ;;  %v4232_v32 = vpop.permute.xlu1 %4231 }
 0x720   :  { %8376 = vmatpush3.msra.mxu1 %v11816_v17  ;;  %8409 = vmatpush3.xpose.msk.msra.mxu0 %vm601_vm1, %v11815_v57 }
 0x721   :  { %v8834_v49 = vpop.eup %8833  ;;  %8412 = vmatprep.mubr.msk.f32.mxu0 %vm601_vm1, %v10417_v47  ;;  %8387 = vmatprep.subr.mxu1 %v11818_v25  ;;  %v4143_v14 = vpop.permute.xlu0 %4142 }
 0x722   :  { %8410 = vmatprep.subr.msk.mxu0 %vm601_vm1, %v11819_v50  ;;  %v3162_v26 = vmul.f32 %v8834_v49, %v10369_v19 }
 0x723   :  { %v4420_v59 = vpop.permute.xlu1 %4419 }
 0x724   :  { %8411 = vmatpush3.xpose.msk.msra.mxu0 %vm601_vm1, %v11819_v50  ;;  %8377 = vmatprep.mubr.msk.f32.mxu1 %vm1356_vm2, %v3162_v26  ;;  %v10632_v50 = vld [vmem:[#allocation5 + $0x28] sm:$0xff] }
 0x725   :  { %8422 = vmatprep.subr.msk.mxu0 %vm601_vm1, %v10425_v55  ;;  %8378 = vmatmul.mubr.msk.f32.vlgmr.msra.gmra.mxu1 %vm1356_vm2, %v3163_v42  ;;  %v4327_v47 = vpop.permute.xlu0 %4326  ;;  %v8836_v43 = vpop.eup %8835  ;;  %v10636_v42 = vld [vmem:[#allocation7 + $0x8] sm:$0xff] }
 0x726   :  { %8388 = vmatpush3.msra.mxu1 %v11818_v25  ;;  %v3167_v52 = vmul.f32 %v8836_v43, %v10373_v21  ;;  %11835 = vst [vmem:[#allocation28_spill] sm:$0xff] %v10636_v42 }
 0x727   :  { %v8838_v40 = vpop.eup %8837  ;;  %8389 = vmatprep.subr.mxu1 %v11820_v36  ;;  %8413 = vmatmul.mubr.msk.f32.vlgmr.msra.gmra.mxu0 %vm601_vm1, %v10439_v1  ;;  %v4323_v13 = vpop.permute.xlu1 %4322 }
 0x728   :  { %8390 = vmatpush3.msra.mxu1 %v11820_v36  ;;  %8423 = vmatpush3.xpose.msk.msra.mxu0 %vm601_vm1, %v10425_v55  ;;  %v3166_v19 = vmul.f32 %v8838_v40, %v10377_v24  ;;  %v11822_v24 = vld [vmem:[#allocation31_spill] sm:$0xff]  ;;  %v11823_v55 = vld [vmem:[#allocation33_spill] sm:$0xff] }
 0x729   :  { %8426 = vmatprep.mubr.msk.f32.mxu0 %vm601_vm1, %v4232_v32  ;;  %8401 = vmatprep.subr.msk.mxu1 %vm601_vm1, %v11821_v41  ;;  %v4234_v39 = vpop.permute.xlu0 %4233 }
 0x72a   :  { %8424 = vmatprep.subr.msk.mxu0 %vm601_vm1, %v4236_v12  ;;  %8391 = vmatprep.mubr.msk.f32.mxu1 %vm1356_vm2, %v3166_v19 }
 0x72b   :  { %v4511_v1 = vpop.permute.xlu1 %4510  ;;  %8392 = vmatmul.mubr.msk.f32.vlgmr.msra.gmra.mxu1 %vm1356_vm2, %v3167_v52 }
 0x72c   :  { %8402 = vmatpush3.xpose.msk.msra.mxu1 %vm601_vm1, %v11821_v41  ;;  %8425 = vmatpush3.xpose.msk.msra.mxu0 %vm601_vm1, %v4236_v12 }
 0x72d   :  { %8403 = vmatprep.subr.msk.mxu1 %vm601_vm1, %v11822_v24  ;;  %8405 = vmatprep.mubr.msk.f32.mxu1 %vm601_vm1, %v11823_v55  ;;  %v4418_v28 = vpop.permute.xlu0 %4417 }
 0x72e   :  { %8436 = vmatprep.subr.msk.mxu0 %vm601_vm1, %v4420_v59 }
 0x72f   :  { %8427 = vmatmul.mubr.msk.f32.vlgmr.msra.gmra.mxu0 %vm601_vm1, %v4234_v39  ;;  %v4414_v21 = vpop.permute.xlu1 %4413 }
 0x730   :  { %8404 = vmatpush3.xpose.msk.msra.mxu1 %vm601_vm1, %v11822_v24  ;;  %8437 = vmatpush3.xpose.msk.msra.mxu0 %vm601_vm1, %v4420_v59 }
 0x731   :  { %8415 = vmatprep.subr.msk.mxu1 %vm601_vm1, %v11824_v23  ;;  %8438 = vmatprep.subr.msk.mxu0 %vm601_vm1, %v4418_v28  ;;  %v4325_v51 = vpop.permute.xlu0 %4324 }
 0x732   :  { %8440 = vmatprep.mubr.msk.f32.mxu0 %vm601_vm1, %v4414_v21  ;;  %v10660_v21 = vld [vmem:[#allocation7 + $0x28] sm:$0xff] }
 0x733   :  { %8406 = vmatmul.mubr.msk.f32.vlgmr.msra.gmra.mxu1 %vm601_vm1, %v10419_v27  ;;  %v4509_v48 = vpop.permute.xlu1 %4508  ;;  %11840 = vst [vmem:[#allocation33_spill] sm:$0xff] %v10660_v21 }
 0x734   :  { %8416 = vmatpush3.xpose.msk.msra.mxu1 %vm601_vm1, %v11824_v23  ;;  %8419 = vmatprep.mubr.msk.f32.mxu1 %vm601_vm1, %v10437_v10 }
 0x735   :  { %8439 = vmatpush3.xpose.msk.msra.mxu0 %vm601_vm1, %v4418_v28  ;;  %8417 = vmatprep.subr.msk.mxu1 %vm601_vm1, %v10431_v20  ;;  %v4416_v46 = vpop.permute.xlu0 %4415 }
 0x737   :  { %v4507_v29 = vpop.permute.xlu1 %4506 }
 0x738   :  { %8441 = vmatmul.mubr.msk.f32.vlgmr.msra.gmra.mxu0 %vm601_vm1, %v4416_v46  ;;  %8418 = vmatpush3.xpose.msk.msra.mxu1 %vm601_vm1, %v10431_v20 }
 0x739   :  { %8429 = vmatprep.subr.msk.mxu1 %vm601_vm1, %v10521_v6  ;;  %v4505_v27 = vpop.permute.xlu0 %4504 }
 0x73b   :  { %8420 = vmatmul.mubr.msk.f32.vlgmr.msra.gmra.mxu1 %vm601_vm1, %v4143_v14  ;;  %v4804_v11 = vpop.permute.xlu1 %4803 }
 0x73c   :  { %8430 = vmatpush3.xpose.msk.msra.mxu1 %vm601_vm1, %v10521_v6  ;;  %8433 = vmatprep.mubr.msk.f32.mxu1 %vm601_vm1, %v4323_v13  ;;  %v10643_v13 = vld [vmem:[#allocation7] sm:$0xff] }
 0x73d   :  { %8431 = vmatprep.subr.msk.mxu1 %vm601_vm1, %v4327_v47  ;;  %v4806_v10 = vpop.permute.xlu0 %4805  ;;  %11837 = vst [vmem:[#allocation25_spill] sm:$0xff] %v10643_v13 }
 0x73e   :  { %8450 = vmatprep.subr.mxu0 %v4806_v10 }
 0x73f   :  { %v4893_v0 = vpop.permute.xlu1 %4892  ;;  %8451 = vmatpush3.msra.mxu0 %v4806_v10 }
 0x740   :  { %8432 = vmatpush3.xpose.msk.msra.mxu1 %vm601_vm1, %v4327_v47  ;;  %8452 = vmatprep.subr.mxu0 %v4804_v11  ;;  %v10638_v47 = vld [vmem:[#allocation5 + $0x20] sm:$0xff] }
 0x741   :  { %8443 = vmatprep.subr.msk.mxu1 %vm601_vm1, %v4511_v1  ;;  %8453 = vmatpush3.msra.mxu0 %v4804_v11  ;;  %v4891_v6 = vpop.permute.xlu0 %4890 }
 0x743   :  { %8434 = vmatmul.mubr.msk.f32.vlgmr.msra.gmra.mxu1 %vm601_vm1, %v4325_v51  ;;  %v10603_v20 = vpop.permute.xlu1 %4979 }
 0x744   :  { %8444 = vmatpush3.xpose.msk.msra.mxu1 %vm601_vm1, %v4511_v1  ;;  %8447 = vmatprep.mubr.msk.f32.mxu1 %vm601_vm1, %v4505_v27 }
 0x745   :  { %8445 = vmatprep.subr.msk.mxu1 %vm601_vm1, %v4509_v48  ;;  %8464 = vmatprep.subr.mxu0 %v10603_v20  ;;  %v10611_v35 = vpop.permute.xlu0 %5066 }
 0x748   :  { %8446 = vmatpush3.xpose.msk.msra.mxu1 %vm601_vm1, %v4509_v48  ;;  %v10663_v48 = vld [vmem:[#allocation7 + $0x20] sm:$0xff] }
 0x749   :  { %8457 = vmatprep.subr.mxu1 %v4893_v0  ;;  %11841 = vst [vmem:[#allocation36_spill] sm:$0xff] %v10663_v48 }
 0x74b   :  { %8448 = vmatmul.mubr.msk.f32.vlgmr.msra.gmra.mxu1 %vm601_vm1, %v4507_v29 }
 0x74c   :  { %8458 = vmatpush3.msra.mxu1 %v4893_v0 }
 0x74d   :  { %8459 = vmatprep.subr.mxu1 %v4891_v6 }
 0x74e   :  { %8460 = vmatpush3.msra.mxu1 %v4891_v6 }
 0x74f   :  { %8471 = vmatprep.subr.mxu1 %v10611_v35 }
 0x7a8   :  { %v10614_v57 = vpop.f32.mrf.mxu0 }
 0x7a9   :  { %11825 = vst [vmem:[#allocation18_spill] sm:$0xff] %v10614_v57  ;;  %v10760_v57 = vld [vmem:[#allocation7 + $0x78] sm:$0xff] }
 0x7aa   :  { %v10616_v12 = vpop.f32.mrf.mxu0  ;;  %11855 = vst [vmem:[#allocation66_spill] sm:$0xff] %v10760_v57 }
 0x7ab   :  { %11826 = vst [vmem:[#allocation27_spill] sm:$0xff] %v10616_v12 }
 0x7b2   :  { %v10618_v17 = vpop.f32.mrf.mxu0 }
 0x7b3   :  { %11827 = vst [vmem:[#allocation41_spill] sm:$0xff] %v10618_v17 }
 0x7b4   :  { %v10620_v2 = vpop.f32.mrf.mxu0 }
 0x7b5   :  { %11828 = vst [vmem:[#allocation23_spill] sm:$0xff] %v10620_v2 }
 0x7c6   :  { %v10622_v32 = vpop.f32.mrf.mxu0 }
 0x7c7   :  { %11829 = vst [vmem:[#allocation34_spill] sm:$0xff] %v10622_v32  ;;  %v10721_v32 = vld [vmem:[#allocation7 + $0x38] sm:$0xff] }
 0x7c8   :  { %v10624_v8 = vpop.f32.mrf.mxu0  ;;  %11851 = vst [vmem:[#allocation62_spill] sm:$0xff] %v10721_v32 }
 0x7c9   :  { %11830 = vst [vmem:[#allocation24_spill] sm:$0xff] %v10624_v8 }
 0x7d5   :  { %v10628_v25 = vpop.f32.mrf.mxu1 }
 0x7d6   :  { %11832 = vst [vmem:[#allocation29_spill] sm:$0xff] %v10628_v25 }
 0x7d7   :  { %v10626_v49 = vpop.f32.mrf.mxu0  ;;  %v10634_v26 = vpop.f32.mrf.mxu1 }
 0x7d8   :  { %11831 = vst [vmem:[#allocation30_spill] sm:$0xff] %v10626_v49  ;;  %11834 = vst [vmem:[#allocation35_spill] sm:$0xff] %v10634_v26  ;;  %v10744_v26 = vld [vmem:[#allocation7 + $0x58] sm:$0xff] }
 0x7d9   :  { %v10630_v14 = vpop.f32.mrf.mxu0  ;;  %11853 = vst [vmem:[#allocation64_spill] sm:$0xff] %v10744_v26 }
 0x7da   :  { %11833 = vst [vmem:[#allocation26_spill] sm:$0xff] %v10630_v14 }
 0x7dd   :  { %v10641_v40 = vpop.f32.mrf.mxu1 }
 0x7de   :  { %11836 = vst [vmem:[#allocation37_spill] sm:$0xff] %v10641_v40 }
 0x7df   :  { %v8400_v59 = vpop.f32.mrf.mxu0  ;;  %v10654_v1 = vpop.f32.mrf.mxu1 }
 0x7e0   :  { %v3955_v43 = vadd.f32 %v8400_v59, %v10632_v50  ;;  %11838 = vst [vmem:[#allocation32_spill] sm:$0xff] %v10654_v1 }
 0x7e1   :  { %v3949_v36 = vpop.f32.mrf.mxu0 }
 0x7e2   :  { %v10646_v19 = vadd.f32 %v10636_v42, %v3955_v43  ;;  %v3950_v41 = vadd.f32 %v3949_v36, %v10638_v47  ;;  %v10680_v43 = vld [vmem:[#allocation7 + $0x48] sm:$0xff] }
 0x7e3   :  { %11844 = vst [vmem:[#allocation55_spill] sm:$0xff] %v10680_v43 }
 0x7e4   :  { %v10650_v39 = vadd.f32 %v10643_v13, %v3950_v41  ;;  %v4630_v52 = vsel %vm1356_vm2, %v10646_v19, -inf }
 0x7e5   :  { %4631 = vmax.xlane.f32.xlu1 %v4630_v52  ;;  %v10658_v55 = vpop.f32.mrf.mxu1 }
 0x7e6   :  { %v4627_v24 = vsel %vm1356_vm2, %v10650_v39, -inf  ;;  %11839 = vst [vmem:[#allocation31_spill] sm:$0xff] %v10658_v55 }
 0x7e7   :  { %v8414_v28 = vpop.f32.mrf.mxu0  ;;  %4628 = vmax.xlane.f32.xlu0 %v4627_v24  ;;  %v10669_v27 = vpop.f32.mrf.mxu1  ;;  %v10685_v24 = vld [vmem:[#allocation7 + $0x40] sm:$0xff] }
 0x7e8   :  { %v4137_v23 = vadd.f32 %v8414_v28, %v10632_v50  ;;  %11842 = vst [vmem:[#allocation53_spill] sm:$0xff] %v10669_v27  ;;  %11846 = vst [vmem:[#allocation57_spill] sm:$0xff] %v10685_v24 }
 0x7e9   :  { %v4131_v51 = vpop.f32.mrf.mxu0 }
 0x7ea   :  { %v10666_v46 = vadd.f32 %v10660_v21, %v4137_v23  ;;  %v4132_v29 = vadd.f32 %v4131_v51, %v10638_v47 }
 0x7eb   :  { %v10676_v0 = vpop.f32.mrf.mxu1 }
 0x7ec   :  { %v10672_v11 = vadd.f32 %v10663_v48, %v4132_v29  ;;  %v4642_v10 = vsel %vm1356_vm2, %v10666_v46, -inf  ;;  %11843 = vst [vmem:[#allocation54_spill] sm:$0xff] %v10676_v0  ;;  %v10691_v29 = vld [vmem:[#allocation7 + $0x18] sm:$0xff]  ;;  %v10699_v0 = vld [vmem:[#allocation7 + $0x10] sm:$0xff] }
 0x7ed   :  { %4643 = vmax.xlane.f32.xlu1 %v4642_v10  ;;  %v10683_v41 = vpop.f32.mrf.mxu1  ;;  %11847 = vst [vmem:[#allocation58_spill] sm:$0xff] %v10691_v29  ;;  %11848 = vst [vmem:[#allocation59_spill] sm:$0xff] %v10699_v0 }
 0x7ee   :  { %v4639_v6 = vsel %vm1356_vm2, %v10672_v11, -inf  ;;  %11845 = vst [vmem:[#allocation56_spill] sm:$0xff] %v10683_v41 }
 0x7ef   :  { %4640 = vmax.xlane.f32.xlu0 %v4639_v6  ;;  %v8428_v59 = vpop.f32.mrf.mxu0 }
 0x7f0   :  { %v4319_v36 = vadd.f32 %v8428_v59, %v10632_v50 }
 0x7f1   :  { %v4313_v52 = vpop.f32.mrf.mxu0 }
 0x7f2   :  { %v10688_v28 = vadd.f32 %v10680_v43, %v4319_v36  ;;  %v4314_v23 = vadd.f32 %v4313_v52, %v10638_v47 }
 0x7f3   :  { %v8407_v51 = vpop.f32.mrf.mxu1 }
 0x7f4   :  { %v10694_v10 = vadd.f32 %v10685_v24, %v4314_v23  ;;  %v4046_v6 = vadd.f32 %v8407_v51, %v10632_v50  ;;  %v4654_v59 = vsel %vm1356_vm2, %v10688_v28, -inf  ;;  %v10708_v23 = vld [vmem:[#allocation7 + $0x68] sm:$0xff] }
 0x7f5   :  { %v4040_v41 = vpop.f32.mrf.mxu1  ;;  %4655 = vmax.xlane.f32.xlu1 %v4654_v59  ;;  %11849 = vst [vmem:[#allocation60_spill] sm:$0xff] %v10708_v23  ;;  %v10715_v59 = vld [vmem:[#allocation7 + $0x60] sm:$0xff] }
 0x7f6   :  { %v10702_v36 = vadd.f32 %v10691_v29, %v4046_v6  ;;  %v4041_v52 = vadd.f32 %v4040_v41, %v10638_v47  ;;  %v4651_v27 = vsel %vm1356_vm2, %v10694_v10, -inf  ;;  %11850 = vst [vmem:[#allocation61_spill] sm:$0xff] %v10715_v59 }
 0x7f8   :  { %v10706_v14 = vadd.f32 %v10699_v0, %v4041_v52  ;;  %v8442_v49 = vpop.f32.mrf.mxu0  ;;  %v4636_v51 = vsel %vm1356_vm2, %v10702_v36, -inf }
 0x7f9   :  { %v4501_v55 = vadd.f32 %v8442_v49, %v10632_v50  ;;  %4637 = vmax.xlane.f32.xlu0 %v4636_v51  ;;  %4652 = vmax.xlane.f32.xlu1 %v4651_v27  ;;  %v10729_v51 = vld [vmem:[#allocation7 + $0x30] sm:$0xff] }
 0x7fa   :  { %v4495_v6 = vpop.f32.mrf.mxu0  ;;  %v4633_v40 = vsel %vm1356_vm2, %v10706_v14, -inf  ;;  %11852 = vst [vmem:[#allocation63_spill] sm:$0xff] %v10729_v51 }
 0x7fb   :  { %v10718_v41 = vadd.f32 %v10708_v23, %v4501_v55  ;;  %v4496_v52 = vadd.f32 %v4495_v6, %v10638_v47  ;;  %v8421_v8 = vpop.f32.mrf.mxu1 }
 0x7fc   :  { %v4228_v1 = vadd.f32 %v8421_v8, %v10632_v50 }
 0x7fd   :  { %v10727_v49 = vadd.f32 %v10715_v59, %v4496_v52  ;;  %4634 = vmax.xlane.f32.xlu0 %v4633_v40  ;;  %v4222_v27 = vpop.f32.mrf.mxu1  ;;  %v4666_v55 = vsel %vm1356_vm2, %v10718_v41, -inf }
 0x7fe   :  { %v10734_v6 = vadd.f32 %v10721_v32, %v4228_v1  ;;  %v4223_v2 = vadd.f32 %v4222_v27, %v10638_v47  ;;  %4667 = vmax.xlane.f32.xlu1 %v4666_v55 }
 0x7ff   :  { %v4663_v40 = vsel %vm1356_vm2, %v10727_v49, -inf }
 0x800   :  { %v10738_v8 = vadd.f32 %v10729_v51, %v4223_v2  ;;  %v4648_v52 = vsel %vm1356_vm2, %v10734_v6, -inf  ;;  %v10749_v2 = vld [vmem:[#allocation7 + $0x50] sm:$0xff] }
 0x801   :  { %4649 = vmax.xlane.f32.xlu0 %v4648_v52  ;;  %11854 = vst [vmem:[#allocation65_spill] sm:$0xff] %v10749_v2 }
 0x802   :  { %4664 = vmax.xlane.f32.xlu1 %v4663_v40  ;;  %v4645_v27 = vsel %vm1356_vm2, %v10738_v8, -inf }
 0x803   :  { %v8435_v17 = vpop.f32.mrf.mxu1 }
 0x804   :  { %v4410_v1 = vadd.f32 %v8435_v17, %v10632_v50 }
 0x805   :  { %4646 = vmax.xlane.f32.xlu0 %v4645_v27  ;;  %v4404_v55 = vpop.f32.mrf.mxu1 }
 0x806   :  { %v10752_v25 = vadd.f32 %v10744_v26, %v4410_v1  ;;  %v4405_v52 = vadd.f32 %v4404_v55, %v10638_v47  ;;  %v10765_v26 = vld [vmem:[#allocation7 + $0x70] sm:$0xff] }
 0x807   :  { %11856 = vst [vmem:[#allocation67_spill] sm:$0xff] %v10765_v26 }
 0x808   :  { %v10756_v12 = vadd.f32 %v10749_v2, %v4405_v52  ;;  %v4660_v40 = vsel %vm1356_vm2, %v10752_v25, -inf }
 0x809   :  { %4661 = vmax.xlane.f32.xlu0 %v4660_v40 }
 0x80a   :  { %v4657_v59 = vsel %vm1356_vm2, %v10756_v12, -inf }
 0x80b   :  { %v8449_v17 = vpop.f32.mrf.mxu1 }
 0x80c   :  { %v4592_v27 = vadd.f32 %v8449_v17, %v10632_v50  ;;  %v11859_v17 = vld [vmem:[#allocation20_spill] sm:$0xff] }
 0x80d   :  { %4658 = vmax.xlane.f32.xlu0 %v4657_v59  ;;  %v4586_v1 = vpop.f32.mrf.mxu1  ;;  %v11857_v59 = vld [vmem:[#allocation19_spill] sm:$0xff] }
 0x80e   :  { %v10768_v55 = vadd.f32 %v10760_v57, %v4592_v27  ;;  %v4587_v52 = vadd.f32 %v4586_v1, %v10638_v47  ;;  %v11858_v47 = vld [vmem:[#allocation21_spill] sm:$0xff]  ;;  %v10788_v27 = vpop.permute.xlu1 %4977 }
 0x810   :  { %v10772_v2 = vadd.f32 %v10765_v26, %v4587_v52  ;;  %v4672_v40 = vsel %vm1356_vm2, %v10768_v55, -inf }
 0x811   :  { %4673 = vmax.xlane.f32.xlu1 %v4672_v40  ;;  %v10796_v40 = vpop.permute.xlu0 %5064 }
 0x812   :  { %v4669_v50 = vsel %vm1356_vm2, %v10772_v2, -inf  ;;  %v10792_v1 = vpop.permute.xlu1 %5153 }
 0x813   :  { %4670 = vmax.xlane.f32.xlu0 %v4669_v50 }
 0x816   :  { %v10794_v52 = vpop.permute.xlu1 %5151 }
 0x81a   :  { %v10798_v50 = vpop.permute.xlu1 %5327 }
 0x81e   :  { %v10802_v26 = vpop.permute.xlu1 %5325 }
 0x822   :  { %5684 = vrot.lane.b32.xlu1 %v11857_v59, %s9111_s24  ;;  %v10800_v59 = vpop.permute.xlu0 %5240 }
 0x826   :  { %5779 = vrot.lane.b32.xlu1 %v9444_v15, %s9110_s23 }
 0x829   :  { %5781 = vrot.lane.b32.xlu0 %v9432_v45, %s9110_s23 }
 0x82a   :  { %5775 = vrot.lane.b32.xlu1 %v11858_v47, %s9111_s24  ;;  %v10804_v47 = vpop.permute.xlu0 %5238 }
 0x82b   :  { %11860 = vst [vmem:[#allocation19_spill] sm:$0xff] %v10804_v47 }
 0x82d   :  { %5686 = vrot.lane.b32.xlu0 %v11859_v17, %s9111_s24  ;;  %v10806_v17 = vpop.permute.xlu1 %5508 }
 0x82e   :  { %v10808_v57 = vpop.permute.xlu0 %5414 }
 0x82f   :  { %11861 = vst [vmem:[#allocation21_spill] sm:$0xff] %v10808_v57 }
 0x831   :  { %5872 = vrot.lane.b32.xlu0 %v9440_v54, %s9110_s23  ;;  %v10810_v51 = vpop.permute.xlu1 %5506 }
 0x832   :  { %v10812_v54 = vpop.permute.xlu0 %5412 }
 0x833   :  { %11862 = vst [vmem:[#allocation20_spill] sm:$0xff] %v10812_v54 }
 0x835   :  { %v10814_v23 = vpop.permute.xlu1 %5502 }
 0x836   :  { %11863 = vst [vmem:[#allocation68_spill] sm:$0xff] %v10814_v23  ;;  %v10816_v32 = vpop.permute.xlu0 %5599 }
 0x837   :  { %11864 = vst [vmem:[#allocation69_spill] sm:$0xff] %v10816_v32 }
 0x839   :  { %v10818_v24 = vpop.permute.xlu1 %5597 }
 0x83a   :  { %11865 = vst [vmem:[#allocation70_spill] sm:$0xff] %v10818_v24  ;;  %v10820_v0 = vpop.permute.xlu0 %5504 }
 0x83b   :  { %11866 = vst [vmem:[#allocation71_spill] sm:$0xff] %v10820_v0 }
 0x83d   :  { %v10822_v29 = vpop.permute.xlu1 %5593 }
 0x83e   :  { %11867 = vst [vmem:[#allocation72_spill] sm:$0xff] %v10822_v29  ;;  %v10824_v43 = vpop.permute.xlu0 %5690 }
 0x83f   :  { %11868 = vst [vmem:[#allocation73_spill] sm:$0xff] %v10824_v43 }
 0x841   :  { %v10826_v48 = vpop.permute.xlu1 %5688 }
 0x842   :  { %11869 = vst [vmem:[#allocation74_spill] sm:$0xff] %v10826_v48  ;;  %v10828_v21 = vpop.permute.xlu0 %5595 }
 0x843   :  { %11870 = vst [vmem:[#allocation75_spill] sm:$0xff] %v10828_v21 }
 0x86e   :  { %v4632_v13 = vpop.xlane.xlu1 %4631 }
 0x86f   :  { %v4676_v42 = vsub.f32 %v10646_v19, %v4632_v13 }
 0x870   :  { %v4629_v54 = vpop.xlane.xlu0 %4628 }
 0x871   :  { %v4693_v57 = vmul.f32 1.442695, %v4676_v42  ;;  %v4675_v47 = vsub.f32 %v10650_v39, %v4629_v54 }
 0x873   :  { %8839 = vpow2.f32 %v4693_v57  ;;  %v4691_v32 = vmul.f32 1.442695, %v4675_v47 }
 0x875   :  { %8841 = vpow2.f32 %v4691_v32 }
 0x876   :  { %v4644_v24 = vpop.xlane.xlu1 %4643 }
 0x877   :  { %v4680_v0 = vsub.f32 %v10666_v46, %v4644_v24 }
 0x878   :  { %v4641_v29 = vpop.xlane.xlu0 %4640 }
 0x879   :  { %v4701_v23 = vmul.f32 1.442695, %v4680_v0  ;;  %v4679_v43 = vsub.f32 %v10672_v11, %v4641_v29 }
 0x87b   :  { %8843 = vpow2.f32 %v4701_v23  ;;  %v4699_v48 = vmul.f32 1.442695, %v4679_v43 }
 0x87d   :  { %8845 = vpow2.f32 %v4699_v48 }
 0x87e   :  { %v4656_v21 = vpop.xlane.xlu1 %4655 }
 0x87f   :  { %v4684_v13 = vsub.f32 %v10688_v28, %v4656_v21 }
 0x880   :  { %v10835_v19 = vpop.eup %8839 }
 0x881   :  { %v4709_v42 = vmul.f32 1.442695, %v4684_v13  ;;  %v4726_v54 = vsel %vm1356_vm2, %v10835_v19, 0.0 }
 0x882   :  { %v10839_v57 = vpop.eup %8841  ;;  %v4653_v32 = vpop.xlane.xlu1 %4652  ;;  %4727 = vadd.xlane.f32.xlu1 %v4726_v54 }
 0x883   :  { %v4638_v39 = vpop.xlane.xlu0 %4637  ;;  %8847 = vpow2.f32 %v4709_v42  ;;  %v4683_v46 = vsub.f32 %v10694_v10, %v4653_v32  ;;  %v4723_v48 = vsel %vm1356_vm2, %v10839_v57, 0.0 }
 0x884   :  { %v4678_v11 = vsub.f32 %v10702_v36, %v4638_v39  ;;  %4724 = vadd.xlane.f32.xlu0 %v4723_v48 }
 0x885   :  { %v4707_v21 = vmul.f32 1.442695, %v4683_v46 }
 0x886   :  { %v4697_v0 = vmul.f32 1.442695, %v4678_v11 }
 0x887   :  { %v4635_v43 = vpop.xlane.xlu0 %4634  ;;  %8849 = vpow2.f32 %v4707_v21  ;;  %v4668_v24 = vpop.xlane.xlu1 %4667 }
 0x888   :  { %v4677_v28 = vsub.f32 %v10706_v14, %v4635_v43  ;;  %v10846_v29 = vpop.eup %8843  ;;  %8851 = vpow2.f32 %v4697_v0  ;;  %v4688_v23 = vsub.f32 %v10718_v41, %v4668_v24 }
 0x889   :  { %v4738_v10 = vsel %vm1356_vm2, %v10846_v29, 0.0 }
 0x88a   :  { %v4695_v47 = vmul.f32 1.442695, %v4677_v28  ;;  %v10851_v36 = vpop.eup %8845  ;;  %v4717_v13 = vmul.f32 1.442695, %v4688_v23  ;;  %4739 = vadd.xlane.f32.xlu1 %v4738_v10 }
 0x88b   :  { %v4650_v42 = vpop.xlane.xlu0 %4649  ;;  %v4665_v54 = vpop.xlane.xlu1 %4664  ;;  %v4735_v41 = vsel %vm1356_vm2, %v10851_v36, 0.0 }
 0x88c   :  { %8853 = vpow2.f32 %v4695_v47  ;;  %v4682_v32 = vsub.f32 %v10734_v6, %v4650_v42  ;;  %v4687_v14 = vsub.f32 %v10727_v49, %v4665_v54 }
 0x88d   :  { %8855 = vpow2.f32 %v4717_v13 }
 0x88e   :  { %v4705_v39 = vmul.f32 1.442695, %v4682_v32  ;;  %v4715_v46 = vmul.f32 1.442695, %v4687_v14  ;;  %4736 = vadd.xlane.f32.xlu1 %v4735_v41 }
 0x88f   :  { %v4647_v11 = vpop.xlane.xlu0 %4646 }
 0x890   :  { %8857 = vpow2.f32 %v4705_v39  ;;  %v4681_v48 = vsub.f32 %v10738_v8, %v4647_v11  ;;  %v10858_v21 = vpop.eup %8847 }
 0x891   :  { %8859 = vpow2.f32 %v4715_v46  ;;  %v4750_v6 = vsel %vm1356_vm2, %v10858_v21, 0.0 }
 0x892   :  { %v4703_v0 = vmul.f32 1.442695, %v4681_v48  ;;  %4751 = vadd.xlane.f32.xlu1 %v4750_v6 }
 0x893   :  { %v4662_v43 = vpop.xlane.xlu0 %4661 }
 0x894   :  { %8861 = vpow2.f32 %v4703_v0  ;;  %v4686_v49 = vsub.f32 %v10752_v25, %v4662_v43  ;;  %v10863_v24 = vpop.eup %8849 }
 0x895   :  { %v10865_v28 = vpop.eup %8851  ;;  %v4747_v8 = vsel %vm1356_vm2, %v10863_v24, 0.0 }
 0x896   :  { %v4713_v23 = vmul.f32 1.442695, %v4686_v49  ;;  %4748 = vadd.xlane.f32.xlu1 %v4747_v8  ;;  %v4732_v47 = vsel %vm1356_vm2, %v10865_v28, 0.0 }
 0x897   :  { %v4659_v10 = vpop.xlane.xlu0 %4658  ;;  %4733 = vadd.xlane.f32.xlu0 %v4732_v47 }
 0x898   :  { %8863 = vpow2.f32 %v4713_v23  ;;  %v4685_v13 = vsub.f32 %v10756_v12, %v4659_v10 }
 0x899   :  { %v10872_v42 = vpop.eup %8853 }
 0x89a   :  { %v10874_v25 = vpop.eup %8855  ;;  %v4711_v54 = vmul.f32 1.442695, %v4685_v13  ;;  %v4729_v32 = vsel %vm1356_vm2, %v10872_v42, 0.0  ;;  %v4674_v14 = vpop.xlane.xlu1 %4673 }
 0x89b   :  { %v4762_v39 = vsel %vm1356_vm2, %v10874_v25, 0.0  ;;  %v4690_v41 = vsub.f32 %v10768_v55, %v4674_v14  ;;  %4730 = vadd.xlane.f32.xlu0 %v4729_v32 }
 0x89c   :  { %8865 = vpow2.f32 %v4711_v54  ;;  %4763 = vadd.xlane.f32.xlu1 %v4762_v39  ;;  %v4671_v12 = vpop.xlane.xlu0 %4670 }
 0x89d   :  { %v10881_v46 = vpop.eup %8857  ;;  %v4721_v48 = vmul.f32 1.442695, %v4690_v41  ;;  %v4689_v0 = vsub.f32 %v10772_v2, %v4671_v12 }
 0x89e   :  { %v10883_v11 = vpop.eup %8859  ;;  %v4744_v6 = vsel %vm1356_vm2, %v10881_v46, 0.0 }
 0x89f   :  { %v4759_v43 = vsel %vm1356_vm2, %v10883_v11, 0.0  ;;  %8867 = vpow2.f32 %v4721_v48  ;;  %v4719_v49 = vmul.f32 1.442695, %v4689_v0  ;;  %4745 = vadd.xlane.f32.xlu0 %v4744_v6 }
 0x8a0   :  { %4760 = vadd.xlane.f32.xlu1 %v4759_v43 }
 0x8a1   :  { %v10890_v55 = vpop.eup %8861  ;;  %8869 = vpow2.f32 %v4719_v49 }
 0x8a2   :  { %v4741_v23 = vsel %vm1356_vm2, %v10890_v55, 0.0 }
 0x8a3   :  { %4742 = vadd.xlane.f32.xlu0 %v4741_v23 }
 0x8a5   :  { %v10894_v8 = vpop.eup %8863 }
 0x8a6   :  { %v4756_v2 = vsel %vm1356_vm2, %v10894_v8, 0.0 }
 0x8a7   :  { %4757 = vadd.xlane.f32.xlu0 %v4756_v2 }
 0x8a9   :  { %v10898_v47 = vpop.eup %8865 }
 0x8aa   :  { %v4753_v10 = vsel %vm1356_vm2, %v10898_v47, 0.0 }
 0x8ab   :  { %4754 = vadd.xlane.f32.xlu0 %v4753_v10 }
 0x8ac   :  { %v10902_v13 = vpop.eup %8867 }
 0x8ad   :  { %v4768_v54 = vsel %vm1356_vm2, %v10902_v13, 0.0 }
 0x8ae   :  { %v10906_v32 = vpop.eup %8869  ;;  %4769 = vadd.xlane.f32.xlu1 %v4768_v54 }
 0x8af   :  { %v4765_v14 = vsel %vm1356_vm2, %v10906_v32, 0.0 }
 0x8b0   :  { %4766 = vadd.xlane.f32.xlu0 %v4765_v14 }
 0x8bf   :  { %5870 = vrot.lane.b32.xlu1 %v9446_v18, %s9110_s23 }
 0x8c3   :  { %5866 = vrot.lane.b32.xlu1 %v9455_v16, %s9111_s24 }
 0x8c6   :  { %5777 = vrot.lane.b32.xlu0 %v9584_v58, %s9111_s24 }
 0x8c7   :  { %5961 = vrot.lane.b32.xlu1 %v9465_v31, %s9110_s23 }
 0x8ca   :  { %5963 = vrot.lane.b32.xlu0 %v9450_v22, %s9110_s23 }
 0x8cb   :  { %5957 = vrot.lane.b32.xlu1 %v9588_v60, %s9111_s24 }
 0x8ce   :  { %5868 = vrot.lane.b32.xlu0 %v9566_v53, %s9111_s24 }
 0x8cf   :  { %6052 = vrot.lane.b32.xlu1 %v9473_v34, %s9110_s23 }
 0x8d2   :  { %6054 = vrot.lane.b32.xlu0 %v9461_v30, %s9110_s23 }
 0x8d3   :  { %6048 = vrot.lane.b32.xlu1 %v9572_v56, %s9111_s24 }
 0x8d6   :  { %5959 = vrot.lane.b32.xlu0 %v9604_v44, %s9111_s24 }
 0x8d7   :  { %6143 = vrot.lane.b32.xlu1 %v9479_v38, %s9110_s23 }
 0x8da   :  { %6145 = vrot.lane.b32.xlu0 %v9469_v33, %s9110_s23 }
 0x8db   :  { %6141 = vrot.lane.b32.xlu1 %v9620_v4, %s9111_s24 }
 0x8de   :  { %6050 = vrot.lane.b32.xlu0 %v9593_v61, %s9111_s24 }
 0x8df   :  { %6438 = vrot.lane.b32.xlu1 %v9411_v37, %s9112_s1  ;;  %v10958_v37 = vpop.permute.xlu1 %5684 }
 0x8e2   :  { %6139 = vrot.lane.b32.xlu0 %v9607_v62, %s9111_s24 }
 0x8e3   :  { %6525 = vrot.lane.b32.xlu1 %v9428_v7, %s9112_s1  ;;  %v10960_v7 = vpop.permute.xlu0 %5781 }
 0x8e6   :  { %6440 = vrot.lane.b32.xlu0 %v9409_v63, %s9112_s1  ;;  %v10962_v63 = vpop.permute.xlu1 %5779 }
 0x8e7   :  { %6614 = vrot.lane.b32.xlu1 %v9424_v5, %s9112_s1  ;;  %v10964_v16 = vpop.permute.xlu0 %5686 }
 0x8ea   :  { %6527 = vrot.lane.b32.xlu0 %v9420_v3, %s9112_s1  ;;  %v10966_v5 = vpop.permute.xlu1 %5775 }
 0x8eb   :  { %6612 = vrot.lane.b32.xlu1 %v9436_v9, %s9112_s1  ;;  %v10968_v3 = vpop.permute.xlu0 %5872 }
 0x8ee   :  { %6701 = vrot.lane.b32.xlu0 %v9432_v45, %s9112_s1 }
 0x8ef   :  { %6699 = vrot.lane.b32.xlu1 %v9444_v15, %s9112_s1 }
 0x90b   :  { %v4728_v53 = vpop.xlane.xlu1 %4727 }
 0x90c   :  { %8871 = vrcp.f32 %v4728_v53 }
 0x90d   :  { %v4725_v9 = vpop.xlane.xlu0 %4724 }
 0x90e   :  { %8873 = vrcp.f32 %v4725_v9  ;;  %v11873_v9 = vld [vmem:[#allocation73_spill] sm:$0xff] }
 0x913   :  { %v4740_v45 = vpop.xlane.xlu1 %4739 }
 0x914   :  { %8875 = vrcp.f32 %v4740_v45 }
 0x917   :  { %v4737_v56 = vpop.xlane.xlu1 %4736 }
 0x918   :  { %8877 = vrcp.f32 %v4737_v56 }
 0x919   :  { %v8872_v15 = vpop.eup %8871 }
 0x91a   :  { %v4788_v44 = vmul.f32 %v8872_v15, %v10835_v19  ;;  %v11874_v15 = vld [vmem:[#allocation21_spill] sm:$0xff] }
 0x91b   :  { %v8874_v58 = vpop.eup %8873  ;;  %v4752_v60 = vpop.xlane.xlu1 %4751 }
 0x91c   :  { %v4787_v61 = vmul.f32 %v8874_v58, %v10839_v57  ;;  %8879 = vrcp.f32 %v4752_v60  ;;  %v11875_v58 = vld [vmem:[#allocation71_spill] sm:$0xff]  ;;  %v11876_v60 = vld [vmem:[#allocation74_spill] sm:$0xff] }
 0x91e   :  { %8454 = vmatprep.mubr.msk.f32.mxu0 %vm1356_vm2, %v4787_v61 }
 0x91f   :  { %v4749_v62 = vpop.xlane.xlu1 %4748  ;;  %8455 = vmatmul.mubr.msk.f32.vlgmr.msra.gmra.mxu0 %vm1356_vm2, %v4788_v44 }
 0x920   :  { %8881 = vrcp.f32 %v4749_v62  ;;  %8465 = vmatpush3.msra.mxu0 %v10603_v20  ;;  %v4734_v4 = vpop.xlane.xlu0 %4733 }
 0x921   :  { %8466 = vmatprep.subr.mxu0 %v10788_v27  ;;  %v8876_v39 = vpop.eup %8875  ;;  %8883 = vrcp.f32 %v4734_v4 }
 0x922   :  { %8467 = vmatpush3.msra.mxu0 %v10788_v27  ;;  %v4792_v48 = vmul.f32 %v8876_v39, %v10846_v29  ;;  %v11877_v39 = vld [vmem:[#allocation20_spill] sm:$0xff] }
 0x923   :  { %8478 = vmatprep.subr.mxu0 %v10792_v1 }
 0x924   :  { %v4731_v41 = vpop.xlane.xlu0 %4730 }
 0x925   :  { %v4764_v57 = vpop.xlane.xlu1 %4763  ;;  %v8878_v19 = vpop.eup %8877  ;;  %8885 = vrcp.f32 %v4731_v41 }
 0x926   :  { %v4791_v12 = vmul.f32 %v8878_v19, %v10851_v36  ;;  %8887 = vrcp.f32 %v4764_v57  ;;  %v11878_v57 = vld [vmem:[#allocation69_spill] sm:$0xff] }
 0x928   :  { %v4746_v20 = vpop.xlane.xlu0 %4745  ;;  %8468 = vmatprep.mubr.msk.f32.mxu0 %vm1356_vm2, %v4791_v12  ;;  %v11879_v12 = vld [vmem:[#allocation72_spill] sm:$0xff] }
 0x929   :  { %v4761_v0 = vpop.xlane.xlu1 %4760  ;;  %8469 = vmatmul.mubr.msk.f32.vlgmr.msra.gmra.mxu0 %vm1356_vm2, %v4792_v48  ;;  %v8880_v27 = vpop.eup %8879 }
 0x92a   :  { %8889 = vrcp.f32 %v4761_v0  ;;  %8479 = vmatpush3.msra.mxu0 %v10792_v1  ;;  %v4796_v43 = vmul.f32 %v8880_v27, %v10858_v21  ;;  %v11881_v0 = vld [vmem:[#allocation75_spill] sm:$0xff] }
 0x92b   :  { %8480 = vmatprep.subr.mxu0 %v10794_v52  ;;  %8891 = vrcp.f32 %v4746_v20 }
 0x92c   :  { %8481 = vmatpush3.msra.mxu0 %v10794_v52  ;;  %v4743_v6 = vpop.xlane.xlu0 %4742 }
 0x92d   :  { %v8882_v36 = vpop.eup %8881  ;;  %8893 = vrcp.f32 %v4743_v6  ;;  %8492 = vmatprep.subr.mxu0 %v10798_v50 }
 0x92e   :  { %v4795_v29 = vmul.f32 %v8882_v36, %v10863_v24  ;;  %v8884_v1 = vpop.eup %8883 }
 0x92f   :  { %v4790_v21 = vmul.f32 %v8884_v1, %v10865_v28 }
 0x930   :  { %v4758_v49 = vpop.xlane.xlu0 %4757  ;;  %8482 = vmatprep.mubr.msk.f32.mxu0 %vm1356_vm2, %v4795_v29 }
 0x931   :  { %8483 = vmatmul.mubr.msk.f32.vlgmr.msra.gmra.mxu0 %vm1356_vm2, %v4796_v43  ;;  %8895 = vrcp.f32 %v4758_v49 }
 0x932   :  { %8493 = vmatpush3.msra.mxu0 %v10798_v50  ;;  %v8886_v23 = vpop.eup %8885 }
 0x933   :  { %8494 = vmatprep.subr.mxu0 %v10802_v26  ;;  %v4789_v2 = vmul.f32 %v8886_v23, %v10872_v42  ;;  %v8888_v24 = vpop.eup %8887 }
 0x934   :  { %8495 = vmatpush3.msra.mxu0 %v10802_v26  ;;  %v4755_v52 = vpop.xlane.xlu0 %4754  ;;  %v4800_v26 = vmul.f32 %v8888_v24, %v10874_v25  ;;  %v11871_v25 = vld [vmem:[#allocation68_spill] sm:$0xff] }
 0x935   :  { %8897 = vrcp.f32 %v4755_v52  ;;  %8506 = vmatprep.subr.msk.mxu0 %vm601_vm1, %v10806_v17  ;;  %8461 = vmatprep.mubr.msk.f32.mxu1 %vm1356_vm2, %v4789_v2 }
 0x936   :  { %8462 = vmatmul.mubr.msk.f32.vlgmr.msra.gmra.mxu1 %vm1356_vm2, %v4790_v21 }
 0x937   :  { %v8890_v10 = vpop.eup %8889  ;;  %v4770_v50 = vpop.xlane.xlu1 %4769  ;;  %8472 = vmatpush3.msra.mxu1 %v10611_v35 }
 0x938   :  { %v4799_v54 = vmul.f32 %v8890_v10, %v10883_v11  ;;  %v8892_v42 = vpop.eup %8891  ;;  %8473 = vmatprep.subr.mxu1 %v10796_v40 }
 0x939   :  { %v4767_v14 = vpop.xlane.xlu0 %4766  ;;  %8474 = vmatpush3.msra.mxu1 %v10796_v40  ;;  %v4794_v40 = vmul.f32 %v8892_v42, %v10881_v46 }
 0x93a   :  { %8496 = vmatprep.mubr.msk.f32.mxu0 %vm1356_vm2, %v4799_v54  ;;  %v8894_v53 = vpop.eup %8893  ;;  %8899 = vrcp.f32 %v4767_v14  ;;  %8485 = vmatprep.subr.mxu1 %v10800_v59  ;;  %v11124_v54 = vld [vmem:[#allocation5 + $0x38] sm:$0xff]  ;;  %v11128_v14 = vld [vmem:[#allocation5 + $0x30] sm:$0xff] }
 0x93b   :  { %8497 = vmatmul.mubr.msk.f32.vlgmr.msra.gmra.mxu0 %vm1356_vm2, %v4800_v26  ;;  %8901 = vrcp.f32 %v4770_v50  ;;  %v5871_v35 = vpop.permute.xlu1 %5870  ;;  %v4793_v28 = vmul.f32 %v8894_v53, %v10890_v55  ;;  %v11872_v55 = vld [vmem:[#allocation19_spill] sm:$0xff] }
 0x93c   :  { %8507 = vmatpush3.xpose.msk.msra.mxu0 %vm601_vm1, %v10806_v17  ;;  %8510 = vmatprep.mubr.msk.f32.mxu0 %vm601_vm1, %v11871_v25  ;;  %v11882_v25 = vld [vmem:[#allocation28_spill] sm:$0xff] }
 0x93d   :  { %8508 = vmatprep.subr.msk.mxu0 %vm601_vm1, %v10810_v51  ;;  %8475 = vmatprep.mubr.msk.f32.mxu1 %vm1356_vm2, %v4793_v28  ;;  %v11016_v11 = vpop.permute.xlu0 %5777 }
 0x93e   :  { %8476 = vmatmul.mubr.msk.f32.vlgmr.msra.gmra.mxu1 %vm1356_vm2, %v4794_v40  ;;  %v8896_v45 = vpop.eup %8895 }
 0x93f   :  { %8486 = vmatpush3.msra.mxu1 %v10800_v59  ;;  %v5867_v17 = vpop.permute.xlu1 %5866  ;;  %v4798_v61 = vmul.f32 %v8896_v45, %v10894_v8 }
 0x940   :  { %8509 = vmatpush3.xpose.msk.msra.mxu0 %vm601_vm1, %v10810_v51  ;;  %8487 = vmatprep.subr.mxu1 %v11872_v55 }
 0x941   :  { %8520 = vmatprep.subr.msk.mxu0 %vm601_vm1, %v11873_v9  ;;  %8488 = vmatpush3.msra.mxu1 %v11872_v55  ;;  %v5964_v46 = vpop.permute.xlu0 %5963  ;;  %v11883_v55 = vld [vmem:[#allocation25_spill] sm:$0xff] }
 0x942   :  { %v8898_v56 = vpop.eup %8897  ;;  %8499 = vmatprep.subr.mxu1 %v11874_v15 }
 0x943   :  { %8511 = vmatmul.mubr.msk.f32.vlgmr.msra.gmra.mxu0 %vm601_vm1, %v11875_v58  ;;  %v5962_v51 = vpop.permute.xlu1 %5961  ;;  %v4797_v59 = vmul.f32 %v8898_v56, %v10898_v47 }
 0x944   :  { %8521 = vmatpush3.xpose.msk.msra.mxu0 %vm601_vm1, %v11873_v9  ;;  %8524 = vmatprep.mubr.msk.f32.mxu0 %vm601_vm1, %v10958_v37 }
 0x945   :  { %8522 = vmatprep.subr.msk.mxu0 %vm601_vm1, %v11876_v60  ;;  %8489 = vmatprep.mubr.msk.f32.mxu1 %vm1356_vm2, %v4797_v59  ;;  %v5869_v44 = vpop.permute.xlu0 %5868 }
 0x946   :  { %8490 = vmatmul.mubr.msk.f32.vlgmr.msra.gmra.mxu1 %vm1356_vm2, %v4798_v61 }
 0x947   :  { %v8900_v62 = vpop.eup %8899  ;;  %8500 = vmatpush3.msra.mxu1 %v11874_v15  ;;  %v5958_v37 = vpop.permute.xlu1 %5957 }
 0x948   :  { %8523 = vmatpush3.xpose.msk.msra.mxu0 %vm601_vm1, %v11876_v60  ;;  %v8902_v4 = vpop.eup %8901  ;;  %8501 = vmatprep.subr.mxu1 %v11877_v39  ;;  %v4801_v8 = vmul.f32 %v8900_v62, %v10906_v32  ;;  %v11884_v60 = vld [vmem:[#allocation33_spill] sm:$0xff]  ;;  %v11885_v62 = vld [vmem:[#allocation36_spill] sm:$0xff] }
 0x949   :  { %8534 = vmatprep.subr.msk.mxu0 %vm601_vm1, %v10968_v3  ;;  %8502 = vmatpush3.msra.mxu1 %v11877_v39  ;;  %v6055_v47 = vpop.permute.xlu0 %6054  ;;  %v4802_v19 = vmul.f32 %v8902_v4, %v10902_v13 }
 0x94a   :  { %8513 = vmatprep.subr.msk.mxu1 %vm601_vm1, %v11878_v57  ;;  %8503 = vmatprep.mubr.msk.f32.mxu1 %vm1356_vm2, %v4801_v8 }
 0x94b   :  { %8525 = vmatmul.mubr.msk.f32.vlgmr.msra.gmra.mxu0 %vm601_vm1, %v10964_v16  ;;  %v6053_v41 = vpop.permute.xlu1 %6052  ;;  %8504 = vmatmul.mubr.msk.f32.vlgmr.msra.gmra.mxu1 %vm1356_vm2, %v4802_v19  ;;  %v11880_v16 = vld [vmem:[#allocation70_spill] sm:$0xff]  ;;  %v11886_v19 = vld [vmem:[#allocation55_spill] sm:$0xff] }
 0x94c   :  { %8535 = vmatpush3.xpose.msk.msra.mxu0 %vm601_vm1, %v10968_v3  ;;  %8538 = vmatprep.mubr.msk.f32.mxu0 %vm601_vm1, %v5867_v17 }
 0x94d   :  { %8536 = vmatprep.subr.msk.mxu0 %vm601_vm1, %v5871_v35  ;;  %v5960_v32 = vpop.permute.xlu0 %5959  ;;  %8514 = vmatpush3.xpose.msk.msra.mxu1 %vm601_vm1, %v11878_v57 }
 0x94e   :  { %8517 = vmatprep.mubr.msk.f32.mxu1 %vm601_vm1, %v11879_v12  ;;  %8515 = vmatprep.subr.msk.mxu1 %vm601_vm1, %v11880_v16 }
 0x94f   :  { %v6049_v3 = vpop.permute.xlu1 %6048 }
 0x950   :  { %8537 = vmatpush3.xpose.msk.msra.mxu0 %vm601_vm1, %v5871_v35 }
 0x951   :  { %8548 = vmatprep.subr.msk.mxu0 %vm601_vm1, %v6055_v47  ;;  %v6146_v13 = vpop.permute.xlu0 %6145  ;;  %8516 = vmatpush3.xpose.msk.msra.mxu1 %vm601_vm1, %v11880_v16 }
 0x952   :  { %8527 = vmatprep.subr.msk.mxu1 %vm601_vm1, %v10960_v7 }
 0x953   :  { %8539 = vmatmul.mubr.msk.f32.vlgmr.msra.gmra.mxu0 %vm601_vm1, %v5869_v44  ;;  %v6144_v48 = vpop.permute.xlu1 %6143 }
 0x954   :  { %8549 = vmatpush3.xpose.msk.msra.mxu0 %vm601_vm1, %v6055_v47  ;;  %8552 = vmatprep.mubr.msk.f32.mxu0 %vm601_vm1, %v6049_v3 }
 0x955   :  { %8550 = vmatprep.subr.msk.mxu0 %vm601_vm1, %v6053_v41  ;;  %8518 = vmatmul.mubr.msk.f32.vlgmr.msra.gmra.mxu1 %vm601_vm1, %v11881_v0  ;;  %v6051_v20 = vpop.permute.xlu0 %6050  ;;  %v11887_v0 = vld [vmem:[#allocation58_spill] sm:$0xff] }
 0x956   :  { %8528 = vmatpush3.xpose.msk.msra.mxu1 %vm601_vm1, %v10960_v7  ;;  %8531 = vmatprep.mubr.msk.f32.mxu1 %vm601_vm1, %v10966_v5 }
 0x957   :  { %8529 = vmatprep.subr.msk.mxu1 %vm601_vm1, %v10962_v63  ;;  %v6142_v27 = vpop.permute.xlu1 %6141 }
 0x958   :  { %8551 = vmatpush3.xpose.msk.msra.mxu0 %vm601_vm1, %v6053_v41 }
 0x959   :  { %v6140_v6 = vpop.permute.xlu0 %6139 }
 0x95a   :  { %8530 = vmatpush3.xpose.msk.msra.mxu1 %vm601_vm1, %v10962_v63 }
 0x95b   :  { %8553 = vmatmul.mubr.msk.f32.vlgmr.msra.gmra.mxu0 %vm601_vm1, %v6051_v20  ;;  %8541 = vmatprep.subr.msk.mxu1 %vm601_vm1, %v5964_v46  ;;  %v6439_v36 = vpop.permute.xlu1 %6438 }
 0x95d   :  { %8532 = vmatmul.mubr.msk.f32.vlgmr.msra.gmra.mxu1 %vm601_vm1, %v11016_v11  ;;  %v6441_v7 = vpop.permute.xlu0 %6440 }
 0x95e   :  { %8542 = vmatpush3.xpose.msk.msra.mxu1 %vm601_vm1, %v5964_v46  ;;  %8545 = vmatprep.mubr.msk.f32.mxu1 %vm601_vm1, %v5958_v37 }
 0x95f   :  { %8543 = vmatprep.subr.msk.mxu1 %vm601_vm1, %v5962_v51  ;;  %8562 = vmatprep.subr.mxu0 %v6441_v7  ;;  %v6526_v5 = vpop.permute.xlu1 %6525 }
 0x960   :  { %8563 = vmatpush3.msra.mxu0 %v6441_v7 }
 0x961   :  { %8564 = vmatprep.subr.mxu0 %v6439_v36  ;;  %v6528_v29 = vpop.permute.xlu0 %6527 }
 0x962   :  { %8544 = vmatpush3.xpose.msk.msra.mxu1 %vm601_vm1, %v5962_v51  ;;  %8565 = vmatpush3.msra.mxu0 %v6439_v36  ;;  %v11888_v36 = vld [vmem:[#allocation59_spill] sm:$0xff] }
 0x963   :  { %8555 = vmatprep.subr.msk.mxu1 %vm601_vm1, %v6146_v13  ;;  %v11094_v63 = vpop.permute.xlu1 %6614 }
 0x964   :  { %8576 = vmatprep.subr.mxu0 %v11094_v63 }
 0x965   :  { %8546 = vmatmul.mubr.msk.f32.vlgmr.msra.gmra.mxu1 %vm601_vm1, %v5960_v32  ;;  %v11103_v43 = vpop.permute.xlu0 %6701 }
 0x966   :  { %8556 = vmatpush3.xpose.msk.msra.mxu1 %vm601_vm1, %v6146_v13  ;;  %8559 = vmatprep.mubr.msk.f32.mxu1 %vm601_vm1, %v6140_v6 }
 0x967   :  { %8557 = vmatprep.subr.msk.mxu1 %vm601_vm1, %v6144_v48 }
 0x96a   :  { %8558 = vmatpush3.xpose.msk.msra.mxu1 %vm601_vm1, %v6144_v48 }
 0x96b   :  { %8569 = vmatprep.subr.mxu1 %v6528_v29 }
 0x96d   :  { %8560 = vmatmul.mubr.msk.f32.vlgmr.msra.gmra.mxu1 %vm601_vm1, %v6142_v27 }
 0x96e   :  { %8570 = vmatpush3.msra.mxu1 %v6528_v29 }
 0x96f   :  { %8571 = vmatprep.subr.mxu1 %v6526_v5 }
 0x970   :  { %8572 = vmatpush3.msra.mxu1 %v6526_v5 }
 0x971   :  { %8583 = vmatprep.subr.mxu1 %v11103_v43 }
 0x9df   :  { %v11106_v49 = vpop.f32.mrf.mxu0 }
 0x9e1   :  { %v11108_v1 = vpop.f32.mrf.mxu0 }
 0x9e9   :  { %v11110_v23 = vpop.f32.mrf.mxu0 }
 0x9eb   :  { %v11112_v52 = vpop.f32.mrf.mxu0 }
 0x9f1   :  { %v11114_v2 = vpop.f32.mrf.mxu0 }
 0x9f3   :  { %v11116_v24 = vpop.f32.mrf.mxu0 }
 0x9f6   :  { %v11120_v10 = vpop.f32.mrf.mxu1 }
 0x9f8   :  { %v11126_v26 = vpop.f32.mrf.mxu1 }
 0x9fb   :  { %v11118_v21 = vpop.f32.mrf.mxu0 }
 0x9fd   :  { %v11122_v50 = vpop.f32.mrf.mxu0 }
 0x9fe   :  { %v11130_v53 = vpop.f32.mrf.mxu1 }
 0xa00   :  { %v11137_v17 = vpop.f32.mrf.mxu1 }
 0xa03   :  { %v8512_v42 = vpop.f32.mrf.mxu0 }
 0xa04   :  { %v5590_v35 = vadd.f32 %v8512_v42, %v11124_v54  ;;  %v11889_v42 = vld [vmem:[#allocation57_spill] sm:$0xff] }
 0xa05   :  { %v5584_v28 = vpop.f32.mrf.mxu0 }
 0xa06   :  { %v11134_v40 = vadd.f32 %v5590_v35, %v11882_v25  ;;  %v5585_v11 = vadd.f32 %v5584_v28, %v11128_v14  ;;  %v11144_v46 = vpop.f32.mrf.mxu1 }
 0xa08   :  { %v11140_v9 = vadd.f32 %v5585_v11, %v11883_v55  ;;  %v6265_v45 = vsel %vm1356_vm2, %v11134_v40, -inf  ;;  %v11149_v59 = vpop.f32.mrf.mxu1 }
 0xa09   :  { %6266 = vmax.xlane.f32.xlu1 %v6265_v45 }
 0xa0a   :  { %v6262_v56 = vsel %vm1356_vm2, %v11140_v9, -inf }
 0xa0b   :  { %v8526_v15 = vpop.f32.mrf.mxu0  ;;  %6263 = vmax.xlane.f32.xlu0 %v6262_v56  ;;  %v11158_v4 = vpop.f32.mrf.mxu1 }
 0xa0c   :  { %v5772_v58 = vadd.f32 %v8526_v15, %v11124_v54  ;;  %v11890_v15 = vld [vmem:[#allocation62_spill] sm:$0xff] }
 0xa0d   :  { %v5766_v51 = vpop.f32.mrf.mxu0  ;;  %v11164_v57 = vpop.f32.mrf.mxu1 }
 0xa0e   :  { %v11152_v61 = vadd.f32 %v5772_v58, %v11884_v60  ;;  %v5767_v44 = vadd.f32 %v5766_v51, %v11128_v14 }
 0xa10   :  { %v11156_v37 = vadd.f32 %v5767_v44, %v11885_v62  ;;  %v6277_v39 = vsel %vm1356_vm2, %v11152_v61, -inf  ;;  %v11891_v44 = vld [vmem:[#allocation60_spill] sm:$0xff] }
 0xa11   :  { %6278 = vmax.xlane.f32.xlu1 %v6277_v39 }
 0xa12   :  { %v6274_v8 = vsel %vm1356_vm2, %v11156_v37, -inf }
 0xa13   :  { %6275 = vmax.xlane.f32.xlu0 %v6274_v8  ;;  %v8540_v47 = vpop.f32.mrf.mxu0  ;;  %v11892_v8 = vld [vmem:[#allocation63_spill] sm:$0xff] }
 0xa14   :  { %v5954_v41 = vadd.f32 %v8540_v47, %v11124_v54 }
 0xa15   :  { %v8519_v12 = vpop.f32.mrf.mxu1  ;;  %v5948_v3 = vpop.f32.mrf.mxu0 }
 0xa16   :  { %v11168_v32 = vadd.f32 %v5954_v41, %v11886_v19  ;;  %v5681_v16 = vadd.f32 %v8519_v12, %v11124_v54  ;;  %v5949_v6 = vadd.f32 %v5948_v3, %v11128_v14  ;;  %v11893_v12 = vld [vmem:[#allocation61_spill] sm:$0xff] }
 0xa17   :  { %v5675_v13 = vpop.f32.mrf.mxu1 }
 0xa18   :  { %v6289_v48 = vsel %vm1356_vm2, %v11168_v32, -inf  ;;  %v11174_v20 = vadd.f32 %v5681_v16, %v11887_v0  ;;  %v5676_v27 = vadd.f32 %v5675_v13, %v11128_v14  ;;  %v11184_v35 = vadd.f32 %v5949_v6, %v11889_v42 }
 0xa19   :  { %6290 = vmax.xlane.f32.xlu1 %v6289_v48 }
 0xa1a   :  { %v11179_v7 = vadd.f32 %v5676_v27, %v11888_v36  ;;  %v6271_v5 = vsel %vm1356_vm2, %v11174_v20, -inf  ;;  %v6286_v60 = vsel %vm1356_vm2, %v11184_v35, -inf  ;;  %v11894_v27 = vld [vmem:[#allocation64_spill] sm:$0xff] }
 0xa1b   :  { %6272 = vmax.xlane.f32.xlu0 %v6271_v5  ;;  %v8554_v29 = vpop.f32.mrf.mxu0  ;;  %v11895_v5 = vld [vmem:[#allocation65_spill] sm:$0xff] }
 0xa1c   :  { %v6136_v25 = vadd.f32 %v8554_v29, %v11124_v54  ;;  %v6268_v55 = vsel %vm1356_vm2, %v11179_v7, -inf }
 0xa1d   :  { %v8533_v28 = vpop.f32.mrf.mxu1  ;;  %v6130_v45 = vpop.f32.mrf.mxu0 }
 0xa1e   :  { %v5863_v11 = vadd.f32 %v8533_v28, %v11124_v54  ;;  %v11197_v62 = vadd.f32 %v6136_v25, %v11891_v44  ;;  %v6131_v39 = vadd.f32 %v6130_v45, %v11128_v14  ;;  %v11898_v44 = vld [vmem:[#allocation67_spill] sm:$0xff] }
 0xa1f   :  { %6269 = vmax.xlane.f32.xlu0 %v6268_v55  ;;  %v5857_v56 = vpop.f32.mrf.mxu1 }
 0xa20   :  { %v11191_v58 = vadd.f32 %v5863_v11, %v11890_v15  ;;  %v5858_v51 = vadd.f32 %v5857_v56, %v11128_v14  ;;  %v11206_v16 = vadd.f32 %v6131_v39, %v11893_v12  ;;  %v6301_v48 = vsel %vm1356_vm2, %v11197_v62, -inf  ;;  %v11896_v11 = vld [vmem:[#allocation16_spill] sm:$0xff]  ;;  %v11897_v15 = vld [vmem:[#allocation66_spill] sm:$0xff] }
 0xa22   :  { %v11201_v47 = vadd.f32 %v5858_v51, %v11892_v8  ;;  %v6283_v41 = vsel %vm1356_vm2, %v11191_v58, -inf  ;;  %v6298_v28 = vsel %vm1356_vm2, %v11206_v16, -inf }
 0xa23   :  { %6284 = vmax.xlane.f32.xlu1 %v6283_v41  ;;  %6287 = vmax.xlane.f32.xlu0 %v6286_v60 }
 0xa24   :  { %v6280_v13 = vsel %vm1356_vm2, %v11201_v47, -inf }
 0xa25   :  { %v8547_v19 = vpop.f32.mrf.mxu1 }
 0xa26   :  { %v6045_v3 = vadd.f32 %v8547_v19, %v11124_v54 }
 0xa27   :  { %6281 = vmax.xlane.f32.xlu0 %v6280_v13  ;;  %v6039_v0 = vpop.f32.mrf.mxu1  ;;  %6302 = vmax.xlane.f32.xlu1 %v6301_v48 }
 0xa28   :  { %v11214_v6 = vadd.f32 %v6045_v3, %v11894_v27  ;;  %v6040_v36 = vadd.f32 %v6039_v0, %v11128_v14 }
 0xa2a   :  { %v11218_v29 = vadd.f32 %v6040_v36, %v11895_v5  ;;  %v6295_v42 = vsel %vm1356_vm2, %v11214_v6, -inf }
 0xa2b   :  { %6296 = vmax.xlane.f32.xlu1 %v6295_v42  ;;  %6299 = vmax.xlane.f32.xlu0 %v6298_v28 }
 0xa2c   :  { %v6292_v25 = vsel %vm1356_vm2, %v11218_v29, -inf }
 0xa2d   :  { %v8561_v55 = vpop.f32.mrf.mxu1 }
 0xa2e   :  { %v6227_v45 = vadd.f32 %v8561_v55, %v11124_v54  ;;  %v11250_v54 = vpop.permute.xlu1 %6612 }
 0xa2f   :  { %6293 = vmax.xlane.f32.xlu0 %v6292_v25  ;;  %v6221_v56 = vpop.f32.mrf.mxu1 }
 0xa30   :  { %v11232_v51 = vadd.f32 %v6227_v45, %v11897_v15  ;;  %v6222_v60 = vadd.f32 %v6221_v56, %v11128_v14 }
 0xa32   :  { %v11236_v39 = vadd.f32 %v6222_v60, %v11898_v44  ;;  %v6307_v8 = vsel %vm1356_vm2, %v11232_v51, -inf  ;;  %v11252_v14 = vpop.permute.xlu1 %6699 }
 0xa3c   :  { %6786 = vrot.lane.b32.xlu1 %v9446_v18, %s9112_s1  ;;  %v6304_v18 = vsel %vm1356_vm2, %v11236_v39, -inf }
 0xa45   :  { %6788 = vrot.lane.b32.xlu0 %v11896_v11, %s9112_s1 }
 0xa60   :  { %6308 = vmax.xlane.f32.xlu1 %v6307_v8 }
 0xa64   :  { %6305 = vmax.xlane.f32.xlu0 %v6304_v18 }
 0xa71   :  { %6873 = vrot.lane.b32.xlu1 %v9465_v31, %s9112_s1 }
 0xa75   :  { %6960 = vrot.lane.b32.xlu1 %v9473_v34, %s9112_s1 }
 0xa7a   :  { %6875 = vrot.lane.b32.xlu0 %v9450_v22, %s9112_s1 }
 0xa7e   :  { %6962 = vrot.lane.b32.xlu0 %v9461_v30, %s9112_s1 }
 0xa92   :  { %v6267_v41 = vpop.xlane.xlu1 %6266 }
 0xa93   :  { %v6311_v19 = vsub.f32 %v11134_v40, %v6267_v41 }
 0xa94   :  { %v6264_v12 = vpop.xlane.xlu0 %6263 }
 0xa95   :  { %v6328_v3 = vmul.f32 1.442695, %v6311_v19  ;;  %v6310_v31 = vsub.f32 %v11140_v9, %v6264_v12 }
 0xa97   :  { %8903 = vpow2.f32 %v6328_v3  ;;  %v6326_v13 = vmul.f32 1.442695, %v6310_v31 }
 0xa99   :  { %8905 = vpow2.f32 %v6326_v13 }
 0xa9a   :  { %v6279_v34 = vpop.xlane.xlu1 %6278 }
 0xa9b   :  { %v6315_v22 = vsub.f32 %v11152_v61, %v6279_v34 }
 0xa9c   :  { %v6276_v48 = vpop.xlane.xlu0 %6275 }
 0xa9d   :  { %v6336_v0 = vmul.f32 1.442695, %v6315_v22  ;;  %v6314_v30 = vsub.f32 %v11156_v37, %v6276_v48 }
 0xa9f   :  { %8907 = vpow2.f32 %v6336_v0  ;;  %v6334_v27 = vmul.f32 1.442695, %v6314_v30 }
 0xaa1   :  { %8909 = vpow2.f32 %v6334_v27 }
 0xaa2   :  { %v6291_v36 = vpop.xlane.xlu1 %6290 }
 0xaa3   :  { %v6319_v40 = vsub.f32 %v11168_v32, %v6291_v36 }
 0xaa4   :  { %v11258_v5 = vpop.eup %8903  ;;  %v6273_v42 = vpop.xlane.xlu0 %6272 }
 0xaa5   :  { %v6361_v9 = vsel %vm1356_vm2, %v11258_v5, 0.0  ;;  %v6313_v61 = vsub.f32 %v11174_v20, %v6273_v42  ;;  %v6344_v25 = vmul.f32 1.442695, %v6319_v40 }
 0xaa6   :  { %v11263_v28 = vpop.eup %8905  ;;  %6362 = vadd.xlane.f32.xlu1 %v6361_v9 }
 0xaa7   :  { %v6358_v37 = vsel %vm1356_vm2, %v11263_v28, 0.0  ;;  %v6332_v11 = vmul.f32 1.442695, %v6313_v61 }
 0xaa8   :  { %6359 = vadd.xlane.f32.xlu0 %v6358_v37  ;;  %v6270_v55 = vpop.xlane.xlu0 %6269 }
 0xaa9   :  { %8911 = vpow2.f32 %v6332_v11  ;;  %v6312_v45 = vsub.f32 %v11179_v7, %v6270_v55 }
 0xaaa   :  { %8913 = vpow2.f32 %v6344_v25 }
 0xaab   :  { %v6330_v56 = vmul.f32 1.442695, %v6312_v45 }
 0xaac   :  { %v11269_v32 = vpop.eup %8907  ;;  %v6285_v15 = vpop.xlane.xlu1 %6284 }
 0xaad   :  { %v6288_v60 = vpop.xlane.xlu0 %6287  ;;  %v6373_v20 = vsel %vm1356_vm2, %v11269_v32, 0.0  ;;  %8915 = vpow2.f32 %v6330_v56  ;;  %v6317_v8 = vsub.f32 %v11191_v58, %v6285_v15 }
 0xaae   :  { %v11273_v44 = vpop.eup %8909  ;;  %v6318_v18 = vsub.f32 %v11184_v35, %v6288_v60  ;;  %6374 = vadd.xlane.f32.xlu1 %v6373_v20 }
 0xaaf   :  { %v6370_v7 = vsel %vm1356_vm2, %v11273_v44, 0.0  ;;  %v6340_v41 = vmul.f32 1.442695, %v6317_v8 }
 0xab0   :  { %v6342_v19 = vmul.f32 1.442695, %v6318_v18  ;;  %6371 = vadd.xlane.f32.xlu0 %v6370_v7  ;;  %v6303_v12 = vpop.xlane.xlu1 %6302 }
 0xab1   :  { %v6282_v3 = vpop.xlane.xlu0 %6281  ;;  %8917 = vpow2.f32 %v6340_v41  ;;  %v6323_v31 = vsub.f32 %v11197_v62, %v6303_v12 }
 0xab2   :  { %v6316_v13 = vsub.f32 %v11201_v47, %v6282_v3  ;;  %8919 = vpow2.f32 %v6342_v19 }
 0xab3   :  { %v6352_v34 = vmul.f32 1.442695, %v6323_v31 }
 0xab4   :  { %v6338_v22 = vmul.f32 1.442695, %v6316_v13  ;;  %v6297_v58 = vpop.xlane.xlu1 %6296 }
 0xab5   :  { %v6300_v48 = vpop.xlane.xlu0 %6299  ;;  %8921 = vpow2.f32 %v6352_v34  ;;  %v6321_v35 = vsub.f32 %v11214_v6, %v6297_v58 }
 0xab6   :  { %v6322_v0 = vsub.f32 %v11206_v16, %v6300_v48  ;;  %v11283_v30 = vpop.eup %8911  ;;  %8923 = vpow2.f32 %v6338_v22 }
 0xab7   :  { %v6348_v27 = vmul.f32 1.442695, %v6321_v35  ;;  %v6367_v62 = vsel %vm1356_vm2, %v11283_v30, 0.0  ;;  %v11287_v40 = vpop.eup %8913 }
 0xab8   :  { %v6350_v36 = vmul.f32 1.442695, %v6322_v0  ;;  %6368 = vadd.xlane.f32.xlu1 %v6367_v62  ;;  %v6385_v16 = vsel %vm1356_vm2, %v11287_v40, 0.0  ;;  %v11324_v19 = vpop.permute.xlu1 %6786 }
 0xab9   :  { %v6294_v47 = vpop.xlane.xlu0 %6293  ;;  %8925 = vpow2.f32 %v6348_v27 }
 0xaba   :  { %v6320_v42 = vsub.f32 %v11218_v29, %v6294_v47  ;;  %v11290_v9 = vpop.eup %8915  ;;  %8927 = vpow2.f32 %v6350_v36  ;;  %v11901_v36 = vld [vmem:[#allocation29_spill] sm:$0xff] }
 0xabb   :  { %v6364_v61 = vsel %vm1356_vm2, %v11290_v9, 0.0 }
 0xabc   :  { %v6346_v6 = vmul.f32 1.442695, %v6320_v42  ;;  %6386 = vadd.xlane.f32.xlu1 %v6385_v16  ;;  %6365 = vadd.xlane.f32.xlu0 %v6364_v61  ;;  %v11908_v61 = vld [vmem:[#allocation24_spill] sm:$0xff] }
 0xabd   :  { %v11326_v12 = vpop.permute.xlu0 %6788 }
 0xabe   :  { %8929 = vpow2.f32 %v6346_v6  ;;  %v11296_v37 = vpop.eup %8917  ;;  %v11906_v6 = vld [vmem:[#allocation32_spill] sm:$0xff] }
 0xabf   :  { %v11298_v25 = vpop.eup %8919  ;;  %v6379_v29 = vsel %vm1356_vm2, %v11296_v37, 0.0 }
 0xac0   :  { %6380 = vadd.xlane.f32.xlu1 %v6379_v29  ;;  %v6382_v11 = vsel %vm1356_vm2, %v11298_v25, 0.0 }
 0xac1   :  { %6383 = vadd.xlane.f32.xlu0 %v6382_v11 }
 0xac2   :  { %v11304_v55 = vpop.eup %8921 }
 0xac3   :  { %v11306_v45 = vpop.eup %8923  ;;  %v6397_v56 = vsel %vm1356_vm2, %v11304_v55, 0.0 }
 0xac4   :  { %6398 = vadd.xlane.f32.xlu1 %v6397_v56  ;;  %v6376_v15 = vsel %vm1356_vm2, %v11306_v45, 0.0  ;;  %v11910_v56 = vld [vmem:[#allocation53_spill] sm:$0xff] }
 0xac5   :  { %6377 = vadd.xlane.f32.xlu0 %v6376_v15 }
 0xac6   :  { %v11312_v60 = vpop.eup %8925 }
 0xac7   :  { %v11314_v20 = vpop.eup %8927  ;;  %v6391_v8 = vsel %vm1356_vm2, %v11312_v60, 0.0 }
 0xac8   :  { %6392 = vadd.xlane.f32.xlu1 %v6391_v8  ;;  %v6394_v18 = vsel %vm1356_vm2, %v11314_v20, 0.0 }
 0xac9   :  { %6395 = vadd.xlane.f32.xlu0 %v6394_v18 }
 0xacb   :  { %v11320_v7 = vpop.eup %8929 }
 0xacc   :  { %v6388_v41 = vsel %vm1356_vm2, %v11320_v7, 0.0 }
 0xacd   :  { %6389 = vadd.xlane.f32.xlu0 %v6388_v41  ;;  %v11911_v41 = vld [vmem:[#allocation30_spill] sm:$0xff] }
 0xae9   :  { %v6309_v3 = vpop.xlane.xlu1 %6308 }
 0xaea   :  { %v6325_v31 = vsub.f32 %v11232_v51, %v6309_v3  ;;  %v11899_v51 = vld [vmem:[#allocation18_spill] sm:$0xff] }
 0xaec   :  { %v6356_v13 = vmul.f32 1.442695, %v6325_v31  ;;  %v11913_v31 = vld [vmem:[#allocation54_spill] sm:$0xff] }
 0xaed   :  { %v6306_v34 = vpop.xlane.xlu0 %6305 }
 0xaee   :  { %8931 = vpow2.f32 %v6356_v13  ;;  %v6324_v22 = vsub.f32 %v11236_v39, %v6306_v34  ;;  %v11900_v39 = vld [vmem:[#allocation27_spill] sm:$0xff] }
 0xaf0   :  { %v6354_v58 = vmul.f32 1.442695, %v6324_v22 }
 0xaf1   :  { %v11360_v62 = vpop.permute.xlu0 %6875 }
 0xaf2   :  { %8933 = vpow2.f32 %v6354_v58 }
 0xafb   :  { %v11330_v48 = vpop.eup %8931 }
 0xafc   :  { %v6403_v35 = vsel %vm1356_vm2, %v11330_v48, 0.0 }
 0xafd   :  { %6404 = vadd.xlane.f32.xlu0 %v6403_v35 }
 0xaff   :  { %v11334_v0 = vpop.eup %8933 }
 0xb00   :  { %v6400_v27 = vsel %vm1356_vm2, %v11334_v0, 0.0 }
 0xb01   :  { %6401 = vadd.xlane.f32.xlu1 %v6400_v27 }
 0xb12   :  { %7047 = vrot.lane.b32.xlu1 %v9479_v38, %s9112_s1  ;;  %v11902_v38 = vld [vmem:[#allocation35_spill] sm:$0xff] }
 0xb13   :  { %7049 = vrot.lane.b32.xlu0 %v9469_v33, %s9112_s1  ;;  %v11358_v33 = vpop.permute.xlu1 %6873 }
 0xb16   :  { %7152 = vrot.lane.b32.xlu1 %v11899_v51, %s9098_s15 }
 0xb17   :  { %7150 = vrot.lane.b32.xlu0 %v11900_v39, %s9098_s15  ;;  %v11366_v47 = vpop.permute.xlu1 %6960 }
 0xb1a   :  { %7216 = vrot.lane.b32.xlu1 %v11106_v49, %s9113_s25  ;;  %v11903_v49 = vld [vmem:[#allocation41_spill] sm:$0xff] }
 0xb1b   :  { %7214 = vrot.lane.b32.xlu0 %v11108_v1, %s9113_s25  ;;  %v11904_v1 = vld [vmem:[#allocation23_spill] sm:$0xff] }
 0xb1e   :  { %7156 = vrot.lane.b32.xlu1 %v11901_v36, %s9098_s15 }
 0xb1f   :  { %7154 = vrot.lane.b32.xlu0 %v11902_v38, %s9098_s15 }
 0xb22   :  { %7220 = vrot.lane.b32.xlu1 %v11120_v10, %s9113_s25  ;;  %v11372_v10 = vpop.permute.xlu0 %6962 }
 0xb23   :  { %7218 = vrot.lane.b32.xlu0 %v11126_v26, %s9113_s25  ;;  %v11905_v26 = vld [vmem:[#allocation37_spill] sm:$0xff] }
 0xb26   :  { %7160 = vrot.lane.b32.xlu1 %v11903_v49, %s9098_s15 }
 0xb27   :  { %7158 = vrot.lane.b32.xlu0 %v11904_v1, %s9098_s15 }
 0xb2a   :  { %7224 = vrot.lane.b32.xlu1 %v11110_v23, %s9113_s25  ;;  %v11907_v23 = vld [vmem:[#allocation34_spill] sm:$0xff] }
 0xb2b   :  { %7222 = vrot.lane.b32.xlu0 %v11112_v52, %s9113_s25 }
 0xb2e   :  { %7164 = vrot.lane.b32.xlu1 %v11905_v26, %s9098_s15 }
 0xb2f   :  { %v6363_v42 = vpop.xlane.xlu1 %6362  ;;  %7162 = vrot.lane.b32.xlu0 %v11906_v6, %s9098_s15 }
 0xb30   :  { %8935 = vrcp.f32 %v6363_v42 }
 0xb31   :  { %v6360_v16 = vpop.xlane.xlu0 %6359 }
 0xb32   :  { %8937 = vrcp.f32 %v6360_v16  ;;  %7228 = vrot.lane.b32.xlu1 %v11130_v53, %s9113_s25 }
 0xb33   :  { %7226 = vrot.lane.b32.xlu0 %v11137_v17, %s9113_s25  ;;  %v11909_v17 = vld [vmem:[#allocation31_spill] sm:$0xff] }
 0xb36   :  { %7168 = vrot.lane.b32.xlu1 %v11907_v23, %s9098_s15  ;;  %v11915_v23 = vld [vmem:[#allocation48_spill] sm:$0xff] }
 0xb37   :  { %v6375_v52 = vpop.xlane.xlu1 %6374  ;;  %7166 = vrot.lane.b32.xlu0 %v11908_v61, %s9098_s15 }
 0xb38   :  { %8939 = vrcp.f32 %v6375_v52 }
 0xb39   :  { %v6372_v29 = vpop.xlane.xlu0 %6371 }
 0xb3a   :  { %8941 = vrcp.f32 %v6372_v29  ;;  %7232 = vrot.lane.b32.xlu1 %v11114_v2, %s9113_s25 }
 0xb3b   :  { %7230 = vrot.lane.b32.xlu0 %v11116_v24, %s9113_s25 }
 0xb3d   :  { %v8936_v53 = vpop.eup %8935 }
 0xb3e   :  { %7172 = vrot.lane.b32.xlu1 %v11909_v17, %s9098_s15  ;;  %v6423_v8 = vmul.f32 %v8936_v53, %v11258_v5  ;;  %v11916_v17 = vld [vmem:[#allocation44_spill] sm:$0xff] }
 0xb3f   :  { %v8938_v11 = vpop.eup %8937  ;;  %7170 = vrot.lane.b32.xlu0 %v11910_v56, %s9098_s15 }
 0xb40   :  { %v6422_v15 = vmul.f32 %v8938_v11, %v11263_v28 }
 0xb41   :  { %v6369_v18 = vpop.xlane.xlu1 %6368 }
 0xb42   :  { %8566 = vmatprep.mubr.msk.f32.mxu0 %vm1356_vm2, %v6422_v15  ;;  %7236 = vrot.lane.b32.xlu1 %v11144_v46, %s9113_s25  ;;  %8943 = vrcp.f32 %v6369_v18  ;;  %v11912_v46 = vld [vmem:[#allocation26_spill] sm:$0xff] }
 0xb43   :  { %8567 = vmatmul.mubr.msk.f32.vlgmr.msra.gmra.mxu0 %vm1356_vm2, %v6423_v8  ;;  %7234 = vrot.lane.b32.xlu0 %v11149_v59, %s9113_s25  ;;  %v11917_v18 = vld [vmem:[#allocation38_spill] sm:$0xff] }
 0xb44   :  { %8577 = vmatpush3.msra.mxu0 %v11094_v63 }
 0xb45   :  { %8578 = vmatprep.subr.mxu0 %v11250_v54  ;;  %v8940_v2 = vpop.eup %8939  ;;  %v6387_v24 = vpop.xlane.xlu1 %6386 }
 0xb46   :  { %8579 = vmatpush3.msra.mxu0 %v11250_v54  ;;  %v6366_v5 = vpop.xlane.xlu0 %6365  ;;  %7176 = vrot.lane.b32.xlu1 %v11911_v41, %s9098_s15  ;;  %v6427_v59 = vmul.f32 %v8940_v2, %v11269_v32  ;;  %v7376_v41 = vld [vmem:[#allocation10 + $0x8] sm:$0xff] }
 0xb47   :  { %v8942_v28 = vpop.eup %8941  ;;  %8590 = vmatprep.subr.mxu0 %v11326_v12  ;;  %8945 = vrcp.f32 %v6366_v5  ;;  %7174 = vrot.lane.b32.xlu0 %v11912_v46, %s9098_s15  ;;  %v7378_v5 = vld [vmem:[#allocation10 + $0x18] sm:$0xff]  ;;  %v7375_v46 = vld [vmem:[#allocation10] sm:$0xff] }
 0xb48   :  { %v6426_v63 = vmul.f32 %v8942_v28, %v11273_v44  ;;  %8947 = vrcp.f32 %v6387_v24  ;;  %v7377_v28 = vld [vmem:[#allocation10 + $0x10] sm:$0xff] }
 0xb49   :  { %v6381_v3 = vpop.xlane.xlu1 %6380 }
 0xb4a   :  { %8580 = vmatprep.mubr.msk.f32.mxu0 %vm1356_vm2, %v6426_v63  ;;  %v6384_v54 = vpop.xlane.xlu0 %6383  ;;  %7240 = vrot.lane.b32.xlu1 %v11118_v21, %s9113_s25  ;;  %v11914_v21 = vld [vmem:[#allocation56_spill] sm:$0xff] }
 0xb4b   :  { %8581 = vmatmul.mubr.msk.f32.vlgmr.msra.gmra.mxu0 %vm1356_vm2, %v6427_v59  ;;  %8949 = vrcp.f32 %v6384_v54  ;;  %7238 = vrot.lane.b32.xlu0 %v11122_v50, %s9113_s25 }
 0xb4c   :  { %8591 = vmatpush3.msra.mxu0 %v11326_v12  ;;  %8951 = vrcp.f32 %v6381_v3 }
 0xb4d   :  { %8592 = vmatprep.subr.mxu0 %v11324_v19  ;;  %v6399_v44 = vpop.xlane.xlu1 %6398 }
 0xb4e   :  { %8593 = vmatpush3.msra.mxu0 %v11324_v19  ;;  %v6378_v32 = vpop.xlane.xlu0 %6377  ;;  %7180 = vrot.lane.b32.xlu1 %v11913_v31, %s9098_s15 }
 0xb4f   :  { %8604 = vmatprep.subr.mxu0 %v11372_v10  ;;  %8953 = vrcp.f32 %v6378_v32  ;;  %7178 = vrot.lane.b32.xlu0 %v11914_v21, %s9098_s15  ;;  %v8944_v13 = vpop.eup %8943 }
 0xb50   :  { %8955 = vrcp.f32 %v6399_v44  ;;  %v6425_v58 = vmul.f32 %v8944_v13, %v11283_v30 }
 0xb51   :  { %v6393_v12 = vpop.xlane.xlu1 %6392 }
 0xb52   :  { %v6396_v50 = vpop.xlane.xlu0 %6395 }
 0xb53   :  { %8957 = vrcp.f32 %v6396_v50 }
 0xb54   :  { %v8946_v34 = vpop.eup %8945  ;;  %8959 = vrcp.f32 %v6393_v12 }
 0xb55   :  { %v6424_v22 = vmul.f32 %v8946_v34, %v11290_v9  ;;  %v8948_v35 = vpop.eup %8947 }
 0xb56   :  { %v6390_v19 = vpop.xlane.xlu0 %6389  ;;  %v6431_v39 = vmul.f32 %v8948_v35, %v11287_v40 }
 0xb57   :  { %8961 = vrcp.f32 %v6390_v19  ;;  %8573 = vmatprep.mubr.msk.f32.mxu1 %vm1356_vm2, %v6424_v22 }
 0xb58   :  { %v8950_v27 = vpop.eup %8949  ;;  %8574 = vmatmul.mubr.msk.f32.vlgmr.msra.gmra.mxu1 %vm1356_vm2, %v6425_v58 }
 0xb59   :  { %8584 = vmatpush3.msra.mxu1 %v11103_v43  ;;  %v6430_v51 = vmul.f32 %v8950_v27, %v11298_v25  ;;  %v8952_v9 = vpop.eup %8951 }
 0xb5a   :  { %8585 = vmatprep.subr.mxu1 %v11252_v14  ;;  %v6429_v25 = vmul.f32 %v8952_v9, %v11296_v37 }
 0xb5b   :  { %8586 = vmatpush3.msra.mxu1 %v11252_v14  ;;  %8594 = vmatprep.mubr.msk.f32.mxu0 %vm1356_vm2, %v6430_v51 }
 0xb5c   :  { %v8954_v30 = vpop.eup %8953  ;;  %8597 = vmatprep.subr.mxu1 %v11360_v62  ;;  %8595 = vmatmul.mubr.msk.f32.vlgmr.msra.gmra.mxu0 %vm1356_vm2, %v6431_v39 }
 0xb5d   :  { %8605 = vmatpush3.msra.mxu0 %v11372_v10  ;;  %v6428_v43 = vmul.f32 %v8954_v30, %v11306_v45  ;;  %v8956_v36 = vpop.eup %8955 }
 0xb5e   :  { %8606 = vmatprep.subr.mxu0 %v11366_v47  ;;  %v6435_v45 = vmul.f32 %v8956_v36, %v11304_v55 }
 0xb5f   :  { %8607 = vmatpush3.msra.mxu0 %v11366_v47  ;;  %8587 = vmatprep.mubr.msk.f32.mxu1 %vm1356_vm2, %v6428_v43 }
 0xb60   :  { %v8958_v14 = vpop.eup %8957  ;;  %8588 = vmatmul.mubr.msk.f32.vlgmr.msra.gmra.mxu1 %vm1356_vm2, %v6429_v25  ;;  %8618 = vmatprep.subr.mxu0 %v7378_v5 }
 0xb61   :  { %8598 = vmatpush3.msra.mxu1 %v11360_v62  ;;  %v6434_v40 = vmul.f32 %v8958_v14, %v11314_v20  ;;  %v8960_v38 = vpop.eup %8959 }
 0xb62   :  { %8599 = vmatprep.subr.mxu1 %v11358_v33  ;;  %v6433_v1 = vmul.f32 %v8960_v38, %v11312_v60 }
 0xb63   :  { %8600 = vmatpush3.msra.mxu1 %v11358_v33  ;;  %8608 = vmatprep.mubr.msk.f32.mxu0 %vm1356_vm2, %v6434_v40 }
 0xb64   :  { %v8962_v37 = vpop.eup %8961  ;;  %8609 = vmatmul.mubr.msk.f32.vlgmr.msra.gmra.mxu0 %vm1356_vm2, %v6435_v45 }
 0xb65   :  { %v6432_v49 = vmul.f32 %v8962_v37, %v11320_v7  ;;  %8619 = vmatpush3.msra.mxu0 %v7378_v5 }
 0xb66   :  { %8620 = vmatprep.subr.mxu0 %v7377_v28 }
 0xb67   :  { %8601 = vmatprep.mubr.msk.f32.mxu1 %vm1356_vm2, %v6432_v49  ;;  %8621 = vmatpush3.msra.mxu0 %v7377_v28 }
 0xb68   :  { %8602 = vmatmul.mubr.msk.f32.vlgmr.msra.gmra.mxu1 %vm1356_vm2, %v6433_v1  ;;  %8622 = vmatprep.subr.mxu0 %v7376_v41 }
 0xb69   :  { %8623 = vmatpush3.msra.mxu0 %v7376_v41 }
 0xb6a   :  { %8624 = vmatprep.subr.mxu0 %v7375_v46 }
 0xb6b   :  { %8625 = vmatpush3.msra.mxu0 %v7375_v46 }
 0xb86   :  { %v6405_v20 = vpop.xlane.xlu0 %6404 }
 0xb87   :  { %8963 = vrcp.f32 %v6405_v20 }
 0xb8a   :  { %v6402_v62 = vpop.xlane.xlu1 %6401  ;;  %v7050_v55 = vpop.permute.xlu0 %7049 }
 0xb8b   :  { %8965 = vrcp.f32 %v6402_v62  ;;  %8611 = vmatprep.subr.mxu1 %v7050_v55 }
 0xb8c   :  { %8612 = vmatpush3.msra.mxu1 %v7050_v55 }
 0xb8e   :  { %v7048_v33 = vpop.permute.xlu1 %7047  ;;  %v11456_v47 = vpop.permute.xlu0 %7150 }
 0xb8f   :  { %8613 = vmatprep.subr.mxu1 %v7048_v33 }
 0xb90   :  { %8614 = vmatpush3.msra.mxu1 %v7048_v33  ;;  %v11918_v33 = vld [vmem:[#allocation52_spill] sm:$0xff] }
 0xb92   :  { %v11458_v10 = vpop.permute.xlu1 %7152  ;;  %v11460_v7 = vpop.permute.xlu0 %7214 }
 0xb94   :  { %v8964_v42 = vpop.eup %8963 }
 0xb95   :  { %v6437_v53 = vmul.f32 %v8964_v42, %v11330_v48 }
 0xb96   :  { %v11462_v60 = vpop.permute.xlu1 %7216  ;;  %v7155_v26 = vpop.permute.xlu0 %7154 }
 0xb97   :  { %v7328_v52 = vsel %vm601_vm1, %v11915_v23, %v7155_v26  ;;  %v7326_v26 = vsel %vm601_vm1, %v11918_v33, %v11456_v47 }
 0xb98   :  { %v8966_v6 = vpop.eup %8965  ;;  %v7342_v23 = vsel %vm1356_vm2, %v7326_v26, %v11460_v7 }
 0xb99   :  { %v6436_v16 = vmul.f32 %v8966_v6, %v11334_v0  ;;  %v11919_v6 = vld [vmem:[#allocation17_spill] sm:$0xff] }
 0xb9a   :  { %v7157_v61 = vpop.permute.xlu1 %7156  ;;  %v7219_v29 = vpop.permute.xlu0 %7218 }
 0xb9b   :  { %v11469_v11 = vsel %vm1356_vm2, %v7328_v52, %v7219_v29  ;;  %8615 = vmatprep.mubr.msk.f32.mxu1 %vm1356_vm2, %v6436_v16  ;;  %v7329_v56 = vsel %vm601_vm1, %v11916_v17, %v7157_v61  ;;  %v7327_v16 = vsel %vm601_vm1, %v11919_v6, %v11458_v10  ;;  %v11920_v10 = vld [vmem:[#allocation43_spill] sm:$0xff]  ;;  %v11929_v6 = vld [vmem:[#allocation22_spill] sm:$0xff] }
 0xb9c   :  { %8616 = vmatmul.mubr.msk.f32.vlgmr.msra.gmra.mxu1 %vm1356_vm2, %v6437_v53  ;;  %v7343_v61 = vsel %vm1356_vm2, %v7327_v16, %v11462_v60 }
 0xb9e   :  { %v7221_v15 = vpop.permute.xlu1 %7220  ;;  %v7159_v58 = vpop.permute.xlu0 %7158 }
 0xb9f   :  { %v11476_v0 = vsel %vm1356_vm2, %v7329_v56, %v7221_v15 }
 0xba2   :  { %v7161_v8 = vpop.permute.xlu1 %7160  ;;  %v7223_v35 = vpop.permute.xlu0 %7222 }
 0xba3   :  { %v7331_v2 = vsel %vm601_vm1, %v11917_v18, %v7161_v8  ;;  %v7330_v8 = vsel %vm601_vm1, %v11920_v10, %v7159_v58 }
 0xba4   :  { %v7346_v60 = vsel %vm1356_vm2, %v7330_v8, %v7223_v35  ;;  %v11925_v35 = vld [vmem:[#allocation45_spill] sm:$0xff] }
 0xba6   :  { %v7225_v24 = vpop.permute.xlu1 %7224  ;;  %v7163_v51 = vpop.permute.xlu0 %7162 }
 0xba7   :  { %v11481_v48 = vsel %vm1356_vm2, %v7331_v2, %v7225_v24 }
 0xbaa   :  { %v7165_v27 = vpop.permute.xlu1 %7164  ;;  %v7227_v9 = vpop.permute.xlu0 %7226 }
 0xbae   :  { %v7229_v39 = vpop.permute.xlu1 %7228  ;;  %v7167_v43 = vpop.permute.xlu0 %7166 }
 0xbb2   :  { %v7169_v30 = vpop.permute.xlu1 %7168  ;;  %v7231_v36 = vpop.permute.xlu0 %7230 }
 0xbb6   :  { %v7233_v25 = vpop.permute.xlu1 %7232  ;;  %v7171_v40 = vpop.permute.xlu0 %7170 }
 0xbba   :  { %v11501_v14 = vpop.permute.xlu1 %7172  ;;  %v7235_v38 = vpop.permute.xlu0 %7234 }
 0xbbe   :  { %v7175_v49 = vpop.permute.xlu0 %7174 }
 0xbc2   :  { %v7239_v20 = vpop.permute.xlu0 %7238 }
 0xbc6   :  { %v11511_v55 = vpop.permute.xlu0 %7178 }
 0xbc7   :  { %v7340_v16 = vsel %vm601_vm1, %v11929_v6, %v11511_v55  ;;  %v7825_v55 = vld [vmem:[%s11629_s8] ss:$0 sm:$0xff]  ;;  %s9115_s8 = smov [#allocation11]  }
 0xbc8   :  { %s7600_s28 = sshll.u32 %s9115_s8, 4  ;;  %s7601_s28 = int_to_ptr.vmem [resolvable:$true] %s7600_s28 }
 0xbc9   :  { %s9067_s29 = scalar_lea.vmem %s7601_s28, 2048  ;;  %p9072_p12 = scmp.lt.s32.totalorder %s7601_s28, %s7601_s28 }
 0xbca   :  { %p9068_p11 = scmp.ne.s32.totalorder %s7601_s28, %s9067_s29  ;;  %p9073_p13 = scmp.lt.s32.totalorder %s9067_s29, %s9067_s29 }
 0xbcc   :  { %p9074_p0 = por %p9073_p13, %p9072_p12 }
 0xbce   :  { %p9075_p1 = pnand %p9074_p0, %p9068_p11 }
 0xc03   :  { %v8568_v63 = vpop.f32.mrf.mxu0 }
 0xc04   :  { %7280 = vrot.lane.b32.xlu1 %v8568_v63, %s9114_s26 }
 0xc05   :  { %v6516_v59 = vpop.f32.mrf.mxu0 }
 0xc06   :  { %7278 = vrot.lane.b32.xlu0 %v6516_v59, %s9114_s26 }
 0xc0b   :  { %v8582_v3 = vpop.f32.mrf.mxu0 }
 0xc0c   :  { %7288 = vrot.lane.b32.xlu1 %v8582_v3, %s9114_s26 }
 0xc0d   :  { %v6690_v54 = vpop.f32.mrf.mxu0 }
 0xc0e   :  { %7286 = vrot.lane.b32.xlu0 %v6690_v54, %s9114_s26 }
 0xc18   :  { %v8575_v44 = vpop.f32.mrf.mxu1 }
 0xc19   :  { %7284 = vrot.lane.b32.xlu1 %v8575_v44, %s9114_s26  ;;  %v11923_v44 = vld [vmem:[#allocation40_spill] sm:$0xff] }
 0xc1a   :  { %v6603_v32 = vpop.f32.mrf.mxu1 }
 0xc1b   :  { %7282 = vrot.lane.b32.xlu0 %v6603_v32, %s9114_s26  ;;  %v7334_v32 = vsel %vm601_vm1, %v11923_v44, %v7167_v43 }
 0xc1c   :  { %v8596_v31 = vpop.f32.mrf.mxu0 }
 0xc1d   :  { %7296 = vrot.lane.b32.xlu1 %v8596_v31, %s9114_s26 }
 0xc1e   :  { %v6864_v21 = vpop.f32.mrf.mxu0 }
 0xc1f   :  { %7294 = vrot.lane.b32.xlu0 %v6864_v21, %s9114_s26 }
 0xc20   :  { %v8589_v50 = vpop.f32.mrf.mxu1 }
 0xc21   :  { %7292 = vrot.lane.b32.xlu1 %v8589_v50, %s9114_s26 }
 0xc22   :  { %v6777_v13 = vpop.f32.mrf.mxu1 }
 0xc23   :  { %7290 = vrot.lane.b32.xlu0 %v6777_v13, %s9114_s26 }
 0xc24   :  { %v8610_v12 = vpop.f32.mrf.mxu0 }
 0xc25   :  { %7304 = vrot.lane.b32.xlu1 %v8610_v12, %s9114_s26  ;;  %v11924_v12 = vld [vmem:[#allocation39_spill] sm:$0xff] }
 0xc26   :  { %v7038_v34 = vpop.f32.mrf.mxu0 }
 0xc27   :  { %7302 = vrot.lane.b32.xlu0 %v7038_v34, %s9114_s26  ;;  %v7335_v34 = vsel %vm601_vm1, %v11924_v12, %v7169_v30 }
 0xc28   :  { %v8603_v22 = vpop.f32.mrf.mxu1 }
 0xc29   :  { %7300 = vrot.lane.b32.xlu1 %v8603_v22, %s9114_s26 }
 0xc2a   :  { %v6951_v19 = vpop.f32.mrf.mxu1 }
 0xc2b   :  { %7298 = vrot.lane.b32.xlu0 %v6951_v19, %s9114_s26  ;;  %v7351_v19 = vsel %vm1356_vm2, %v7335_v34, %v7233_v25 }
 0xc2d   :  { %7244 = vrot.lane.b32.xlu1 %v11158_v4, %s9113_s25 }
 0xc2f   :  { %7242 = vrot.lane.b32.xlu0 %v11164_v57, %s9113_s25  ;;  %v7237_v57 = vpop.permute.xlu1 %7236 }
 0xc33   :  { %v11505_v37 = vpop.permute.xlu1 %7176 }
 0xc37   :  { %v11507_v1 = vpop.permute.xlu1 %7240 }
 0xc3b   :  { %v11509_v62 = vpop.permute.xlu1 %7180 }
 0xc5c   :  { %v8617_v45 = vpop.f32.mrf.mxu1 }
 0xc5d   :  { %7308 = vrot.lane.b32.xlu1 %v8617_v45, %s9114_s26  ;;  %v11927_v45 = vld [vmem:[#allocation46_spill] sm:$0xff] }
 0xc5e   :  { %v7125_v4 = vpop.f32.mrf.mxu1  ;;  %v7338_v25 = vsel %vm601_vm1, %v11927_v45, %v7175_v49 }
 0xc5f   :  { %7306 = vrot.lane.b32.xlu0 %v7125_v4, %s9114_s26  ;;  %v7354_v33 = vsel %vm1356_vm2, %v7338_v25, %v7239_v20 }
 0xc76   :  { %v7281_v42 = vpop.permute.xlu1 %7280 }
 0xc77   :  { %v7360_v53 = vsel %vm7358_vm3, %v7343_v61, %v7281_v42 }
 0xc78   :  { %v7279_v52 = vpop.permute.xlu0 %7278 }
 0xc79   :  { %v7359_v29 = vsel %vm7358_vm3, %v7342_v23, %v7279_v52  ;;  %v11930_v52 = vld [vmem:[#allocation51_spill] sm:$0xff] }
 0xc7a   :  { %8626 = vmatprep.mubr.msk.f32.mxu0 %vm119_vm0, %v7359_v29 }
 0xc7b   :  { %8627 = vmatmul.mubr.msk.f32.vlgmr.msra.gmra.mxu0 %vm119_vm0, %v7360_v53 }
 0xc7e   :  { %v7289_v47 = vpop.permute.xlu1 %7288 }
 0xc7f   :  { %v7364_v28 = vsel %vm7358_vm3, %v11481_v48, %v7289_v47  ;;  %v7350_v48 = vsel %vm1356_vm2, %v7334_v32, %v7231_v36 }
 0xc80   :  { %v7287_v17 = vpop.permute.xlu0 %7286 }
 0xc81   :  { %v7363_v24 = vsel %vm7358_vm3, %v7346_v60, %v7287_v17 }
 0xc8b   :  { %v7285_v56 = vpop.permute.xlu1 %7284 }
 0xc8c   :  { %v7362_v18 = vsel %vm7358_vm3, %v11476_v0, %v7285_v56  ;;  %v11922_v0 = vld [vmem:[#allocation47_spill] sm:$0xff] }
 0xc8d   :  { %v7283_v15 = vpop.permute.xlu0 %7282  ;;  %v7333_v63 = vsel %vm601_vm1, %v11922_v0, %v7165_v27  ;;  %v7336_v27 = vsel %vm601_vm1, %v11925_v35, %v7171_v40 }
 0xc8e   :  { %v7361_v7 = vsel %vm7358_vm3, %v11469_v11, %v7283_v15  ;;  %v11921_v11 = vld [vmem:[#allocation49_spill] sm:$0xff]  ;;  %v7349_v54 = vsel %vm1356_vm2, %v7333_v63, %v7229_v39  ;;  %v11926_v39 = vld [vmem:[#allocation50_spill] sm:$0xff]  ;;  %v7352_v43 = vsel %vm1356_vm2, %v7336_v27, %v7235_v38 }
 0xc8f   :  { %v7297_v2 = vpop.permute.xlu1 %7296  ;;  %8629 = vmatprep.mubr.msk.f32.mxu0 %vm119_vm0, %v7361_v7  ;;  %v7332_v46 = vsel %vm601_vm1, %v11921_v11, %v7163_v51 }
 0xc90   :  { %8630 = vmatmul.mubr.msk.f32.gmra.mxu0 %vm119_vm0, %v7362_v18  ;;  %v7348_v59 = vsel %vm1356_vm2, %v7332_v46, %v7227_v9  ;;  %v7368_v58 = vsel %vm7358_vm3, %v7351_v19, %v7297_v2  ;;  %v7337_v9 = vsel %vm601_vm1, %v11926_v39, %v11501_v14  ;;  %v11928_v14 = vld [vmem:[#allocation42_spill] sm:$0xff] }
 0xc91   :  { %8632 = vmatprep.mubr.msk.f32.mxu0 %vm119_vm0, %v7363_v24  ;;  %v7295_v5 = vpop.permute.xlu0 %7294  ;;  %v7353_v36 = vsel %vm1356_vm2, %v7337_v9, %v7237_v57  ;;  %v7339_v38 = vsel %vm601_vm1, %v11928_v14, %v11505_v37  ;;  %v7341_v37 = vsel %vm601_vm1, %v11930_v52, %v11509_v62 }
 0xc92   :  { %v7367_v13 = vsel %vm7358_vm3, %v7350_v48, %v7295_v5  ;;  %v7355_v57 = vsel %vm1356_vm2, %v7339_v38, %v11507_v1 }
 0xc93   :  { %v7293_v41 = vpop.permute.xlu1 %7292 }
 0xc94   :  { %8633 = vmatmul.mubr.msk.f32.gmra.mxu0 %vm119_vm0, %v7364_v28  ;;  %v7366_v21 = vsel %vm7358_vm3, %v7349_v54, %v7293_v41 }
 0xc95   :  { %v7291_v3 = vpop.permute.xlu0 %7290 }
 0xc96   :  { %v7365_v31 = vsel %vm7358_vm3, %v7348_v59, %v7291_v3 }
 0xc97   :  { %v7305_v50 = vpop.permute.xlu1 %7304  ;;  %8635 = vmatprep.mubr.msk.f32.mxu0 %vm119_vm0, %v7365_v31 }
 0xc98   :  { %8636 = vmatmul.mubr.msk.f32.gmra.mxu0 %vm119_vm0, %v7366_v21  ;;  %v7372_v49 = vsel %vm7358_vm3, %v7355_v57, %v7305_v50 }
 0xc99   :  { %8638 = vmatprep.mubr.msk.f32.mxu0 %vm119_vm0, %v7367_v13  ;;  %v7303_v22 = vpop.permute.xlu0 %7302 }
 0xc9a   :  { %v7371_v26 = vsel %vm7358_vm3, %v7354_v33, %v7303_v22 }
 0xc9b   :  { %v7301_v51 = vpop.permute.xlu1 %7300 }
 0xc9c   :  { %8639 = vmatmul.mubr.msk.f32.gmra.mxu0 %vm119_vm0, %v7368_v58  ;;  %v7370_v40 = vsel %vm7358_vm3, %v7353_v36, %v7301_v51 }
 0xc9d   :  { %v7299_v30 = vpop.permute.xlu0 %7298 }
 0xc9e   :  { %v7369_v4 = vsel %vm7358_vm3, %v7352_v43, %v7299_v30 }
 0xc9f   :  { %8641 = vmatprep.mubr.msk.f32.mxu0 %vm119_vm0, %v7369_v4  ;;  %v7245_v20 = vpop.permute.xlu1 %7244 }
 0xca0   :  { %8642 = vmatmul.mubr.msk.f32.gmra.mxu0 %vm119_vm0, %v7370_v40  ;;  %v7357_v1 = vsel %vm1356_vm2, %v7341_v37, %v7245_v20 }
 0xca1   :  { %8644 = vmatprep.mubr.msk.f32.mxu0 %vm119_vm0, %v7371_v26  ;;  %v7243_v42 = vpop.permute.xlu0 %7242 }
 0xca2   :  { %v7356_v61 = vsel %vm1356_vm2, %v7340_v16, %v7243_v42 }
 0xca4   :  { %8645 = vmatmul.mubr.msk.f32.gmra.mxu0 %vm119_vm0, %v7372_v49 }
 0xccf   :  { %v7309_v23 = vpop.permute.xlu1 %7308 }
 0xcd0   :  { %v7374_v47 = vsel %vm7358_vm3, %v7357_v1, %v7309_v23 }
 0xcd1   :  { %v7307_v29 = vpop.permute.xlu0 %7306 }
 0xcd2   :  { %v7373_v53 = vsel %vm7358_vm3, %v7356_v61, %v7307_v29 }
 0xcd3   :  { %8647 = vmatprep.mubr.msk.f32.mxu0 %vm119_vm0, %v7373_v53 }
 0xcd4   :  { %8648 = vmatmul.mubr.msk.f32.gmra.mxu0 %vm119_vm0, %v7374_v47 }
 0xd3b   :  { %v8628_v17 = vpop.f32.mrf.mxu0 }
 0xd3c   :  { %v7506_v56 = vadd.f32 %v8628_v17, %v7825_v55 }
 0xd3d   :  { %v7500_v62 = vpop.f32.mrf.mxu0 }
 0xd3e   :  { %7580 = vst.msk [vmem:[#allocation11 + $0x8] sm:$0xff] %vm119_vm0, %v7506_v56  ;;  %v7501_v15 = vadd.f32 %v7825_v55, %v7500_v62 }
 0xd40   :  { %7579 = vst.msk [vmem:[#allocation11] sm:$0xff] %vm119_vm0, %v7501_v15 }
 0xd50   :  { %v8631_v10 = vpop.f32.mrf.mxu0 }
 0xd51   :  { %v7516_v8 = vadd.f32 %v8631_v10, %v7825_v55 }
 0xd52   :  { %v7510_v7 = vpop.f32.mrf.mxu0 }
 0xd53   :  { %7582 = vst.msk [vmem:[#allocation11 + $0x18] sm:$0xff] %vm119_vm0, %v7516_v8  ;;  %v7511_v60 = vadd.f32 %v7825_v55, %v7510_v7 }
 0xd54   :  { %v8634_v18 = vpop.f32.mrf.mxu0 }
 0xd55   :  { %7581 = vst.msk [vmem:[#allocation11 + $0x10] sm:$0xff] %vm119_vm0, %v7511_v60  ;;  %v7526_v2 = vadd.f32 %v8634_v18, %v7825_v55 }
 0xd56   :  { %v7520_v24 = vpop.f32.mrf.mxu0 }
 0xd57   :  { %7584 = vst.msk [vmem:[#allocation11 + $0x28] sm:$0xff] %vm119_vm0, %v7526_v2  ;;  %v7521_v5 = vadd.f32 %v7825_v55, %v7520_v24 }
 0xd58   :  { %v8637_v28 = vpop.f32.mrf.mxu0 }
 0xd59   :  { %7583 = vst.msk [vmem:[#allocation11 + $0x20] sm:$0xff] %vm119_vm0, %v7521_v5  ;;  %v7536_v41 = vadd.f32 %v8637_v28, %v7825_v55 }
 0xd5a   :  { %v7530_v11 = vpop.f32.mrf.mxu0 }
 0xd5b   :  { %7586 = vst.msk [vmem:[#allocation11 + $0x38] sm:$0xff] %vm119_vm0, %v7536_v41  ;;  %v7531_v46 = vadd.f32 %v7825_v55, %v7530_v11 }
 0xd5c   :  { %v8640_v0 = vpop.f32.mrf.mxu0 }
 0xd5d   :  { %7585 = vst.msk [vmem:[#allocation11 + $0x30] sm:$0xff] %vm119_vm0, %v7531_v46  ;;  %v7546_v63 = vadd.f32 %v8640_v0, %v7825_v55 }
 0xd5e   :  { %v7540_v59 = vpop.f32.mrf.mxu0 }
 0xd5f   :  { %7588 = vst.msk [vmem:[#allocation11 + $0x48] sm:$0xff] %vm119_vm0, %v7546_v63  ;;  %v7541_v3 = vadd.f32 %v7825_v55, %v7540_v59 }
 0xd60   :  { %v8643_v54 = vpop.f32.mrf.mxu0 }
 0xd61   :  { %7587 = vst.msk [vmem:[#allocation11 + $0x40] sm:$0xff] %vm119_vm0, %v7541_v3  ;;  %v7556_v44 = vadd.f32 %v8643_v54, %v7825_v55 }
 0xd62   :  { %v7550_v32 = vpop.f32.mrf.mxu0 }
 0xd63   :  { %7590 = vst.msk [vmem:[#allocation11 + $0x58] sm:$0xff] %vm119_vm0, %v7556_v44  ;;  %v7551_v31 = vadd.f32 %v7825_v55, %v7550_v32 }
 0xd64   :  { %v8646_v48 = vpop.f32.mrf.mxu0 }
 0xd65   :  { %7589 = vst.msk [vmem:[#allocation11 + $0x50] sm:$0xff] %vm119_vm0, %v7551_v31  ;;  %v7566_v21 = vadd.f32 %v8646_v48, %v7825_v55 }
 0xd66   :  { %v7560_v50 = vpop.f32.mrf.mxu0 }
 0xd67   :  { %7592 = vst.msk [vmem:[#allocation11 + $0x68] sm:$0xff] %vm119_vm0, %v7566_v21  ;;  %v7561_v13 = vadd.f32 %v7825_v55, %v7560_v50 }
 0xd69   :  { %7591 = vst.msk [vmem:[#allocation11 + $0x60] sm:$0xff] %vm119_vm0, %v7561_v13 }
 0xd94   :  { %v8649_v12 = vpop.f32.mrf.mxu0 }
 0xd95   :  { %v7576_v34 = vadd.f32 %v8649_v12, %v7825_v55 }
 0xd96   :  { %v7570_v22 = vpop.f32.mrf.mxu0 }
 0xd97   :  { %7594 = vst.msk [vmem:[#allocation11 + $0x78] sm:$0xff] %vm119_vm0, %v7576_v34  ;;  %v7571_v19 = vadd.f32 %v7825_v55, %v7570_v22 }
 0xd99   :  { %7593 = vst.msk [vmem:[#allocation11 + $0x70] sm:$0xff] %vm119_vm0, %v7571_v19 }
 0xd9a   :  { %9078 = shalt.err (!%p9075_p1)
}
 0xd9b   :  { %7606 = dma.vmem_to_hbm [thread:$0]  %s7601_s28, 2048, %s11630_s9, [#allocation4], %s9097_s14, %s9097_s14, %s9098_s15  }
 0xd9c   :  { %9093 = dma.done.wait [#allocation4], 2048  }
 0xd9d   :  { %9094 = vsyncadd [#allocation4], 4294965248 }
 0xd9e   :  { %7610 = vsyncpa [#allocation3], 1 }
 0xd9f   :  { %7611 = vsyncpa [#allocation6], 1 }
 0xda0   :  { %7612 = vsyncpa [#allocation9], 1 }
 0xda1   :  { %7613 = vsyncpa [#allocation4], 1 }

</bundles_post_ra>
